<compile_context>
chip_gen: v7x
topology: tpu7x:2x2x1
jax: 0.10.0
libtpu: 0.0.40
codegen_flags: <defaults>
</compile_context>

<pallas_src>
import functools

import jax
import jax.numpy as jnp
from jax.experimental import pallas as pl
from jax.experimental.pallas import tpu as pltpu


# -----------------------------------------------------------------------------
# Pallas kernels
# -----------------------------------------------------------------------------


def _matmul_act_kernel(a_ref, b_ref, o_ref, *, slope):
    """Single-shot (full-K) matmul tile with optional fused LeakyReLU."""
    y = jnp.dot(a_ref[...], b_ref[...], preferred_element_type=jnp.float32)
    if slope is not None:
        y = jnp.where(y > 0, y, slope * y)
    o_ref[...] = y


def _matmul_stats_kernel(a_ref, b_ref, o_ref, sum_ref, sq_ref):
    """Full-K matmul tile + fused per-column sum / sum-of-squares.

    Grid is (N_blocks, M_blocks); M (axis 1) is the stats reduction axis, so
    sum/sq output blocks stay VMEM-resident across it and accumulate.
    """
    y = jnp.dot(a_ref[...], b_ref[...], preferred_element_type=jnp.float32)
    o_ref[...] = y

    @pl.when(pl.program_id(1) == 0)
    def _():
        sum_ref[...] = jnp.zeros_like(sum_ref)
        sq_ref[...] = jnp.zeros_like(sq_ref)

    sum_ref[...] += jnp.sum(y, axis=0, keepdims=True)
    sq_ref[...] += jnp.sum(y * y, axis=0, keepdims=True)


def _bn_lrelu_kernel(x_ref, scale_ref, shift_ref, o_ref, *, slope):
    """y = leaky_relu(x * scale + shift); per-channel scale/shift broadcast."""
    y = x_ref[...] * scale_ref[...] + shift_ref[...]
    o_ref[...] = jnp.where(y > 0, y, slope * y)


# -----------------------------------------------------------------------------
# pallas_call wrappers
# -----------------------------------------------------------------------------

_TM_CAP = 512  # biggest row tile; (512, 1024) bf16 A tile = 1 MiB, VMEM-safe
_TN = 128      # Cout never exceeds 64 at these sizes; 128 = one lane width


def _round_up(x, m):
    return ((x + m - 1) // m) * m


def _pad_to(x, s0, s1):
    if x.shape == (s0, s1):
        return x
    return jnp.pad(x, ((0, s0 - x.shape[0]), (0, s1 - x.shape[1])))


def _tiling(M, K, N):
    Kp = _round_up(K, 128)
    Np = _round_up(N, _TN)
    Mp8 = _round_up(M, 8)
    tm = min(Mp8, _TM_CAP)
    Mp = _round_up(Mp8, tm)
    return Mp, Kp, Np, tm


def pallas_conv_matmul(patches, w_mat, *, slope=None):
    """(M,K)@(K,N) -> padded (Mp,Np) f32 with optional fused LeakyReLU.

    A/B are cast to bf16 (MXU-native); accumulation and output are f32.
    """
    M, K = patches.shape
    _, N = w_mat.shape
    Mp, Kp, Np, tm = _tiling(M, K, N)

    a = _pad_to(patches.astype(jnp.bfloat16), Mp, Kp)
    b = _pad_to(w_mat.astype(jnp.bfloat16), Kp, Np)

    out = pl.pallas_call(
        functools.partial(_matmul_act_kernel, slope=slope),
        out_shape=jax.ShapeDtypeStruct((Mp, Np), jnp.float32),
        grid_spec=pltpu.PrefetchScalarGridSpec(
            num_scalar_prefetch=0,
            grid=(Mp // tm, Np // _TN),
            in_specs=[
                pl.BlockSpec((tm, Kp), lambda i, j: (i, 0)),
                pl.BlockSpec((Kp, _TN), lambda i, j: (0, j)),
            ],
            out_specs=pl.BlockSpec((tm, _TN), lambda i, j: (i, j)),
        ),
        compiler_params=pltpu.CompilerParams(
            dimension_semantics=("parallel", "parallel")
        ),
    )(a, b)
    return out  # padded; caller slices once when reshaping back to NHWC


def pallas_conv_matmul_stats(patches, w_mat):
    """Conv matmul with fused per-channel sum / sum-of-squares outputs."""
    M, K = patches.shape
    _, N = w_mat.shape
    Mp, Kp, Np, tm = _tiling(M, K, N)

    a = _pad_to(patches.astype(jnp.bfloat16), Mp, Kp)
    b = _pad_to(w_mat.astype(jnp.bfloat16), Kp, Np)

    y, s, sq = pl.pallas_call(
        _matmul_stats_kernel,
        out_shape=(
            jax.ShapeDtypeStruct((Mp, Np), jnp.float32),
            jax.ShapeDtypeStruct((1, Np), jnp.float32),
            jax.ShapeDtypeStruct((1, Np), jnp.float32),
        ),
        grid_spec=pltpu.PrefetchScalarGridSpec(
            num_scalar_prefetch=0,
            grid=(Np // _TN, Mp // tm),  # stats reduction axis (M) last
            in_specs=[
                pl.BlockSpec((tm, Kp), lambda j, i: (i, 0)),
                pl.BlockSpec((Kp, _TN), lambda j, i: (0, j)),
            ],
            out_specs=(
                pl.BlockSpec((tm, _TN), lambda j, i: (i, j)),
                pl.BlockSpec((1, _TN), lambda j, i: (0, j)),
                pl.BlockSpec((1, _TN), lambda j, i: (0, j)),
            ),
        ),
        compiler_params=pltpu.CompilerParams(
            dimension_semantics=("parallel", "arbitrary")
        ),
    )(a, b)
    return y, s, sq


def pallas_bn_lrelu(y_padded, scale, shift, *, slope=0.2):
    """Elementwise y = leaky_relu(x * scale + shift) on the padded activation."""
    Mp, Np = y_padded.shape
    tm = min(Mp, _TM_CAP)  # Mp is a multiple of tm by construction
    C = scale.shape[0]
    sc = _pad_to(scale.reshape(1, C).astype(jnp.float32), 1, Np)
    sh = _pad_to(shift.reshape(1, C).astype(jnp.float32), 1, Np)

    out = pl.pallas_call(
        functools.partial(_bn_lrelu_kernel, slope=slope),
        out_shape=jax.ShapeDtypeStruct((Mp, Np), jnp.float32),
        grid_spec=pltpu.PrefetchScalarGridSpec(
            num_scalar_prefetch=0,
            grid=(Mp // tm,),
            in_specs=[
                pl.BlockSpec((tm, Np), lambda i: (i, 0)),
                pl.BlockSpec((1, Np), lambda i: (0, 0)),
                pl.BlockSpec((1, Np), lambda i: (0, 0)),
            ],
            out_specs=pl.BlockSpec((tm, Np), lambda i: (i, 0)),
        ),
        compiler_params=pltpu.CompilerParams(dimension_semantics=("parallel",)),
    )(y_padded, sc, sh)
    return out


# -----------------------------------------------------------------------------
# Conv-as-matmul glue (im2col) + discriminator forward
# -----------------------------------------------------------------------------


def _im2col(x_nhwc, k, stride, pad):
    """Extract kxk patches -> ((N*Ho*Wo, k*k*C), Ho, Wo)."""
    N, H, W, C = x_nhwc.shape
    xp = jnp.pad(x_nhwc, ((0, 0), (pad, pad), (pad, pad), (0, 0))) if pad else x_nhwc
    Ho = (H + 2 * pad - k) // stride + 1
    Wo = (W + 2 * pad - k) // stride + 1
    cols = []
    for ki in range(k):
        for kj in range(k):
            cols.append(
                xp[:, ki:ki + Ho * stride:stride, kj:kj + Wo * stride:stride, :]
            )
    patches = jnp.stack(cols, axis=3)  # (N, Ho, Wo, k*k, C)
    return patches.reshape(N * Ho * Wo, k * k * C), Ho, Wo


def _w_mat(w_oikk):
    """(Cout, Cin, k, k) -> (k*k*Cin, Cout) matching im2col (ki, kj, cin) order."""
    cout = w_oikk.shape[0]
    return jnp.transpose(w_oikk, (2, 3, 1, 0)).reshape(-1, cout)


def discriminator_forward(x_nchw, params):
    """Forward pass matching the PyTorch Discriminator (training-mode BN)."""
    x = jnp.transpose(x_nchw, (0, 2, 3, 1)).astype(jnp.float32)  # NCHW -> NHWC
    batch = x.shape[0]

    # --- layer 1: Conv(nd->ndf, 4, 2, 1) + LeakyReLU(0.2) fused in epilogue
    patches, Ho, Wo = _im2col(x, 4, 2, 1)
    cout = params["w1"].shape[0]
    npix = batch * Ho * Wo
    yp = pallas_conv_matmul(patches, _w_mat(params["w1"]), slope=0.2)
    x = yp[:npix, :cout].reshape(batch, Ho, Wo, cout)

    # --- layers 2..4: Conv(4, 2, 1) + BatchNorm2d + LeakyReLU(0.2)
    for wk, gk, bk in (("w2", "g2", "b2"), ("w3", "g3", "b3"), ("w4", "g4", "b4")):
        patches, Ho, Wo = _im2col(x, 4, 2, 1)
        cout = params[wk].shape[0]
        npix = batch * Ho * Wo
        yp, s, sq = pallas_conv_matmul_stats(patches, _w_mat(params[wk]))
        mean = s[0, :cout] / npix
        var = sq[0, :cout] / npix - mean * mean  # biased var (BN training mode)
        inv_std = 1.0 / jnp.sqrt(var + 1e-5)
        scale = params[gk] * inv_std
        shift = params[bk] - mean * scale
        yn = pallas_bn_lrelu(yp, scale, shift, slope=0.2)
        x = yn[:npix, :cout].reshape(batch, Ho, Wo, cout)

    # --- layer 5: Conv(ndf*8 -> 1, 4, 1, 0), no activation
    patches, Ho, Wo = _im2col(x, 4, 1, 0)
    npix = batch * Ho * Wo
    yp = pallas_conv_matmul(patches, _w_mat(params["w5"]), slope=None)
    out = yp[:npix, :1].reshape(batch, Ho, Wo, 1)
    return jnp.transpose(out, (0, 3, 1, 2))  # back to NCHW


def init_params(key, nd, ndf):
    """Deterministic synthetic init. Conv weights ~ N(0, 0.02); BN gamma=1, beta=0."""
    ks = jax.random.split(key, 5)

    def w(k, cout, cin):
        return 0.02 * jax.random.normal(k, (cout, cin, 4, 4), jnp.float32)

    return {
        "w1": w(ks[0], ndf, nd),
        "w2": w(ks[1], ndf * 2, ndf),
        "w3": w(ks[2], ndf * 4, ndf * 2),
        "w4": w(ks[3], ndf * 8, ndf * 4),
        "w5": w(ks[4], 1, ndf * 8),
        "g2": jnp.ones((ndf * 2,), jnp.float32),
        "b2": jnp.zeros((ndf * 2,), jnp.float32),
        "g3": jnp.ones((ndf * 4,), jnp.float32),
        "b3": jnp.zeros((ndf * 4,), jnp.float32),
        "g4": jnp.ones((ndf * 8,), jnp.float32),
        "b4": jnp.zeros((ndf * 8,), jnp.float32),
    }


if __name__ == "__main__":
    # DCGAN discriminator geometry requires 64x64 spatial input so the final
    # 4x4 valid conv produces a 1x1 map. Keep batch / channel counts small.
    nd, ndf, batch, spatial = 3, 8, 2, 64

    key = jax.random.PRNGKey(0)
    k_x, k_p = jax.random.split(key)
    x = jax.random.normal(k_x, (batch, nd, spatial, spatial), jnp.float32)
    params = init_params(k_p, nd, ndf)

    fwd = jax.jit(discriminator_forward)
    out = fwd(x, params)
    jax.block_until_ready(out)

    assert out.shape == (batch, 1, 1, 1), out.shape
    assert out.dtype == jnp.float32
    assert bool(jnp.all(jnp.isfinite(out)))
    print("KERNEL_OK")
</pallas_src>

<mosaic_0001>
module attributes {stable_mosaic.version = 11 : i64} {
  func.func @_matmul_act_kernel(%arg0: i32, %arg1: i32, %arg2: memref<512x128xbf16, #tpu.memory_space<vmem>>, %arg3: memref<128x128xbf16, #tpu.memory_space<vmem>>, %arg4: memref<512x128xf32, #tpu.memory_space<vmem>>) attributes {dimension_semantics = [#tpu.dimension_semantics<parallel>, #tpu.dimension_semantics<parallel>], iteration_bounds = array<i64: 4, 1>, scalar_prefetch = 0 : i64, scratch_operands = 0 : i64, tpu.core_type = #tpu.core_type<tc>, window_params = [{transform_indices = @transform_0, window_bounds = array<i64: 512, 128>}, {transform_indices = @transform_1, window_bounds = array<i64: 128, 128>}, {transform_indices = @transform_2, window_bounds = array<i64: 512, 128>}]} {
    %c0 = arith.constant 0 : index
    %c0_0 = arith.constant 0 : index
    %0 = vector.load %arg2[%c0, %c0_0] : memref<512x128xbf16, #tpu.memory_space<vmem>>, vector<512x128xbf16>
    %c0_1 = arith.constant 0 : index
    %c0_2 = arith.constant 0 : index
    %1 = vector.load %arg3[%c0_1, %c0_2] : memref<128x128xbf16, #tpu.memory_space<vmem>>, vector<128x128xbf16>
    %cst = arith.constant dense<0.000000e+00> : vector<512x128xf32>
    %2 = tpu.matmul %0, %1, %cst {dimension_numbers = #tpu.dot_dimension_numbers<[1], [0], [0], [1], [0, 0, 1, 1], [], []>} : vector<512x128xbf16>, vector<128x128xbf16>, vector<512x128xf32> -> vector<512x128xf32>
    %cst_3 = arith.constant 0.000000e+00 : f32
    %3 = vector.broadcast %cst_3 : f32 to vector<512x128xf32>
    %4 = arith.cmpf ogt, %2, %3 : vector<512x128xf32>
    %cst_4 = arith.constant 2.000000e-01 : f32
    %5 = vector.broadcast %cst_4 : f32 to vector<512x128xf32>
    %6 = arith.mulf %5, %2 : vector<512x128xf32>
    %7 = arith.select %4, %2, %6 : vector<512x128xi1>, vector<512x128xf32>
    %c0_5 = arith.constant 0 : index
    %c0_6 = arith.constant 0 : index
    %8 = vector.load %arg4[%c0_5, %c0_6] : memref<512x128xf32, #tpu.memory_space<vmem>>, vector<512x128xf32>
    tpu.vector_store %arg4[%c0_5, %c0_6], %7 {strides = array<i32>} : memref<512x128xf32, #tpu.memory_space<vmem>>, vector<512x128xf32>,
    return
  }
  func.func @transform_0(%arg0: i32, %arg1: i32) -> (i32, i32) {
    %c0_i32 = arith.constant 0 : i32
    %c0_i32_0 = arith.constant 0 : i32
    return %arg0, %c0_i32 : i32, i32
  }
  func.func @transform_1(%arg0: i32, %arg1: i32) -> (i32, i32) {
    %c0_i32 = arith.constant 0 : i32
    %c0_i32_0 = arith.constant 0 : i32
    return %c0_i32, %arg1 : i32, i32
  }
  func.func @transform_2(%arg0: i32, %arg1: i32) -> (i32, i32) {
    %c0_i32 = arith.constant 0 : i32
    return %arg0, %arg1 : i32, i32
  }
}

module attributes {stable_mosaic.version = 11 : i64} {
  func.func @_matmul_stats_kernel(%arg0: i32, %arg1: i32, %arg2: memref<512x128xbf16, #tpu.memory_space<vmem>>, %arg3: memref<128x128xbf16, #tpu.memory_space<vmem>>, %arg4: memref<512x128xf32, #tpu.memory_space<vmem>>, %arg5: memref<1x128xf32, #tpu.memory_space<vmem>>, %arg6: memref<1x128xf32, #tpu.memory_space<vmem>>) attributes {dimension_semantics = [#tpu.dimension_semantics<parallel>, #tpu.dimension_semantics<arbitrary>], iteration_bounds = array<i64: 1, 1>, scalar_prefetch = 0 : i64, scratch_operands = 0 : i64, tpu.core_type = #tpu.core_type<tc>, window_params = [{transform_indices = @transform_0, window_bounds = array<i64: 512, 128>}, {transform_indices = @transform_1, window_bounds = array<i64: 128, 128>}, {transform_indices = @transform_2, window_bounds = array<i64: 512, 128>}, {transform_indices = @transform_3, window_bounds = array<i64: 1, 128>}, {transform_indices = @transform_4, window_bounds = array<i64: 1, 128>}]} {
    %c0 = arith.constant 0 : index
    %c0_0 = arith.constant 0 : index
    %0 = vector.load %arg2[%c0, %c0_0] : memref<512x128xbf16, #tpu.memory_space<vmem>>, vector<512x128xbf16>
    %c0_1 = arith.constant 0 : index
    %c0_2 = arith.constant 0 : index
    %1 = vector.load %arg3[%c0_1, %c0_2] : memref<128x128xbf16, #tpu.memory_space<vmem>>, vector<128x128xbf16>
    %cst = arith.constant dense<0.000000e+00> : vector<512x128xf32>
    %2 = tpu.matmul %0, %1, %cst {dimension_numbers = #tpu.dot_dimension_numbers<[1], [0], [0], [1], [0, 0, 1, 1], [], []>} : vector<512x128xbf16>, vector<128x128xbf16>, vector<512x128xf32> -> vector<512x128xf32>
    %c0_3 = arith.constant 0 : index
    %c0_4 = arith.constant 0 : index
    %3 = vector.load %arg4[%c0_3, %c0_4] : memref<512x128xf32, #tpu.memory_space<vmem>>, vector<512x128xf32>
    tpu.vector_store %arg4[%c0_3, %c0_4], %2 {strides = array<i32>} : memref<512x128xf32, #tpu.memory_space<vmem>>, vector<512x128xf32>,
    %c0_i32 = arith.constant 0 : i32
    %4 = arith.cmpi eq, %arg1, %c0_i32 : i32
    %5 = arith.extui %4 : i1 to i32
    %c0_i32_5 = arith.constant 0 : i32
    %6 = arith.cmpi ne, %5, %c0_i32_5 : i32
    scf.if %6 {
      %cst_16 = arith.constant 0.000000e+00 : f32
      %18 = vector.broadcast %cst_16 : f32 to vector<1x128xf32>
      %c0_17 = arith.constant 0 : index
      %c0_18 = arith.constant 0 : index
      %19 = vector.load %arg5[%c0_17, %c0_18] : memref<1x128xf32, #tpu.memory_space<vmem>>, vector<1x128xf32>
      tpu.vector_store %arg5[%c0_17, %c0_18], %18 {strides = array<i32>} : memref<1x128xf32, #tpu.memory_space<vmem>>, vector<1x128xf32>,
      %cst_19 = arith.constant 0.000000e+00 : f32
      %20 = vector.broadcast %cst_19 : f32 to vector<1x128xf32>
      %c0_20 = arith.constant 0 : index
      %c0_21 = arith.constant 0 : index
      %21 = vector.load %arg6[%c0_20, %c0_21] : memref<1x128xf32, #tpu.memory_space<vmem>>, vector<1x128xf32>
      tpu.vector_store %arg6[%c0_20, %c0_21], %20 {strides = array<i32>} : memref<1x128xf32, #tpu.memory_space<vmem>>, vector<1x128xf32>,
    } else {
    }
    %c0_6 = arith.constant 0 : index
    %c0_7 = arith.constant 0 : index
    %7 = vector.load %arg5[%c0_6, %c0_7] : memref<1x128xf32, #tpu.memory_space<vmem>>, vector<1x128xf32>
    %cst_8 = arith.constant dense<0.000000e+00> : vector<128xf32>
    %8 = vector.multi_reduction <add>, %2, %cst_8 [0] : vector<512x128xf32> to vector<128xf32>
    %9 = vector.shape_cast %8 : vector<128xf32> to vector<1x128xf32>
    %10 = arith.addf %7, %9 : vector<1x128xf32>
    %c0_9 = arith.constant 0 : index
    %c0_10 = arith.constant 0 : index
    %11 = vector.load %arg5[%c0_9, %c0_10] : memref<1x128xf32, #tpu.memory_space<vmem>>, vector<1x128xf32>
    tpu.vector_store %arg5[%c0_9, %c0_10], %10 {strides = array<i32>} : memref<1x128xf32, #tpu.memory_space<vmem>>, vector<1x128xf32>,
    %c0_11 = arith.constant 0 : index
    %c0_12 = arith.constant 0 : index
    %12 = vector.load %arg6[%c0_11, %c0_12] : memref<1x128xf32, #tpu.memory_space<vmem>>, vector<1x128xf32>
    %13 = arith.mulf %2, %2 : vector<512x128xf32>
    %cst_13 = arith.constant dense<0.000000e+00> : vector<128xf32>
    %14 = vector.multi_reduction <add>, %13, %cst_13 [0] : vector<512x128xf32> to vector<128xf32>
    %15 = vector.shape_cast %14 : vector<128xf32> to vector<1x128xf32>
    %16 = arith.addf %12, %15 : vector<1x128xf32>
    %c0_14 = arith.constant 0 : index
    %c0_15 = arith.constant 0 : index
    %17 = vector.load %arg6[%c0_14, %c0_15] : memref<1x128xf32, #tpu.memory_space<vmem>>, vector<1x128xf32>
    tpu.vector_store %arg6[%c0_14, %c0_15], %16 {strides = array<i32>} : memref<1x128xf32, #tpu.memory_space<vmem>>, vector<1x128xf32>,
    return
  }
  func.func @transform_0(%arg0: i32, %arg1: i32) -> (i32, i32) {
    %c0_i32 = arith.constant 0 : i32
    %c0_i32_0 = arith.constant 0 : i32
    return %arg1, %c0_i32 : i32, i32
  }
  func.func @transform_1(%arg0: i32, %arg1: i32) -> (i32, i32) {
    %c0_i32 = arith.constant 0 : i32
    %c0_i32_0 = arith.constant 0 : i32
    return %c0_i32, %arg0 : i32, i32
  }
  func.func @transform_2(%arg0: i32, %arg1: i32) -> (i32, i32) {
    %c0_i32 = arith.constant 0 : i32
    return %arg1, %arg0 : i32, i32
  }
  func.func @transform_3(%arg0: i32, %arg1: i32) -> (i32, i32) {
    %c0_i32 = arith.constant 0 : i32
    %c0_i32_0 = arith.constant 0 : i32
    return %c0_i32, %arg0 : i32, i32
  }
  func.func @transform_4(%arg0: i32, %arg1: i32) -> (i32, i32) {
    %c0_i32 = arith.constant 0 : i32
    %c0_i32_0 = arith.constant 0 : i32
    return %c0_i32, %arg0 : i32, i32
  }
}

module attributes {stable_mosaic.version = 11 : i64} {
  func.func @_bn_lrelu_kernel(%arg0: i32, %arg1: memref<512x128xf32, #tpu.memory_space<vmem>>, %arg2: memref<1x128xf32, #tpu.memory_space<vmem>>, %arg3: memref<1x128xf32, #tpu.memory_space<vmem>>, %arg4: memref<512x128xf32, #tpu.memory_space<vmem>>) attributes {dimension_semantics = [#tpu.dimension_semantics<parallel>], iteration_bounds = array<i64: 1>, scalar_prefetch = 0 : i64, scratch_operands = 0 : i64, tpu.core_type = #tpu.core_type<tc>, window_params = [{transform_indices = @transform_0, window_bounds = array<i64: 512, 128>}, {pipeline_mode = #tpu.pipeline_mode<synchronous>, transform_indices = @transform_1, window_bounds = array<i64: 1, 128>}, {pipeline_mode = #tpu.pipeline_mode<synchronous>, transform_indices = @transform_2, window_bounds = array<i64: 1, 128>}, {transform_indices = @transform_3, window_bounds = array<i64: 512, 128>}]} {
    %c0 = arith.constant 0 : index
    %c0_0 = arith.constant 0 : index
    %0 = vector.load %arg1[%c0, %c0_0] : memref<512x128xf32, #tpu.memory_space<vmem>>, vector<512x128xf32>
    %c0_1 = arith.constant 0 : index
    %c0_2 = arith.constant 0 : index
    %1 = vector.load %arg2[%c0_1, %c0_2] : memref<1x128xf32, #tpu.memory_space<vmem>>, vector<1x128xf32>
    %2 = vector.broadcast %1 : vector<1x128xf32> to vector<512x128xf32>
    %3 = arith.mulf %0, %2 : vector<512x128xf32>
    %c0_3 = arith.constant 0 : index
    %c0_4 = arith.constant 0 : index
    %4 = vector.load %arg3[%c0_3, %c0_4] : memref<1x128xf32, #tpu.memory_space<vmem>>, vector<1x128xf32>
    %5 = vector.broadcast %4 : vector<1x128xf32> to vector<512x128xf32>
    %6 = arith.addf %3, %5 : vector<512x128xf32>
    %cst = arith.constant 0.000000e+00 : f32
    %7 = vector.broadcast %cst : f32 to vector<512x128xf32>
    %8 = arith.cmpf ogt, %6, %7 : vector<512x128xf32>
    %cst_5 = arith.constant 2.000000e-01 : f32
    %9 = vector.broadcast %cst_5 : f32 to vector<512x128xf32>
    %10 = arith.mulf %9, %6 : vector<512x128xf32>
    %11 = arith.select %8, %6, %10 : vector<512x128xi1>, vector<512x128xf32>
    %c0_6 = arith.constant 0 : index
    %c0_7 = arith.constant 0 : index
    %12 = vector.load %arg4[%c0_6, %c0_7] : memref<512x128xf32, #tpu.memory_space<vmem>>, vector<512x128xf32>
    tpu.vector_store %arg4[%c0_6, %c0_7], %11 {strides = array<i32>} : memref<512x128xf32, #tpu.memory_space<vmem>>, vector<512x128xf32>,
    return
  }
  func.func @transform_0(%arg0: i32) -> (i32, i32) {
    %c0_i32 = arith.constant 0 : i32
    %c0_i32_0 = arith.constant 0 : i32
    return %arg0, %c0_i32 : i32, i32
  }
  func.func @transform_1(%arg0: i32) -> (i32, i32) {
    %c0_i32 = arith.constant 0 : i32
    %c0_i32_0 = arith.constant 0 : i32
    %c0_i32_1 = arith.constant 0 : i32
    return %c0_i32, %c0_i32_0 : i32, i32
  }
  func.func @transform_2(%arg0: i32) -> (i32, i32) {
    %c0_i32 = arith.constant 0 : i32
    %c0_i32_0 = arith.constant 0 : i32
    %c0_i32_1 = arith.constant 0 : i32
    return %c0_i32, %c0_i32_0 : i32, i32
  }
  func.func @transform_3(%arg0: i32) -> (i32, i32) {
    %c0_i32 = arith.constant 0 : i32
    %c0_i32_0 = arith.constant 0 : i32
    return %arg0, %c0_i32 : i32, i32
  }
}

module attributes {stable_mosaic.version = 11 : i64} {
  func.func @_matmul_stats_kernel(%arg0: i32, %arg1: i32, %arg2: memref<128x256xbf16, #tpu.memory_space<vmem>>, %arg3: memref<256x128xbf16, #tpu.memory_space<vmem>>, %arg4: memref<128x128xf32, #tpu.memory_space<vmem>>, %arg5: memref<1x128xf32, #tpu.memory_space<vmem>>, %arg6: memref<1x128xf32, #tpu.memory_space<vmem>>) attributes {dimension_semantics = [#tpu.dimension_semantics<parallel>, #tpu.dimension_semantics<arbitrary>], iteration_bounds = array<i64: 1, 1>, scalar_prefetch = 0 : i64, scratch_operands = 0 : i64, tpu.core_type = #tpu.core_type<tc>, window_params = [{transform_indices = @transform_0, window_bounds = array<i64: 128, 256>}, {transform_indices = @transform_1, window_bounds = array<i64: 256, 128>}, {transform_indices = @transform_2, window_bounds = array<i64: 128, 128>}, {transform_indices = @transform_3, window_bounds = array<i64: 1, 128>}, {transform_indices = @transform_4, window_bounds = array<i64: 1, 128>}]} {
    %c0 = arith.constant 0 : index
    %c0_0 = arith.constant 0 : index
    %0 = vector.load %arg2[%c0, %c0_0] : memref<128x256xbf16, #tpu.memory_space<vmem>>, vector<128x256xbf16>
    %c0_1 = arith.constant 0 : index
    %c0_2 = arith.constant 0 : index
    %1 = vector.load %arg3[%c0_1, %c0_2] : memref<256x128xbf16, #tpu.memory_space<vmem>>, vector<256x128xbf16>
    %cst = arith.constant dense<0.000000e+00> : vector<128x128xf32>
    %2 = tpu.matmul %0, %1, %cst {dimension_numbers = #tpu.dot_dimension_numbers<[1], [0], [0], [1], [0, 0, 1, 1], [], []>} : vector<128x256xbf16>, vector<256x128xbf16>, vector<128x128xf32> -> vector<128x128xf32>
    %c0_3 = arith.constant 0 : index
    %c0_4 = arith.constant 0 : index
    %3 = vector.load %arg4[%c0_3, %c0_4] : memref<128x128xf32, #tpu.memory_space<vmem>>, vector<128x128xf32>
    tpu.vector_store %arg4[%c0_3, %c0_4], %2 {strides = array<i32>} : memref<128x128xf32, #tpu.memory_space<vmem>>, vector<128x128xf32>,
    %c0_i32 = arith.constant 0 : i32
    %4 = arith.cmpi eq, %arg1, %c0_i32 : i32
    %5 = arith.extui %4 : i1 to i32
    %c0_i32_5 = arith.constant 0 : i32
    %6 = arith.cmpi ne, %5, %c0_i32_5 : i32
    scf.if %6 {
      %cst_16 = arith.constant 0.000000e+00 : f32
      %18 = vector.broadcast %cst_16 : f32 to vector<1x128xf32>
      %c0_17 = arith.constant 0 : index
      %c0_18 = arith.constant 0 : index
      %19 = vector.load %arg5[%c0_17, %c0_18] : memref<1x128xf32, #tpu.memory_space<vmem>>, vector<1x128xf32>
      tpu.vector_store %arg5[%c0_17, %c0_18], %18 {strides = array<i32>} : memref<1x128xf32, #tpu.memory_space<vmem>>, vector<1x128xf32>,
      %cst_19 = arith.constant 0.000000e+00 : f32
      %20 = vector.broadcast %cst_19 : f32 to vector<1x128xf32>
      %c0_20 = arith.constant 0 : index
      %c0_21 = arith.constant 0 : index
      %21 = vector.load %arg6[%c0_20, %c0_21] : memref<1x128xf32, #tpu.memory_space<vmem>>, vector<1x128xf32>
      tpu.vector_store %arg6[%c0_20, %c0_21], %20 {strides = array<i32>} : memref<1x128xf32, #tpu.memory_space<vmem>>, vector<1x128xf32>,
    } else {
    }
    %c0_6 = arith.constant 0 : index
    %c0_7 = arith.constant 0 : index
    %7 = vector.load %arg5[%c0_6, %c0_7] : memref<1x128xf32, #tpu.memory_space<vmem>>, vector<1x128xf32>
    %cst_8 = arith.constant dense<0.000000e+00> : vector<128xf32>
    %8 = vector.multi_reduction <add>, %2, %cst_8 [0] : vector<128x128xf32> to vector<128xf32>
    %9 = vector.shape_cast %8 : vector<128xf32> to vector<1x128xf32>
    %10 = arith.addf %7, %9 : vector<1x128xf32>
    %c0_9 = arith.constant 0 : index
    %c0_10 = arith.constant 0 : index
    %11 = vector.load %arg5[%c0_9, %c0_10] : memref<1x128xf32, #tpu.memory_space<vmem>>, vector<1x128xf32>
    tpu.vector_store %arg5[%c0_9, %c0_10], %10 {strides = array<i32>} : memref<1x128xf32, #tpu.memory_space<vmem>>, vector<1x128xf32>,
    %c0_11 = arith.constant 0 : index
    %c0_12 = arith.constant 0 : index
    %12 = vector.load %arg6[%c0_11, %c0_12] : memref<1x128xf32, #tpu.memory_space<vmem>>, vector<1x128xf32>
    %13 = arith.mulf %2, %2 : vector<128x128xf32>
    %cst_13 = arith.constant dense<0.000000e+00> : vector<128xf32>
    %14 = vector.multi_reduction <add>, %13, %cst_13 [0] : vector<128x128xf32> to vector<128xf32>
    %15 = vector.shape_cast %14 : vector<128xf32> to vector<1x128xf32>
    %16 = arith.addf %12, %15 : vector<1x128xf32>
    %c0_14 = arith.constant 0 : index
    %c0_15 = arith.constant 0 : index
    %17 = vector.load %arg6[%c0_14, %c0_15] : memref<1x128xf32, #tpu.memory_space<vmem>>, vector<1x128xf32>
    tpu.vector_store %arg6[%c0_14, %c0_15], %16 {strides = array<i32>} : memref<1x128xf32, #tpu.memory_space<vmem>>, vector<1x128xf32>,
    return
  }
  func.func @transform_0(%arg0: i32, %arg1: i32) -> (i32, i32) {
    %c0_i32 = arith.constant 0 : i32
    %c0_i32_0 = arith.constant 0 : i32
    return %arg1, %c0_i32 : i32, i32
  }
  func.func @transform_1(%arg0: i32, %arg1: i32) -> (i32, i32) {
    %c0_i32 = arith.constant 0 : i32
    %c0_i32_0 = arith.constant 0 : i32
    return %c0_i32, %arg0 : i32, i32
  }
  func.func @transform_2(%arg0: i32, %arg1: i32) -> (i32, i32) {
    %c0_i32 = arith.constant 0 : i32
    return %arg1, %arg0 : i32, i32
  }
  func.func @transform_3(%arg0: i32, %arg1: i32) -> (i32, i32) {
    %c0_i32 = arith.constant 0 : i32
    %c0_i32_0 = arith.constant 0 : i32
    return %c0_i32, %arg0 : i32, i32
  }
  func.func @transform_4(%arg0: i32, %arg1: i32) -> (i32, i32) {
    %c0_i32 = arith.constant 0 : i32
    %c0_i32_0 = arith.constant 0 : i32
    return %c0_i32, %arg0 : i32, i32
  }
}

module attributes {stable_mosaic.version = 11 : i64} {
  func.func @_bn_lrelu_kernel(%arg0: i32, %arg1: memref<128x128xf32, #tpu.memory_space<vmem>>, %arg2: memref<1x128xf32, #tpu.memory_space<vmem>>, %arg3: memref<1x128xf32, #tpu.memory_space<vmem>>, %arg4: memref<128x128xf32, #tpu.memory_space<vmem>>) attributes {dimension_semantics = [#tpu.dimension_semantics<parallel>], iteration_bounds = array<i64: 1>, scalar_prefetch = 0 : i64, scratch_operands = 0 : i64, tpu.core_type = #tpu.core_type<tc>, window_params = [{transform_indices = @transform_0, window_bounds = array<i64: 128, 128>}, {pipeline_mode = #tpu.pipeline_mode<synchronous>, transform_indices = @transform_1, window_bounds = array<i64: 1, 128>}, {pipeline_mode = #tpu.pipeline_mode<synchronous>, transform_indices = @transform_2, window_bounds = array<i64: 1, 128>}, {transform_indices = @transform_3, window_bounds = array<i64: 128, 128>}]} {
    %c0 = arith.constant 0 : index
    %c0_0 = arith.constant 0 : index
    %0 = vector.load %arg1[%c0, %c0_0] : memref<128x128xf32, #tpu.memory_space<vmem>>, vector<128x128xf32>
    %c0_1 = arith.constant 0 : index
    %c0_2 = arith.constant 0 : index
    %1 = vector.load %arg2[%c0_1, %c0_2] : memref<1x128xf32, #tpu.memory_space<vmem>>, vector<1x128xf32>
    %2 = vector.broadcast %1 : vector<1x128xf32> to vector<128x128xf32>
    %3 = arith.mulf %0, %2 : vector<128x128xf32>
    %c0_3 = arith.constant 0 : index
    %c0_4 = arith.constant 0 : index
    %4 = vector.load %arg3[%c0_3, %c0_4] : memref<1x128xf32, #tpu.memory_space<vmem>>, vector<1x128xf32>
    %5 = vector.broadcast %4 : vector<1x128xf32> to vector<128x128xf32>
    %6 = arith.addf %3, %5 : vector<128x128xf32>
    %cst = arith.constant 0.000000e+00 : f32
    %7 = vector.broadcast %cst : f32 to vector<128x128xf32>
    %8 = arith.cmpf ogt, %6, %7 : vector<128x128xf32>
    %cst_5 = arith.constant 2.000000e-01 : f32
    %9 = vector.broadcast %cst_5 : f32 to vector<128x128xf32>
    %10 = arith.mulf %9, %6 : vector<128x128xf32>
    %11 = arith.select %8, %6, %10 : vector<128x128xi1>, vector<128x128xf32>
    %c0_6 = arith.constant 0 : index
    %c0_7 = arith.constant 0 : index
    %12 = vector.load %arg4[%c0_6, %c0_7] : memref<128x128xf32, #tpu.memory_space<vmem>>, vector<128x128xf32>
    tpu.vector_store %arg4[%c0_6, %c0_7], %11 {strides = array<i32>} : memref<128x128xf32, #tpu.memory_space<vmem>>, vector<128x128xf32>,
    return
  }
  func.func @transform_0(%arg0: i32) -> (i32, i32) {
    %c0_i32 = arith.constant 0 : i32
    %c0_i32_0 = arith.constant 0 : i32
    return %arg0, %c0_i32 : i32, i32
  }
  func.func @transform_1(%arg0: i32) -> (i32, i32) {
    %c0_i32 = arith.constant 0 : i32
    %c0_i32_0 = arith.constant 0 : i32
    %c0_i32_1 = arith.constant 0 : i32
    return %c0_i32, %c0_i32_0 : i32, i32
  }
  func.func @transform_2(%arg0: i32) -> (i32, i32) {
    %c0_i32 = arith.constant 0 : i32
    %c0_i32_0 = arith.constant 0 : i32
    %c0_i32_1 = arith.constant 0 : i32
    return %c0_i32, %c0_i32_0 : i32, i32
  }
  func.func @transform_3(%arg0: i32) -> (i32, i32) {
    %c0_i32 = arith.constant 0 : i32
    %c0_i32_0 = arith.constant 0 : i32
    return %arg0, %c0_i32 : i32, i32
  }
}

module attributes {stable_mosaic.version = 11 : i64} {
  func.func @_matmul_stats_kernel(%arg0: i32, %arg1: i32, %arg2: memref<32x512xbf16, #tpu.memory_space<vmem>>, %arg3: memref<512x128xbf16, #tpu.memory_space<vmem>>, %arg4: memref<32x128xf32, #tpu.memory_space<vmem>>, %arg5: memref<1x128xf32, #tpu.memory_space<vmem>>, %arg6: memref<1x128xf32, #tpu.memory_space<vmem>>) attributes {dimension_semantics = [#tpu.dimension_semantics<parallel>, #tpu.dimension_semantics<arbitrary>], iteration_bounds = array<i64: 1, 1>, scalar_prefetch = 0 : i64, scratch_operands = 0 : i64, tpu.core_type = #tpu.core_type<tc>, window_params = [{transform_indices = @transform_0, window_bounds = array<i64: 32, 512>}, {transform_indices = @transform_1, window_bounds = array<i64: 512, 128>}, {transform_indices = @transform_2, window_bounds = array<i64: 32, 128>}, {transform_indices = @transform_3, window_bounds = array<i64: 1, 128>}, {transform_indices = @transform_4, window_bounds = array<i64: 1, 128>}]} {
    %c0 = arith.constant 0 : index
    %c0_0 = arith.constant 0 : index
    %0 = vector.load %arg2[%c0, %c0_0] : memref<32x512xbf16, #tpu.memory_space<vmem>>, vector<32x512xbf16>
    %c0_1 = arith.constant 0 : index
    %c0_2 = arith.constant 0 : index
    %1 = vector.load %arg3[%c0_1, %c0_2] : memref<512x128xbf16, #tpu.memory_space<vmem>>, vector<512x128xbf16>
    %cst = arith.constant dense<0.000000e+00> : vector<32x128xf32>
    %2 = tpu.matmul %0, %1, %cst {dimension_numbers = #tpu.dot_dimension_numbers<[1], [0], [0], [1], [0, 0, 1, 1], [], []>} : vector<32x512xbf16>, vector<512x128xbf16>, vector<32x128xf32> -> vector<32x128xf32>
    %c0_3 = arith.constant 0 : index
    %c0_4 = arith.constant 0 : index
    %3 = vector.load %arg4[%c0_3, %c0_4] : memref<32x128xf32, #tpu.memory_space<vmem>>, vector<32x128xf32>
    tpu.vector_store %arg4[%c0_3, %c0_4], %2 {strides = array<i32>} : memref<32x128xf32, #tpu.memory_space<vmem>>, vector<32x128xf32>,
    %c0_i32 = arith.constant 0 : i32
    %4 = arith.cmpi eq, %arg1, %c0_i32 : i32
    %5 = arith.extui %4 : i1 to i32
    %c0_i32_5 = arith.constant 0 : i32
    %6 = arith.cmpi ne, %5, %c0_i32_5 : i32
    scf.if %6 {
      %cst_16 = arith.constant 0.000000e+00 : f32
      %18 = vector.broadcast %cst_16 : f32 to vector<1x128xf32>
      %c0_17 = arith.constant 0 : index
      %c0_18 = arith.constant 0 : index
      %19 = vector.load %arg5[%c0_17, %c0_18] : memref<1x128xf32, #tpu.memory_space<vmem>>, vector<1x128xf32>
      tpu.vector_store %arg5[%c0_17, %c0_18], %18 {strides = array<i32>} : memref<1x128xf32, #tpu.memory_space<vmem>>, vector<1x128xf32>,
      %cst_19 = arith.constant 0.000000e+00 : f32
      %20 = vector.broadcast %cst_19 : f32 to vector<1x128xf32>
      %c0_20 = arith.constant 0 : index
      %c0_21 = arith.constant 0 : index
      %21 = vector.load %arg6[%c0_20, %c0_21] : memref<1x128xf32, #tpu.memory_space<vmem>>, vector<1x128xf32>
      tpu.vector_store %arg6[%c0_20, %c0_21], %20 {strides = array<i32>} : memref<1x128xf32, #tpu.memory_space<vmem>>, vector<1x128xf32>,
    } else {
    }
    %c0_6 = arith.constant 0 : index
    %c0_7 = arith.constant 0 : index
    %7 = vector.load %arg5[%c0_6, %c0_7] : memref<1x128xf32, #tpu.memory_space<vmem>>, vector<1x128xf32>
    %cst_8 = arith.constant dense<0.000000e+00> : vector<128xf32>
    %8 = vector.multi_reduction <add>, %2, %cst_8 [0] : vector<32x128xf32> to vector<128xf32>
    %9 = vector.shape_cast %8 : vector<128xf32> to vector<1x128xf32>
    %10 = arith.addf %7, %9 : vector<1x128xf32>
    %c0_9 = arith.constant 0 : index
    %c0_10 = arith.constant 0 : index
    %11 = vector.load %arg5[%c0_9, %c0_10] : memref<1x128xf32, #tpu.memory_space<vmem>>, vector<1x128xf32>
    tpu.vector_store %arg5[%c0_9, %c0_10], %10 {strides = array<i32>} : memref<1x128xf32, #tpu.memory_space<vmem>>, vector<1x128xf32>,
    %c0_11 = arith.constant 0 : index
    %c0_12 = arith.constant 0 : index
    %12 = vector.load %arg6[%c0_11, %c0_12] : memref<1x128xf32, #tpu.memory_space<vmem>>, vector<1x128xf32>
    %13 = arith.mulf %2, %2 : vector<32x128xf32>
    %cst_13 = arith.constant dense<0.000000e+00> : vector<128xf32>
    %14 = vector.multi_reduction <add>, %13, %cst_13 [0] : vector<32x128xf32> to vector<128xf32>
    %15 = vector.shape_cast %14 : vector<128xf32> to vector<1x128xf32>
    %16 = arith.addf %12, %15 : vector<1x128xf32>
    %c0_14 = arith.constant 0 : index
    %c0_15 = arith.constant 0 : index
    %17 = vector.load %arg6[%c0_14, %c0_15] : memref<1x128xf32, #tpu.memory_space<vmem>>, vector<1x128xf32>
    tpu.vector_store %arg6[%c0_14, %c0_15], %16 {strides = array<i32>} : memref<1x128xf32, #tpu.memory_space<vmem>>, vector<1x128xf32>,
    return
  }
  func.func @transform_0(%arg0: i32, %arg1: i32) -> (i32, i32) {
    %c0_i32 = arith.constant 0 : i32
    %c0_i32_0 = arith.constant 0 : i32
    return %arg1, %c0_i32 : i32, i32
  }
  func.func @transform_1(%arg0: i32, %arg1: i32) -> (i32, i32) {
    %c0_i32 = arith.constant 0 : i32
    %c0_i32_0 = arith.constant 0 : i32
    return %c0_i32, %arg0 : i32, i32
  }
  func.func @transform_2(%arg0: i32, %arg1: i32) -> (i32, i32) {
    %c0_i32 = arith.constant 0 : i32
    return %arg1, %arg0 : i32, i32
  }
  func.func @transform_3(%arg0: i32, %arg1: i32) -> (i32, i32) {
    %c0_i32 = arith.constant 0 : i32
    %c0_i32_0 = arith.constant 0 : i32
    return %c0_i32, %arg0 : i32, i32
  }
  func.func @transform_4(%arg0: i32, %arg1: i32) -> (i32, i32) {
    %c0_i32 = arith.constant 0 : i32
    %c0_i32_0 = arith.constant 0 : i32
    return %c0_i32, %arg0 : i32, i32
  }
}

module attributes {stable_mosaic.version = 11 : i64} {
  func.func @_bn_lrelu_kernel(%arg0: i32, %arg1: memref<32x128xf32, #tpu.memory_space<vmem>>, %arg2: memref<1x128xf32, #tpu.memory_space<vmem>>, %arg3: memref<1x128xf32, #tpu.memory_space<vmem>>, %arg4: memref<32x128xf32, #tpu.memory_space<vmem>>) attributes {dimension_semantics = [#tpu.dimension_semantics<parallel>], iteration_bounds = array<i64: 1>, scalar_prefetch = 0 : i64, scratch_operands = 0 : i64, tpu.core_type = #tpu.core_type<tc>, window_params = [{transform_indices = @transform_0, window_bounds = array<i64: 32, 128>}, {pipeline_mode = #tpu.pipeline_mode<synchronous>, transform_indices = @transform_1, window_bounds = array<i64: 1, 128>}, {pipeline_mode = #tpu.pipeline_mode<synchronous>, transform_indices = @transform_2, window_bounds = array<i64: 1, 128>}, {transform_indices = @transform_3, window_bounds = array<i64: 32, 128>}]} {
    %c0 = arith.constant 0 : index
    %c0_0 = arith.constant 0 : index
    %0 = vector.load %arg1[%c0, %c0_0] : memref<32x128xf32, #tpu.memory_space<vmem>>, vector<32x128xf32>
    %c0_1 = arith.constant 0 : index
    %c0_2 = arith.constant 0 : index
    %1 = vector.load %arg2[%c0_1, %c0_2] : memref<1x128xf32, #tpu.memory_space<vmem>>, vector<1x128xf32>
    %2 = vector.broadcast %1 : vector<1x128xf32> to vector<32x128xf32>
    %3 = arith.mulf %0, %2 : vector<32x128xf32>
    %c0_3 = arith.constant 0 : index
    %c0_4 = arith.constant 0 : index
    %4 = vector.load %arg3[%c0_3, %c0_4] : memref<1x128xf32, #tpu.memory_space<vmem>>, vector<1x128xf32>
    %5 = vector.broadcast %4 : vector<1x128xf32> to vector<32x128xf32>
    %6 = arith.addf %3, %5 : vector<32x128xf32>
    %cst = arith.constant 0.000000e+00 : f32
    %7 = vector.broadcast %cst : f32 to vector<32x128xf32>
    %8 = arith.cmpf ogt, %6, %7 : vector<32x128xf32>
    %cst_5 = arith.constant 2.000000e-01 : f32
    %9 = vector.broadcast %cst_5 : f32 to vector<32x128xf32>
    %10 = arith.mulf %9, %6 : vector<32x128xf32>
    %11 = arith.select %8, %6, %10 : vector<32x128xi1>, vector<32x128xf32>
    %c0_6 = arith.constant 0 : index
    %c0_7 = arith.constant 0 : index
    %12 = vector.load %arg4[%c0_6, %c0_7] : memref<32x128xf32, #tpu.memory_space<vmem>>, vector<32x128xf32>
    tpu.vector_store %arg4[%c0_6, %c0_7], %11 {strides = array<i32>} : memref<32x128xf32, #tpu.memory_space<vmem>>, vector<32x128xf32>,
    return
  }
  func.func @transform_0(%arg0: i32) -> (i32, i32) {
    %c0_i32 = arith.constant 0 : i32
    %c0_i32_0 = arith.constant 0 : i32
    return %arg0, %c0_i32 : i32, i32
  }
  func.func @transform_1(%arg0: i32) -> (i32, i32) {
    %c0_i32 = arith.constant 0 : i32
    %c0_i32_0 = arith.constant 0 : i32
    %c0_i32_1 = arith.constant 0 : i32
    return %c0_i32, %c0_i32_0 : i32, i32
  }
  func.func @transform_2(%arg0: i32) -> (i32, i32) {
    %c0_i32 = arith.constant 0 : i32
    %c0_i32_0 = arith.constant 0 : i32
    %c0_i32_1 = arith.constant 0 : i32
    return %c0_i32, %c0_i32_0 : i32, i32
  }
  func.func @transform_3(%arg0: i32) -> (i32, i32) {
    %c0_i32 = arith.constant 0 : i32
    %c0_i32_0 = arith.constant 0 : i32
    return %arg0, %c0_i32 : i32, i32
  }
}

module attributes {stable_mosaic.version = 11 : i64} {
  func.func @_matmul_act_kernel(%arg0: i32, %arg1: i32, %arg2: memref<8x1024xbf16, #tpu.memory_space<vmem>>, %arg3: memref<1024x128xbf16, #tpu.memory_space<vmem>>, %arg4: memref<8x128xf32, #tpu.memory_space<vmem>>) attributes {dimension_semantics = [#tpu.dimension_semantics<parallel>, #tpu.dimension_semantics<parallel>], iteration_bounds = array<i64: 1, 1>, scalar_prefetch = 0 : i64, scratch_operands = 0 : i64, tpu.core_type = #tpu.core_type<tc>, window_params = [{transform_indices = @transform_0, window_bounds = array<i64: 8, 1024>}, {transform_indices = @transform_1, window_bounds = array<i64: 1024, 128>}, {transform_indices = @transform_2, window_bounds = array<i64: 8, 128>}]} {
    %c0 = arith.constant 0 : index
    %c0_0 = arith.constant 0 : index
    %0 = vector.load %arg2[%c0, %c0_0] : memref<8x1024xbf16, #tpu.memory_space<vmem>>, vector<8x1024xbf16>
    %c0_1 = arith.constant 0 : index
    %c0_2 = arith.constant 0 : index
    %1 = vector.load %arg3[%c0_1, %c0_2] : memref<1024x128xbf16, #tpu.memory_space<vmem>>, vector<1024x128xbf16>
    %cst = arith.constant dense<0.000000e+00> : vector<8x128xf32>
    %2 = tpu.matmul %0, %1, %cst {dimension_numbers = #tpu.dot_dimension_numbers<[1], [0], [0], [1], [0, 0, 1, 1], [], []>} : vector<8x1024xbf16>, vector<1024x128xbf16>, vector<8x128xf32> -> vector<8x128xf32>
    %c0_3 = arith.constant 0 : index
    %c0_4 = arith.constant 0 : index
    %3 = vector.load %arg4[%c0_3, %c0_4] : memref<8x128xf32, #tpu.memory_space<vmem>>, vector<8x128xf32>
    tpu.vector_store %arg4[%c0_3, %c0_4], %2 {strides = array<i32>} : memref<8x128xf32, #tpu.memory_space<vmem>>, vector<8x128xf32>,
    return
  }
  func.func @transform_0(%arg0: i32, %arg1: i32) -> (i32, i32) {
    %c0_i32 = arith.constant 0 : i32
    %c0_i32_0 = arith.constant 0 : i32
    return %arg0, %c0_i32 : i32, i32
  }
  func.func @transform_1(%arg0: i32, %arg1: i32) -> (i32, i32) {
    %c0_i32 = arith.constant 0 : i32
    %c0_i32_0 = arith.constant 0 : i32
    return %c0_i32, %arg1 : i32, i32
  }
  func.func @transform_2(%arg0: i32, %arg1: i32) -> (i32, i32) {
    %c0_i32 = arith.constant 0 : i32
    return %arg0, %arg1 : i32, i32
  }
}

</mosaic_0001>

<bundles_post_ra>
// kernel: discriminator_forward.8
= control target key start
LH: loop header
LB: loop body
LE: loop exit
PB: predicated region body
PF: predicated region fallthrough
CT: control target
= control target key end

     0   :  { %s1431_s9 = smov 0   ;;  %s1433_s10 = smov 0   ;;  %s1592_s0 = inlined_call_operand.vmem [shape: bf16[2048,128], index: 0, kind: input, shape index: {}]   ;;  %s1593_s1 = inlined_call_operand.vmem [shape: bf16[128,128], index: 1, kind: input, shape index: {}]   ;;  %s1594_s2 = inlined_call_operand.vmem [shape: f32[2048,128], index: 2, kind: output, shape index: {}]  }
   0x1   :  { %s1435_s11 = smov 0  }
   0x2 LB: > { %s24_s12 = sadd.s32 1, %s1410_s10  ;;  %p1145_p0 = scmp.ge.s32.totalorder %s1414_s11, 1  ;;  %s1414_s11 = sphi %s1435_s11, %s12_s11   ;;  %s1410_s10 = sphi %s1433_s10, %s1596_s10   ;;  %s1406_s9 = sphi %s1431_s9, %s1595_s9  }
   0x3   : > { %p26_p1 = scmp.ge.s32.totalorder %s24_s12, 4  ;;  %p136_p2 = scmp.lt.s32.totalorder %s1414_s11, 5 }
   0x5   : > { %s1598_s12 = smov (%p26_p1, %s24_s12), 0  ;;  %p137_p3 = pnand %p1145_p0, %p136_p2 }
   0x6   : > { %v1352_v0 = vld [vmem:[%s1593_s1] sm:$0xff] (!%p137_p3)   ;;  %s1146_s15 = sshll.u32 (!%p137_p3), %s1406_s9, 6  ;;  %v1353_v1 = vld [vmem:[%s1593_s1 + $0x8] sm:$0xff] (!%p137_p3)   ;;  %v1354_v2 = vld [vmem:[%s1593_s1 + $0x10] sm:$0xff] (!%p137_p3)  }
   0x7   : > { %140 = sbr.rel (%p137_p3) target bundleno = 317 (0x13d), region = 28  ;;  %p166_p4 = scmp.lt.s32.totalorder (!%p137_p3), %s1146_s15, 255  ;;  %1232 = vmatprep.subr.bf16.mxu0 (!%p137_p3), %v1352_v0  ;;  %1312 = vmatprep.subr.bf16.mxu1 (!%p137_p3), %v1352_v0  ;;  %v1355_v3 = vld [vmem:[%s1593_s1 + $0x18] sm:$0xff] (!%p137_p3)   ;;  %v1356_v6 = vld [vmem:[%s1593_s1 + $0x20] sm:$0xff] (!%p137_p3)   ;;  %v1357_v7 = vld [vmem:[%s1593_s1 + $0x28] sm:$0xff] (!%p137_p3)  }
   0x8   : > { %1233 = vmatpush3.bf16.msra.mxu0 (!%p137_p3), %v1352_v0  ;;  %1320 = vmatpush3.bf16.msra.mxu1 (!%p137_p3), %v1352_v0  ;;  %v1358_v8 = vld [vmem:[%s1593_s1 + $0x30] sm:$0xff] (!%p137_p3)   ;;  %v1359_v9 = vld [vmem:[%s1593_s1 + $0x38] sm:$0xff] (!%p137_p3)  }
   0x9   : > { %1234 = vmatprep.subr.bf16.mxu0 (!%p137_p3), %v1353_v1  ;;  %1313 = vmatprep.subr.bf16.mxu1 (!%p137_p3), %v1353_v1 }
   0xc   : > { %1235 = vmatpush3.bf16.msra.mxu0 (!%p137_p3), %v1353_v1  ;;  %1321 = vmatpush3.bf16.msra.mxu1 (!%p137_p3), %v1353_v1 }
   0xd   : > { %1236 = vmatprep.subr.bf16.mxu0 (!%p137_p3), %v1354_v2  ;;  %1314 = vmatprep.subr.bf16.mxu1 (!%p137_p3), %v1354_v2 }
   0xe   : > { %s1600_s15 = smov (!%p166_p4, %s1146_s15), 255 }
   0xf   : > { %s1147_s20 = sshll.u32 %s1600_s15, 2  ;;  %s1149_s6 = sshll.u32 %s1600_s15, 3 }
  0x10   : > { %s1464_s23 = scalar_lea.vmem %s1592_s0, %s1147_s20  ;;  %1237 = vmatpush3.bf16.msra.mxu0 %v1354_v2  ;;  %1322 = vmatpush3.bf16.msra.mxu1 %v1354_v2  ;;  %s1517_s9 = scalar_lea.vmem %s1594_s2, %s1149_s6 }
  0x11   : > { %v1360_v4 = vld [vmem:[%s1464_s23] sm:$0xff]   ;;  %1238 = vmatprep.subr.bf16.mxu0 %v1355_v3  ;;  %1315 = vmatprep.subr.bf16.mxu1 %v1355_v3  ;;  %v1362_v10 = vld [vmem:[%s1464_s23 + $0x8] sm:$0xff]   ;;  %v1364_v12 = vld [vmem:[%s1464_s23 + $0x10] sm:$0xff]  }
  0x12   : > { %v1361_v5 = vld [vmem:[%s1464_s23 + $0x80] sm:$0xff]   ;;  %1248 = vmatprep.mubr.bf16.mxu0 %v1360_v4  ;;  %v1363_v11 = vld [vmem:[%s1464_s23 + $0x88] sm:$0xff]   ;;  %v1365_v13 = vld [vmem:[%s1464_s23 + $0x90] sm:$0xff]  }
  0x13   : > { %1280 = vmatprep.mubr.bf16.mxu1 %v1361_v5  ;;  %v1366_v14 = vld [vmem:[%s1464_s23 + $0x18] sm:$0xff]   ;;  %v1368_v16 = vld [vmem:[%s1464_s23 + $0x20] sm:$0xff]   ;;  %v1370_v18 = vld [vmem:[%s1464_s23 + $0x28] sm:$0xff]  }
  0x14   : > { %1239 = vmatpush3.bf16.msra.mxu0 %v1355_v3  ;;  %1323 = vmatpush3.bf16.msra.mxu1 %v1355_v3  ;;  %v1367_v15 = vld [vmem:[%s1464_s23 + $0x98] sm:$0xff]   ;;  %v1369_v17 = vld [vmem:[%s1464_s23 + $0xa0] sm:$0xff]   ;;  %v1371_v19 = vld [vmem:[%s1464_s23 + $0xa8] sm:$0xff]  }
  0x15   : > { %1240 = vmatprep.subr.bf16.mxu0 %v1356_v6  ;;  %1316 = vmatprep.subr.bf16.mxu1 %v1356_v6  ;;  %v1372_v20 = vld [vmem:[%s1464_s23 + $0x30] sm:$0xff]   ;;  %v1374_v22 = vld [vmem:[%s1464_s23 + $0x38] sm:$0xff]   ;;  %v1376_v24 = vld [vmem:[%s1464_s23 + $0x40] sm:$0xff]  }
  0x16   : > { %v1373_v21 = vld [vmem:[%s1464_s23 + $0xb0] sm:$0xff]   ;;  %v1375_v23 = vld [vmem:[%s1464_s23 + $0xb8] sm:$0xff]   ;;  %v1377_v25 = vld [vmem:[%s1464_s23 + $0xc0] sm:$0xff]  }
  0x17   : > { %v1378_v26 = vld [vmem:[%s1464_s23 + $0x48] sm:$0xff]   ;;  %v1380_v28 = vld [vmem:[%s1464_s23 + $0x50] sm:$0xff]   ;;  %v1382_v30 = vld [vmem:[%s1464_s23 + $0x58] sm:$0xff]  }
  0x18   : > { %1241 = vmatpush3.bf16.msra.mxu0 %v1356_v6  ;;  %1324 = vmatpush3.bf16.msra.mxu1 %v1356_v6  ;;  %v1379_v27 = vld [vmem:[%s1464_s23 + $0xc8] sm:$0xff]   ;;  %v1381_v29 = vld [vmem:[%s1464_s23 + $0xd0] sm:$0xff]   ;;  %v1383_v31 = vld [vmem:[%s1464_s23 + $0xd8] sm:$0xff]  }
  0x19   : > { %1242 = vmatprep.subr.bf16.mxu0 %v1357_v7  ;;  %1317 = vmatprep.subr.bf16.mxu1 %v1357_v7  ;;  %v1384_v32 = vld [vmem:[%s1464_s23 + $0x60] sm:$0xff]   ;;  %v1386_v34 = vld [vmem:[%s1464_s23 + $0x68] sm:$0xff]   ;;  %v1388_v36 = vld [vmem:[%s1464_s23 + $0x70] sm:$0xff]  }
  0x1a   : > { %v1385_v33 = vld [vmem:[%s1464_s23 + $0xe0] sm:$0xff]   ;;  %v1387_v35 = vld [vmem:[%s1464_s23 + $0xe8] sm:$0xff]   ;;  %v1389_v37 = vld [vmem:[%s1464_s23 + $0xf0] sm:$0xff]  }
  0x1b   : > { %v1390_v38 = vld [vmem:[%s1464_s23 + $0x78] sm:$0xff]  }
  0x1c   : > { %1243 = vmatpush3.bf16.msra.mxu0 %v1357_v7  ;;  %1325 = vmatpush3.bf16.msra.mxu1 %v1357_v7  ;;  %v1391_v39 = vld [vmem:[%s1464_s23 + $0xf8] sm:$0xff]  }
  0x1d   : > { %1244 = vmatprep.subr.bf16.mxu0 %v1358_v8  ;;  %1318 = vmatprep.subr.bf16.mxu1 %v1358_v8 }
  0x20   : > { %1245 = vmatpush3.bf16.msra.mxu0 %v1358_v8  ;;  %1326 = vmatpush3.bf16.msra.mxu1 %v1358_v8 }
  0x21   : > { %1246 = vmatprep.subr.bf16.mxu0 %v1359_v9  ;;  %1319 = vmatprep.subr.bf16.mxu1 %v1359_v9 }
  0x24   : > { %1247 = vmatpush3.bf16.msra.mxu0 %v1359_v9  ;;  %1327 = vmatpush3.bf16.msra.mxu1 %v1359_v9 }
  0x27   : > { %1249 = vmatmul.mubr.bf16.vlgmr.msra.gmra.mrb[0].mxu0 %v1362_v10  ;;  %1281 = vmatmul.mubr.bf16.vlgmr.msra.gmra.mrb[0].mxu1 %v1363_v11 }
  0x28   : > { %1252 = vmatprep.mubr.bf16.mxu0 %v1364_v12  ;;  %1284 = vmatprep.mubr.bf16.mxu1 %v1365_v13 }
  0x2f   : > { %1253 = vmatmul.mubr.bf16.gmra.mrb[4].mxu0 %v1366_v14  ;;  %1285 = vmatmul.mubr.bf16.gmra.mrb[4].mxu1 %v1367_v15 }
  0x30   : > { %1256 = vmatprep.mubr.bf16.mxu0 %v1368_v16  ;;  %1288 = vmatprep.mubr.bf16.mxu1 %v1369_v17 }
  0x37   : > { %1257 = vmatmul.mubr.bf16.gmra.mrb[8].mxu0 %v1370_v18  ;;  %1289 = vmatmul.mubr.bf16.gmra.mrb[8].mxu1 %v1371_v19 }
  0x38   : > { %1260 = vmatprep.mubr.bf16.mxu0 %v1372_v20  ;;  %1292 = vmatprep.mubr.bf16.mxu1 %v1373_v21 }
  0x3f   : > { %1261 = vmatmul.mubr.bf16.gmra.mrb[12].mxu0 %v1374_v22  ;;  %1293 = vmatmul.mubr.bf16.gmra.mrb[12].mxu1 %v1375_v23 }
  0x40   : > { %1264 = vmatprep.mubr.bf16.mxu0 %v1376_v24  ;;  %1296 = vmatprep.mubr.bf16.mxu1 %v1377_v25 }
  0x47   : > { %1265 = vmatmul.mubr.bf16.gmra.mrb[16].mxu0 %v1378_v26  ;;  %1297 = vmatmul.mubr.bf16.gmra.mrb[16].mxu1 %v1379_v27 }
  0x48   : > { %1268 = vmatprep.mubr.bf16.mxu0 %v1380_v28  ;;  %1300 = vmatprep.mubr.bf16.mxu1 %v1381_v29 }
  0x4f   : > { %1269 = vmatmul.mubr.bf16.gmra.mrb[20].mxu0 %v1382_v30  ;;  %1301 = vmatmul.mubr.bf16.gmra.mrb[20].mxu1 %v1383_v31 }
  0x50   : > { %1272 = vmatprep.mubr.bf16.mxu0 %v1384_v32  ;;  %1304 = vmatprep.mubr.bf16.mxu1 %v1385_v33 }
  0x57   : > { %1273 = vmatmul.mubr.bf16.gmra.mrb[24].mxu0 %v1386_v34  ;;  %1305 = vmatmul.mubr.bf16.gmra.mrb[24].mxu1 %v1387_v35 }
  0x58   : > { %1276 = vmatprep.mubr.bf16.mxu0 %v1388_v36  ;;  %1308 = vmatprep.mubr.bf16.mxu1 %v1389_v37 }
  0x5f   : > { %1277 = vmatmul.mubr.bf16.gmra.mrb[28].mxu0 %v1390_v38  ;;  %1309 = vmatmul.mubr.bf16.gmra.mrb[28].mxu1 %v1391_v39 }
  0xfa   : > { %v1250_v40 = vpop.f32.mrb[0].mxu0  ;;  %v1282_v41 = vpop.f32.mrb[0].mxu1 }
  0xfb   : > { %vm796_vm0 = vcmp.gt.f32.partialorder %v1250_v40, 0.0  ;;  %v860_v42 = vmul.f32 0.2, %v1250_v40  ;;  %vm828_vm1 = vcmp.gt.f32.partialorder %v1282_v41, 0.0  ;;  %v892_v43 = vmul.f32 0.2, %v1282_v41 }
  0xfc   : > { %v539_v44 = vpop.f32.mrb[1].mxu0  ;;  %v667_v45 = vpop.f32.mrb[1].mxu1 }
  0xfd   : > { %v924_v46 = vsel %vm796_vm0, %v1250_v40, %v860_v42  ;;  %v956_v47 = vsel %vm828_vm1, %v1282_v41, %v892_v43  ;;  %vm794_vm2 = vcmp.gt.f32.partialorder %v539_v44, 0.0  ;;  %v858_v48 = vmul.f32 0.2, %v539_v44  ;;  %v1251_v49 = vpop.f32.mrb[2].mxu0  ;;  %v1283_v50 = vpop.f32.mrb[2].mxu1 }
  0xfe   : > { %988 = vst [vmem:[%s1517_s9 + $0x10] sm:$0xff] %v924_v46  ;;  %1020 = vst [vmem:[%s1517_s9 + $0x110] sm:$0xff] %v956_v47  ;;  %vm826_vm3 = vcmp.gt.f32.partialorder %v667_v45, 0.0  ;;  %v890_v51 = vmul.f32 0.2, %v667_v45  ;;  %vm797_vm4 = vcmp.gt.f32.partialorder %v1251_v49, 0.0 }
  0xff   : > { %v861_v52 = vmul.f32 0.2, %v1251_v49  ;;  %v922_v53 = vsel %vm794_vm2, %v539_v44, %v858_v48  ;;  %vm829_vm5 = vcmp.gt.f32.partialorder %v1283_v50, 0.0  ;;  %v893_v54 = vmul.f32 0.2, %v1283_v50  ;;  %v542_v55 = vpop.f32.mrb[3].mxu0 }
 0x100   : > { %v670_v56 = vpop.f32.mrb[3].mxu1  ;;  %986 = vst [vmem:[%s1517_s9] sm:$0xff] %v922_v53  ;;  %v954_v57 = vsel %vm826_vm3, %v667_v45, %v890_v51  ;;  %vm795_vm6 = vcmp.gt.f32.partialorder %v542_v55, 0.0  ;;  %v859_v59 = vmul.f32 0.2, %v542_v55 }
 0x101   : > { %v925_v58 = vsel %vm797_vm4, %v1251_v49, %v861_v52  ;;  %1018 = vst [vmem:[%s1517_s9 + $0x100] sm:$0xff] %v954_v57  ;;  %v957_v60 = vsel %vm829_vm5, %v1283_v50, %v893_v54  ;;  %vm827_vm7 = vcmp.gt.f32.partialorder %v670_v56, 0.0  ;;  %v891_v61 = vmul.f32 0.2, %v670_v56 }
 0x102   : > { %989 = vst [vmem:[%s1517_s9 + $0x18] sm:$0xff] %v925_v58  ;;  %1021 = vst [vmem:[%s1517_s9 + $0x118] sm:$0xff] %v957_v60  ;;  %v923_v62 = vsel %vm795_vm6, %v542_v55, %v859_v59  ;;  %v1254_v63 = vpop.f32.mrb[4].mxu0  ;;  %v1286_v0 = vpop.f32.mrb[4].mxu1 }
 0x103   : > { %987 = vst [vmem:[%s1517_s9 + $0x8] sm:$0xff] %v923_v62  ;;  %v955_v1 = vsel %vm827_vm7, %v670_v56, %v891_v61  ;;  %vm800_vm8 = vcmp.gt.f32.partialorder %v1254_v63, 0.0  ;;  %v864_v2 = vmul.f32 0.2, %v1254_v63  ;;  %vm832_vm9 = vcmp.gt.f32.partialorder %v1286_v0, 0.0  ;;  %v555_v3 = vpop.f32.mrb[5].mxu0 }
 0x104   : > { %v683_v4 = vpop.f32.mrb[5].mxu1  ;;  %1019 = vst [vmem:[%s1517_s9 + $0x108] sm:$0xff] %v955_v1  ;;  %v896_v5 = vmul.f32 0.2, %v1286_v0  ;;  %vm798_vm10 = vcmp.gt.f32.partialorder %v555_v3, 0.0  ;;  %v1255_v9 = vpop.f32.mrb[6].mxu0 }
 0x105   : > { %v862_v6 = vmul.f32 0.2, %v555_v3  ;;  %vm830_vm11 = vcmp.gt.f32.partialorder %v683_v4, 0.0  ;;  %v928_v7 = vsel %vm800_vm8, %v1254_v63, %v864_v2  ;;  %v894_v8 = vmul.f32 0.2, %v683_v4  ;;  %v1287_v10 = vpop.f32.mrb[6].mxu1 }
 0x106   : > { %992 = vst [vmem:[%s1517_s9 + $0x30] sm:$0xff] %v928_v7  ;;  %v960_v11 = vsel %vm832_vm9, %v1286_v0, %v896_v5  ;;  %vm801_vm12 = vcmp.gt.f32.partialorder %v1255_v9, 0.0  ;;  %v865_v13 = vmul.f32 0.2, %v1255_v9  ;;  %v558_v14 = vpop.f32.mrb[7].mxu0  ;;  %v686_v15 = vpop.f32.mrb[7].mxu1 }
 0x107   : > { %v926_v12 = vsel %vm798_vm10, %v555_v3, %v862_v6  ;;  %1024 = vst [vmem:[%s1517_s9 + $0x130] sm:$0xff] %v960_v11  ;;  %v958_v16 = vsel %vm830_vm11, %v683_v4, %v894_v8  ;;  %vm833_vm13 = vcmp.gt.f32.partialorder %v1287_v10, 0.0  ;;  %v897_v17 = vmul.f32 0.2, %v1287_v10 }
 0x108   : > { %990 = vst [vmem:[%s1517_s9 + $0x20] sm:$0xff] %v926_v12  ;;  %vm799_vm14 = vcmp.gt.f32.partialorder %v558_v14, 0.0  ;;  %1022 = vst [vmem:[%s1517_s9 + $0x120] sm:$0xff] %v958_v16  ;;  %v929_v18 = vsel %vm801_vm12, %v1255_v9, %v865_v13  ;;  %v863_v19 = vmul.f32 0.2, %v558_v14  ;;  %vm831_vm15 = vcmp.gt.f32.partialorder %v686_v15, 0.0 }
 0x109   : > { %v895_v20 = vmul.f32 0.2, %v686_v15  ;;  %993 = vst [vmem:[%s1517_s9 + $0x38] sm:$0xff] %v929_v18  ;;  %v961_v21 = vsel %vm833_vm13, %v1287_v10, %v897_v17 }
 0x10a   : > { %1025 = vst [vmem:[%s1517_s9 + $0x138] sm:$0xff] %v961_v21  ;;  %v927_v22 = vsel %vm799_vm14, %v558_v14, %v863_v19  ;;  %v1258_v24 = vpop.f32.mrb[8].mxu0  ;;  %v1290_v25 = vpop.f32.mrb[8].mxu1 }
 0x10b   : > { %v959_v23 = vsel %vm831_vm15, %v686_v15, %v895_v20  ;;  %991 = vst [vmem:[%s1517_s9 + $0x28] sm:$0xff] %v927_v22  ;;  %vm804_vm0 = vcmp.gt.f32.partialorder %v1258_v24, 0.0  ;;  %v868_v26 = vmul.f32 0.2, %v1258_v24  ;;  %vm836_vm1 = vcmp.gt.f32.partialorder %v1290_v25, 0.0  ;;  %v571_v28 = vpop.f32.mrb[9].mxu0 }
 0x10c   : > { %1023 = vst [vmem:[%s1517_s9 + $0x128] sm:$0xff] %v959_v23  ;;  %v900_v27 = vmul.f32 0.2, %v1290_v25  ;;  %v699_v29 = vpop.f32.mrb[9].mxu1  ;;  %vm802_vm2 = vcmp.gt.f32.partialorder %v571_v28, 0.0  ;;  %v1259_v33 = vpop.f32.mrb[10].mxu0 }
 0x10d   : > { %v932_v30 = vsel %vm804_vm0, %v1258_v24, %v868_v26  ;;  %v866_v32 = vmul.f32 0.2, %v571_v28  ;;  %v1291_v34 = vpop.f32.mrb[10].mxu1  ;;  %vm834_vm3 = vcmp.gt.f32.partialorder %v699_v29, 0.0  ;;  %v898_v35 = vmul.f32 0.2, %v699_v29 }
 0x10e   : > { %v964_v31 = vsel %vm836_vm1, %v1290_v25, %v900_v27  ;;  %996 = vst [vmem:[%s1517_s9 + $0x50] sm:$0xff] %v932_v30  ;;  %vm805_vm4 = vcmp.gt.f32.partialorder %v1259_v33, 0.0  ;;  %v869_v36 = vmul.f32 0.2, %v1259_v33  ;;  %vm837_vm5 = vcmp.gt.f32.partialorder %v1291_v34, 0.0  ;;  %v574_v39 = vpop.f32.mrb[11].mxu0 }
 0x10f   : > { %1028 = vst [vmem:[%s1517_s9 + $0x150] sm:$0xff] %v964_v31  ;;  %v930_v37 = vsel %vm802_vm2, %v571_v28, %v866_v32  ;;  %v901_v38 = vmul.f32 0.2, %v1291_v34  ;;  %v702_v40 = vpop.f32.mrb[11].mxu1  ;;  %v962_v41 = vsel %vm834_vm3, %v699_v29, %v898_v35  ;;  %vm803_vm6 = vcmp.gt.f32.partialorder %v574_v39, 0.0 }
 0x110   : > { %994 = vst [vmem:[%s1517_s9 + $0x40] sm:$0xff] %v930_v37  ;;  %v933_v42 = vsel %vm805_vm4, %v1259_v33, %v869_v36  ;;  %v867_v43 = vmul.f32 0.2, %v574_v39  ;;  %1026 = vst [vmem:[%s1517_s9 + $0x140] sm:$0xff] %v962_v41  ;;  %vm835_vm7 = vcmp.gt.f32.partialorder %v702_v40, 0.0 }
 0x111   : > { %997 = vst [vmem:[%s1517_s9 + $0x58] sm:$0xff] %v933_v42  ;;  %v965_v44 = vsel %vm837_vm5, %v1291_v34, %v901_v38  ;;  %v899_v45 = vmul.f32 0.2, %v702_v40 }
 0x112   : > { %1029 = vst [vmem:[%s1517_s9 + $0x158] sm:$0xff] %v965_v44  ;;  %v931_v46 = vsel %vm803_vm6, %v574_v39, %v867_v43  ;;  %v1262_v47 = vpop.f32.mrb[12].mxu0  ;;  %v1294_v48 = vpop.f32.mrb[12].mxu1 }
 0x113   : > { %995 = vst [vmem:[%s1517_s9 + $0x48] sm:$0xff] %v931_v46  ;;  %v963_v49 = vsel %vm835_vm7, %v702_v40, %v899_v45  ;;  %vm808_vm8 = vcmp.gt.f32.partialorder %v1262_v47, 0.0  ;;  %v872_v50 = vmul.f32 0.2, %v1262_v47  ;;  %vm840_vm9 = vcmp.gt.f32.partialorder %v1294_v48, 0.0  ;;  %v587_v51 = vpop.f32.mrb[13].mxu0 }
 0x114   : > { %v715_v52 = vpop.f32.mrb[13].mxu1  ;;  %1027 = vst [vmem:[%s1517_s9 + $0x148] sm:$0xff] %v963_v49  ;;  %v904_v53 = vmul.f32 0.2, %v1294_v48  ;;  %vm806_vm10 = vcmp.gt.f32.partialorder %v587_v51, 0.0  ;;  %v1263_v57 = vpop.f32.mrb[14].mxu0 }
 0x115   : > { %v870_v54 = vmul.f32 0.2, %v587_v51  ;;  %vm838_vm11 = vcmp.gt.f32.partialorder %v715_v52, 0.0  ;;  %v936_v55 = vsel %vm808_vm8, %v1262_v47, %v872_v50  ;;  %v902_v56 = vmul.f32 0.2, %v715_v52  ;;  %v1295_v58 = vpop.f32.mrb[14].mxu1 }
 0x116   : > { %1000 = vst [vmem:[%s1517_s9 + $0x70] sm:$0xff] %v936_v55  ;;  %v968_v59 = vsel %vm840_vm9, %v1294_v48, %v904_v53  ;;  %vm809_vm12 = vcmp.gt.f32.partialorder %v1263_v57, 0.0  ;;  %v873_v61 = vmul.f32 0.2, %v1263_v57  ;;  %v590_v62 = vpop.f32.mrb[15].mxu0  ;;  %v718_v63 = vpop.f32.mrb[15].mxu1 }
 0x117   : > { %v934_v60 = vsel %vm806_vm10, %v587_v51, %v870_v54  ;;  %1032 = vst [vmem:[%s1517_s9 + $0x170] sm:$0xff] %v968_v59  ;;  %v966_v0 = vsel %vm838_vm11, %v715_v52, %v902_v56  ;;  %vm841_vm13 = vcmp.gt.f32.partialorder %v1295_v58, 0.0  ;;  %v905_v1 = vmul.f32 0.2, %v1295_v58 }
 0x118   : > { %998 = vst [vmem:[%s1517_s9 + $0x60] sm:$0xff] %v934_v60  ;;  %vm807_vm14 = vcmp.gt.f32.partialorder %v590_v62, 0.0  ;;  %1030 = vst [vmem:[%s1517_s9 + $0x160] sm:$0xff] %v966_v0  ;;  %v937_v2 = vsel %vm809_vm12, %v1263_v57, %v873_v61  ;;  %v871_v3 = vmul.f32 0.2, %v590_v62  ;;  %vm839_vm15 = vcmp.gt.f32.partialorder %v718_v63, 0.0 }
 0x119   : > { %v903_v4 = vmul.f32 0.2, %v718_v63  ;;  %1001 = vst [vmem:[%s1517_s9 + $0x78] sm:$0xff] %v937_v2  ;;  %v969_v5 = vsel %vm841_vm13, %v1295_v58, %v905_v1 }
 0x11a   : > { %1033 = vst [vmem:[%s1517_s9 + $0x178] sm:$0xff] %v969_v5  ;;  %v935_v6 = vsel %vm807_vm14, %v590_v62, %v871_v3  ;;  %v1266_v8 = vpop.f32.mrb[16].mxu0  ;;  %v1298_v9 = vpop.f32.mrb[16].mxu1 }
 0x11b   : > { %v967_v7 = vsel %vm839_vm15, %v718_v63, %v903_v4  ;;  %999 = vst [vmem:[%s1517_s9 + $0x68] sm:$0xff] %v935_v6  ;;  %vm812_vm0 = vcmp.gt.f32.partialorder %v1266_v8, 0.0  ;;  %v876_v10 = vmul.f32 0.2, %v1266_v8  ;;  %vm844_vm1 = vcmp.gt.f32.partialorder %v1298_v9, 0.0  ;;  %v603_v12 = vpop.f32.mrb[17].mxu0 }
 0x11c   : > { %1031 = vst [vmem:[%s1517_s9 + $0x168] sm:$0xff] %v967_v7  ;;  %v908_v11 = vmul.f32 0.2, %v1298_v9  ;;  %v731_v13 = vpop.f32.mrb[17].mxu1  ;;  %vm810_vm2 = vcmp.gt.f32.partialorder %v603_v12, 0.0  ;;  %v1267_v17 = vpop.f32.mrb[18].mxu0 }
 0x11d   : > { %v940_v14 = vsel %vm812_vm0, %v1266_v8, %v876_v10  ;;  %v874_v16 = vmul.f32 0.2, %v603_v12  ;;  %v1299_v18 = vpop.f32.mrb[18].mxu1  ;;  %vm842_vm3 = vcmp.gt.f32.partialorder %v731_v13, 0.0  ;;  %v906_v19 = vmul.f32 0.2, %v731_v13 }
 0x11e   : > { %v972_v15 = vsel %vm844_vm1, %v1298_v9, %v908_v11  ;;  %1004 = vst [vmem:[%s1517_s9 + $0x90] sm:$0xff] %v940_v14  ;;  %vm813_vm4 = vcmp.gt.f32.partialorder %v1267_v17, 0.0  ;;  %v877_v20 = vmul.f32 0.2, %v1267_v17  ;;  %vm845_vm5 = vcmp.gt.f32.partialorder %v1299_v18, 0.0  ;;  %v606_v23 = vpop.f32.mrb[19].mxu0 }
 0x11f   : > { %1036 = vst [vmem:[%s1517_s9 + $0x190] sm:$0xff] %v972_v15  ;;  %v938_v21 = vsel %vm810_vm2, %v603_v12, %v874_v16  ;;  %v909_v22 = vmul.f32 0.2, %v1299_v18  ;;  %v734_v24 = vpop.f32.mrb[19].mxu1  ;;  %v970_v25 = vsel %vm842_vm3, %v731_v13, %v906_v19  ;;  %vm811_vm6 = vcmp.gt.f32.partialorder %v606_v23, 0.0 }
 0x120   : > { %1002 = vst [vmem:[%s1517_s9 + $0x80] sm:$0xff] %v938_v21  ;;  %v941_v26 = vsel %vm813_vm4, %v1267_v17, %v877_v20  ;;  %v875_v27 = vmul.f32 0.2, %v606_v23  ;;  %1034 = vst [vmem:[%s1517_s9 + $0x180] sm:$0xff] %v970_v25  ;;  %vm843_vm7 = vcmp.gt.f32.partialorder %v734_v24, 0.0 }
 0x121   : > { %1005 = vst [vmem:[%s1517_s9 + $0x98] sm:$0xff] %v941_v26  ;;  %v973_v28 = vsel %vm845_vm5, %v1299_v18, %v909_v22  ;;  %v907_v29 = vmul.f32 0.2, %v734_v24 }
 0x122   : > { %1037 = vst [vmem:[%s1517_s9 + $0x198] sm:$0xff] %v973_v28  ;;  %v939_v30 = vsel %vm811_vm6, %v606_v23, %v875_v27  ;;  %v1270_v31 = vpop.f32.mrb[20].mxu0  ;;  %v1302_v32 = vpop.f32.mrb[20].mxu1 }
 0x123   : > { %1003 = vst [vmem:[%s1517_s9 + $0x88] sm:$0xff] %v939_v30  ;;  %v971_v33 = vsel %vm843_vm7, %v734_v24, %v907_v29  ;;  %vm816_vm8 = vcmp.gt.f32.partialorder %v1270_v31, 0.0  ;;  %v880_v34 = vmul.f32 0.2, %v1270_v31  ;;  %vm848_vm9 = vcmp.gt.f32.partialorder %v1302_v32, 0.0  ;;  %v619_v35 = vpop.f32.mrb[21].mxu0 }
 0x124   : > { %v747_v36 = vpop.f32.mrb[21].mxu1  ;;  %1035 = vst [vmem:[%s1517_s9 + $0x188] sm:$0xff] %v971_v33  ;;  %v912_v37 = vmul.f32 0.2, %v1302_v32  ;;  %vm814_vm10 = vcmp.gt.f32.partialorder %v619_v35, 0.0  ;;  %v1271_v41 = vpop.f32.mrb[22].mxu0 }
 0x125   : > { %v878_v38 = vmul.f32 0.2, %v619_v35  ;;  %vm846_vm11 = vcmp.gt.f32.partialorder %v747_v36, 0.0  ;;  %v944_v39 = vsel %vm816_vm8, %v1270_v31, %v880_v34  ;;  %v910_v40 = vmul.f32 0.2, %v747_v36  ;;  %v1303_v42 = vpop.f32.mrb[22].mxu1 }
 0x126   : > { %1008 = vst [vmem:[%s1517_s9 + $0xb0] sm:$0xff] %v944_v39  ;;  %v976_v43 = vsel %vm848_vm9, %v1302_v32, %v912_v37  ;;  %vm817_vm12 = vcmp.gt.f32.partialorder %v1271_v41, 0.0  ;;  %v881_v45 = vmul.f32 0.2, %v1271_v41  ;;  %v622_v46 = vpop.f32.mrb[23].mxu0  ;;  %v750_v47 = vpop.f32.mrb[23].mxu1 }
 0x127   : > { %v942_v44 = vsel %vm814_vm10, %v619_v35, %v878_v38  ;;  %1040 = vst [vmem:[%s1517_s9 + $0x1b0] sm:$0xff] %v976_v43  ;;  %v974_v48 = vsel %vm846_vm11, %v747_v36, %v910_v40  ;;  %vm849_vm13 = vcmp.gt.f32.partialorder %v1303_v42, 0.0  ;;  %v913_v49 = vmul.f32 0.2, %v1303_v42 }
 0x128   : > { %1006 = vst [vmem:[%s1517_s9 + $0xa0] sm:$0xff] %v942_v44  ;;  %vm815_vm14 = vcmp.gt.f32.partialorder %v622_v46, 0.0  ;;  %1038 = vst [vmem:[%s1517_s9 + $0x1a0] sm:$0xff] %v974_v48  ;;  %v945_v50 = vsel %vm817_vm12, %v1271_v41, %v881_v45  ;;  %v879_v51 = vmul.f32 0.2, %v622_v46  ;;  %vm847_vm15 = vcmp.gt.f32.partialorder %v750_v47, 0.0 }
 0x129   : > { %v911_v52 = vmul.f32 0.2, %v750_v47  ;;  %1009 = vst [vmem:[%s1517_s9 + $0xb8] sm:$0xff] %v945_v50  ;;  %v977_v53 = vsel %vm849_vm13, %v1303_v42, %v913_v49 }
 0x12a   : > { %1041 = vst [vmem:[%s1517_s9 + $0x1b8] sm:$0xff] %v977_v53  ;;  %v943_v54 = vsel %vm815_vm14, %v622_v46, %v879_v51  ;;  %v1274_v56 = vpop.f32.mrb[24].mxu0  ;;  %v1306_v57 = vpop.f32.mrb[24].mxu1 }
 0x12b   : > { %v975_v55 = vsel %vm847_vm15, %v750_v47, %v911_v52  ;;  %1007 = vst [vmem:[%s1517_s9 + $0xa8] sm:$0xff] %v943_v54  ;;  %vm820_vm0 = vcmp.gt.f32.partialorder %v1274_v56, 0.0  ;;  %v884_v58 = vmul.f32 0.2, %v1274_v56  ;;  %vm852_vm1 = vcmp.gt.f32.partialorder %v1306_v57, 0.0  ;;  %v635_v60 = vpop.f32.mrb[25].mxu0 }
 0x12c   : > { %1039 = vst [vmem:[%s1517_s9 + $0x1a8] sm:$0xff] %v975_v55  ;;  %v916_v59 = vmul.f32 0.2, %v1306_v57  ;;  %v763_v61 = vpop.f32.mrb[25].mxu1  ;;  %vm818_vm2 = vcmp.gt.f32.partialorder %v635_v60, 0.0  ;;  %v1275_v1 = vpop.f32.mrb[26].mxu0 }
 0x12d   : > { %v948_v62 = vsel %vm820_vm0, %v1274_v56, %v884_v58  ;;  %v882_v0 = vmul.f32 0.2, %v635_v60  ;;  %v1307_v2 = vpop.f32.mrb[26].mxu1  ;;  %vm850_vm3 = vcmp.gt.f32.partialorder %v763_v61, 0.0  ;;  %v914_v3 = vmul.f32 0.2, %v763_v61 }
 0x12e   : > { %v980_v63 = vsel %vm852_vm1, %v1306_v57, %v916_v59  ;;  %1012 = vst [vmem:[%s1517_s9 + $0xd0] sm:$0xff] %v948_v62  ;;  %vm821_vm4 = vcmp.gt.f32.partialorder %v1275_v1, 0.0  ;;  %v885_v4 = vmul.f32 0.2, %v1275_v1  ;;  %vm853_vm5 = vcmp.gt.f32.partialorder %v1307_v2, 0.0  ;;  %v638_v7 = vpop.f32.mrb[27].mxu0 }
 0x12f   : > { %1044 = vst [vmem:[%s1517_s9 + $0x1d0] sm:$0xff] %v980_v63  ;;  %v946_v5 = vsel %vm818_vm2, %v635_v60, %v882_v0  ;;  %v917_v6 = vmul.f32 0.2, %v1307_v2  ;;  %v766_v8 = vpop.f32.mrb[27].mxu1  ;;  %v978_v9 = vsel %vm850_vm3, %v763_v61, %v914_v3  ;;  %vm819_vm6 = vcmp.gt.f32.partialorder %v638_v7, 0.0 }
 0x130   : > { %1010 = vst [vmem:[%s1517_s9 + $0xc0] sm:$0xff] %v946_v5  ;;  %v949_v10 = vsel %vm821_vm4, %v1275_v1, %v885_v4  ;;  %v883_v11 = vmul.f32 0.2, %v638_v7  ;;  %1042 = vst [vmem:[%s1517_s9 + $0x1c0] sm:$0xff] %v978_v9  ;;  %vm851_vm7 = vcmp.gt.f32.partialorder %v766_v8, 0.0 }
 0x131   : > { %1013 = vst [vmem:[%s1517_s9 + $0xd8] sm:$0xff] %v949_v10  ;;  %v981_v12 = vsel %vm853_vm5, %v1307_v2, %v917_v6  ;;  %v915_v13 = vmul.f32 0.2, %v766_v8 }
 0x132   : > { %1045 = vst [vmem:[%s1517_s9 + $0x1d8] sm:$0xff] %v981_v12  ;;  %v947_v14 = vsel %vm819_vm6, %v638_v7, %v883_v11  ;;  %v1278_v15 = vpop.f32.mrb[28].mxu0  ;;  %v1310_v16 = vpop.f32.mrb[28].mxu1 }
 0x133   : > { %1011 = vst [vmem:[%s1517_s9 + $0xc8] sm:$0xff] %v947_v14  ;;  %v979_v17 = vsel %vm851_vm7, %v766_v8, %v915_v13  ;;  %vm824_vm8 = vcmp.gt.f32.partialorder %v1278_v15, 0.0  ;;  %v888_v18 = vmul.f32 0.2, %v1278_v15  ;;  %vm856_vm9 = vcmp.gt.f32.partialorder %v1310_v16, 0.0  ;;  %v651_v19 = vpop.f32.mrb[29].mxu0 }
 0x134   : > { %v779_v20 = vpop.f32.mrb[29].mxu1  ;;  %1043 = vst [vmem:[%s1517_s9 + $0x1c8] sm:$0xff] %v979_v17  ;;  %v920_v21 = vmul.f32 0.2, %v1310_v16  ;;  %vm822_vm10 = vcmp.gt.f32.partialorder %v651_v19, 0.0  ;;  %v1279_v25 = vpop.f32.mrb[30].mxu0 }
 0x135   : > { %v886_v22 = vmul.f32 0.2, %v651_v19  ;;  %vm854_vm11 = vcmp.gt.f32.partialorder %v779_v20, 0.0  ;;  %v952_v23 = vsel %vm824_vm8, %v1278_v15, %v888_v18  ;;  %v918_v24 = vmul.f32 0.2, %v779_v20  ;;  %v1311_v26 = vpop.f32.mrb[30].mxu1 }
 0x136   : > { %1016 = vst [vmem:[%s1517_s9 + $0xf0] sm:$0xff] %v952_v23  ;;  %v984_v27 = vsel %vm856_vm9, %v1310_v16, %v920_v21  ;;  %vm825_vm12 = vcmp.gt.f32.partialorder %v1279_v25, 0.0  ;;  %v889_v29 = vmul.f32 0.2, %v1279_v25  ;;  %v654_v30 = vpop.f32.mrb[31].mxu0  ;;  %v782_v31 = vpop.f32.mrb[31].mxu1 }
 0x137   : > { %v950_v28 = vsel %vm822_vm10, %v651_v19, %v886_v22  ;;  %1048 = vst [vmem:[%s1517_s9 + $0x1f0] sm:$0xff] %v984_v27  ;;  %v982_v32 = vsel %vm854_vm11, %v779_v20, %v918_v24  ;;  %vm857_vm13 = vcmp.gt.f32.partialorder %v1311_v26, 0.0  ;;  %v921_v33 = vmul.f32 0.2, %v1311_v26 }
 0x138   : > { %1014 = vst [vmem:[%s1517_s9 + $0xe0] sm:$0xff] %v950_v28  ;;  %vm823_vm14 = vcmp.gt.f32.partialorder %v654_v30, 0.0  ;;  %1046 = vst [vmem:[%s1517_s9 + $0x1e0] sm:$0xff] %v982_v32  ;;  %v953_v34 = vsel %vm825_vm12, %v1279_v25, %v889_v29  ;;  %v887_v35 = vmul.f32 0.2, %v654_v30  ;;  %vm855_vm15 = vcmp.gt.f32.partialorder %v782_v31, 0.0 }
 0x139   : > { %v919_v36 = vmul.f32 0.2, %v782_v31  ;;  %1017 = vst [vmem:[%s1517_s9 + $0xf8] sm:$0xff] %v953_v34  ;;  %v985_v37 = vsel %vm857_vm13, %v1311_v26, %v921_v33 }
 0x13a   : > { %1049 = vst [vmem:[%s1517_s9 + $0x1f8] sm:$0xff] %v985_v37  ;;  %v951_v38 = vsel %vm823_vm14, %v654_v30, %v887_v35 }
 0x13b   : > { %v983_v39 = vsel %vm855_vm15, %v782_v31, %v919_v36  ;;  %1015 = vst [vmem:[%s1517_s9 + $0xe8] sm:$0xff] %v951_v38 }
 0x13c   : > { %1047 = vst [vmem:[%s1517_s9 + $0x1e8] sm:$0xff] %v983_v39 }
 0x13d PF: > { %s12_s11 = sadd.s32 1, %s1414_s11   ;;  %s1595_s9 = smov %s1410_s10 }
 0x13e   : > { %p9_p5 = scmp.ge.s32.totalorder %s12_s11, 6   ;;  %s1596_s10 = smov %s1598_s12 }
 0x140   :  { %11 = sbr.rel (!%p9_p5) target bundleno = 2 (0x2), region = 61 }

// kernel: discriminator_forward.9
= control target key start
LH: loop header
LB: loop body
LE: loop exit
PB: predicated region body
PF: predicated region fallthrough
CT: control target
= control target key end

     0   :  { %v1131_v40 = vmov 0.0   ;;  %s1679_s1 = inlined_call_operand.vmem [shape: bf16[128,128], index: 1, kind: input, shape index: {}]   ;;  %s1680_s0 = inlined_call_operand.vmem [shape: bf16[512,128], index: 0, kind: input, shape index: {}]   ;;  %s1681_s3 = inlined_call_operand.vmem [shape: f32[1,128], index: 3, kind: output, shape index: {1}]   ;;  %s1682_s4 = inlined_call_operand.vmem [shape: f32[1,128], index: 4, kind: output, shape index: {2}]   ;;  %s1683_s2 = inlined_call_operand.vmem [shape: f32[512,128], index: 2, kind: output, shape index: {0}]  }
   0x1   :  { %v1091_v0 = vld [vmem:[%s1679_s1] sm:$0xff]   ;;  %v1092_v1 = vld [vmem:[%s1679_s1 + $0x8] sm:$0xff]   ;;  %v1093_v2 = vld [vmem:[%s1679_s1 + $0x10] sm:$0xff]   ;;  %692 = vst [vmem:[%s1681_s3] sm:$0x1] %v1131_v40 }
   0x2   :  { %994 = vmatprep.subr.bf16.mxu0 %v1091_v0  ;;  %1074 = vmatprep.subr.bf16.mxu1 %v1091_v0  ;;  %v1094_v3 = vld [vmem:[%s1679_s1 + $0x18] sm:$0xff]   ;;  %v1099_v4 = vld [vmem:[%s1680_s0] sm:$0xff]   ;;  %v1096_v6 = vld [vmem:[%s1679_s1 + $0x28] sm:$0xff]   ;;  %693 = vst [vmem:[%s1682_s4] sm:$0x1] %v1131_v40 }
   0x3   :  { %995 = vmatpush3.bf16.msra.mxu0 %v1091_v0  ;;  %1082 = vmatpush3.bf16.msra.mxu1 %v1091_v0  ;;  %v1095_v5 = vld [vmem:[%s1679_s1 + $0x20] sm:$0xff]   ;;  %v1097_v7 = vld [vmem:[%s1679_s1 + $0x30] sm:$0xff]   ;;  %v1098_v8 = vld [vmem:[%s1679_s1 + $0x38] sm:$0xff]  }
   0x4   :  { %996 = vmatprep.subr.bf16.mxu0 %v1092_v1  ;;  %1075 = vmatprep.subr.bf16.mxu1 %v1092_v1  ;;  %v1115_v9 = vld [vmem:[%s1680_s0 + $0x80] sm:$0xff]   ;;  %v1100_v10 = vld [vmem:[%s1680_s0 + $0x8] sm:$0xff]   ;;  %v1101_v11 = vld [vmem:[%s1680_s0 + $0x10] sm:$0xff]  }
   0x5   :  { %1010 = vmatprep.mubr.bf16.mxu0 %v1099_v4  ;;  %1042 = vmatprep.mubr.bf16.mxu1 %v1115_v9  ;;  %v1116_v12 = vld [vmem:[%s1680_s0 + $0x88] sm:$0xff]   ;;  %v1117_v13 = vld [vmem:[%s1680_s0 + $0x90] sm:$0xff]   ;;  %v1102_v14 = vld [vmem:[%s1680_s0 + $0x18] sm:$0xff]  }
   0x6   :  { %v1103_v15 = vld [vmem:[%s1680_s0 + $0x20] sm:$0xff]   ;;  %v1118_v16 = vld [vmem:[%s1680_s0 + $0x98] sm:$0xff]   ;;  %v1104_v18 = vld [vmem:[%s1680_s0 + $0x28] sm:$0xff]  }
   0x7   :  { %997 = vmatpush3.bf16.msra.mxu0 %v1092_v1  ;;  %1083 = vmatpush3.bf16.msra.mxu1 %v1092_v1  ;;  %v1119_v17 = vld [vmem:[%s1680_s0 + $0xa0] sm:$0xff]   ;;  %v1120_v19 = vld [vmem:[%s1680_s0 + $0xa8] sm:$0xff]   ;;  %v1105_v20 = vld [vmem:[%s1680_s0 + $0x30] sm:$0xff]  }
   0x8   :  { %998 = vmatprep.subr.bf16.mxu0 %v1093_v2  ;;  %1076 = vmatprep.subr.bf16.mxu1 %v1093_v2  ;;  %v1121_v21 = vld [vmem:[%s1680_s0 + $0xb0] sm:$0xff]   ;;  %v1106_v22 = vld [vmem:[%s1680_s0 + $0x38] sm:$0xff]   ;;  %v1107_v24 = vld [vmem:[%s1680_s0 + $0x40] sm:$0xff]  }
   0x9   :  { %v1122_v23 = vld [vmem:[%s1680_s0 + $0xb8] sm:$0xff]   ;;  %v1123_v25 = vld [vmem:[%s1680_s0 + $0xc0] sm:$0xff]   ;;  %v1108_v26 = vld [vmem:[%s1680_s0 + $0x48] sm:$0xff]  }
   0xa   :  { %v1124_v27 = vld [vmem:[%s1680_s0 + $0xc8] sm:$0xff]   ;;  %v1109_v28 = vld [vmem:[%s1680_s0 + $0x50] sm:$0xff]   ;;  %v1110_v30 = vld [vmem:[%s1680_s0 + $0x58] sm:$0xff]  }
   0xb   :  { %999 = vmatpush3.bf16.msra.mxu0 %v1093_v2  ;;  %1084 = vmatpush3.bf16.msra.mxu1 %v1093_v2  ;;  %v1125_v29 = vld [vmem:[%s1680_s0 + $0xd0] sm:$0xff]   ;;  %v1126_v31 = vld [vmem:[%s1680_s0 + $0xd8] sm:$0xff]   ;;  %v1111_v32 = vld [vmem:[%s1680_s0 + $0x60] sm:$0xff]  }
   0xc   :  { %1000 = vmatprep.subr.bf16.mxu0 %v1094_v3  ;;  %1077 = vmatprep.subr.bf16.mxu1 %v1094_v3  ;;  %v1127_v33 = vld [vmem:[%s1680_s0 + $0xe0] sm:$0xff]   ;;  %v1112_v34 = vld [vmem:[%s1680_s0 + $0x68] sm:$0xff]   ;;  %v1113_v36 = vld [vmem:[%s1680_s0 + $0x70] sm:$0xff]  }
   0xd   :  { %v1128_v35 = vld [vmem:[%s1680_s0 + $0xe8] sm:$0xff]   ;;  %v1129_v37 = vld [vmem:[%s1680_s0 + $0xf0] sm:$0xff]   ;;  %v1114_v38 = vld [vmem:[%s1680_s0 + $0x78] sm:$0xff]  }
   0xe   :  { %v1130_v39 = vld [vmem:[%s1680_s0 + $0xf8] sm:$0xff]  }
   0xf   :  { %1001 = vmatpush3.bf16.msra.mxu0 %v1094_v3  ;;  %1085 = vmatpush3.bf16.msra.mxu1 %v1094_v3 }
  0x10   :  { %1002 = vmatprep.subr.bf16.mxu0 %v1095_v5  ;;  %1078 = vmatprep.subr.bf16.mxu1 %v1095_v5 }
  0x13   :  { %1003 = vmatpush3.bf16.msra.mxu0 %v1095_v5  ;;  %1086 = vmatpush3.bf16.msra.mxu1 %v1095_v5 }
  0x14   :  { %1004 = vmatprep.subr.bf16.mxu0 %v1096_v6  ;;  %1079 = vmatprep.subr.bf16.mxu1 %v1096_v6 }
  0x17   :  { %1005 = vmatpush3.bf16.msra.mxu0 %v1096_v6  ;;  %1087 = vmatpush3.bf16.msra.mxu1 %v1096_v6 }
  0x18   :  { %1006 = vmatprep.subr.bf16.mxu0 %v1097_v7  ;;  %1080 = vmatprep.subr.bf16.mxu1 %v1097_v7 }
  0x1b   :  { %1007 = vmatpush3.bf16.msra.mxu0 %v1097_v7  ;;  %1088 = vmatpush3.bf16.msra.mxu1 %v1097_v7 }
  0x1c   :  { %1008 = vmatprep.subr.bf16.mxu0 %v1098_v8  ;;  %1081 = vmatprep.subr.bf16.mxu1 %v1098_v8 }
  0x1f   :  { %1009 = vmatpush3.bf16.msra.mxu0 %v1098_v8  ;;  %1089 = vmatpush3.bf16.msra.mxu1 %v1098_v8 }
  0x22   :  { %1011 = vmatmul.mubr.bf16.vlgmr.msra.gmra.mrb[0].mxu0 %v1100_v10  ;;  %1043 = vmatmul.mubr.bf16.vlgmr.msra.gmra.mrb[0].mxu1 %v1116_v12 }
  0x23   :  { %1014 = vmatprep.mubr.bf16.mxu0 %v1101_v11  ;;  %1046 = vmatprep.mubr.bf16.mxu1 %v1117_v13 }
  0x2a   :  { %1015 = vmatmul.mubr.bf16.gmra.mrb[4].mxu0 %v1102_v14  ;;  %1047 = vmatmul.mubr.bf16.gmra.mrb[4].mxu1 %v1118_v16 }
  0x2b   :  { %1018 = vmatprep.mubr.bf16.mxu0 %v1103_v15  ;;  %1050 = vmatprep.mubr.bf16.mxu1 %v1119_v17 }
  0x32   :  { %1019 = vmatmul.mubr.bf16.gmra.mrb[8].mxu0 %v1104_v18  ;;  %1051 = vmatmul.mubr.bf16.gmra.mrb[8].mxu1 %v1120_v19 }
  0x33   :  { %1022 = vmatprep.mubr.bf16.mxu0 %v1105_v20  ;;  %1054 = vmatprep.mubr.bf16.mxu1 %v1121_v21 }
  0x3a   :  { %1023 = vmatmul.mubr.bf16.gmra.mrb[12].mxu0 %v1106_v22  ;;  %1055 = vmatmul.mubr.bf16.gmra.mrb[12].mxu1 %v1122_v23 }
  0x3b   :  { %1026 = vmatprep.mubr.bf16.mxu0 %v1107_v24  ;;  %1058 = vmatprep.mubr.bf16.mxu1 %v1123_v25 }
  0x42   :  { %1027 = vmatmul.mubr.bf16.gmra.mrb[16].mxu0 %v1108_v26  ;;  %1059 = vmatmul.mubr.bf16.gmra.mrb[16].mxu1 %v1124_v27 }
  0x43   :  { %1030 = vmatprep.mubr.bf16.mxu0 %v1109_v28  ;;  %1062 = vmatprep.mubr.bf16.mxu1 %v1125_v29 }
  0x4a   :  { %1031 = vmatmul.mubr.bf16.gmra.mrb[20].mxu0 %v1110_v30  ;;  %1063 = vmatmul.mubr.bf16.gmra.mrb[20].mxu1 %v1126_v31 }
  0x4b   :  { %1034 = vmatprep.mubr.bf16.mxu0 %v1111_v32  ;;  %1066 = vmatprep.mubr.bf16.mxu1 %v1127_v33 }
  0x52   :  { %1035 = vmatmul.mubr.bf16.gmra.mrb[24].mxu0 %v1112_v34  ;;  %1067 = vmatmul.mubr.bf16.gmra.mrb[24].mxu1 %v1128_v35 }
  0x53   :  { %1038 = vmatprep.mubr.bf16.mxu0 %v1113_v36  ;;  %1070 = vmatprep.mubr.bf16.mxu1 %v1129_v37 }
  0x5a   :  { %1039 = vmatmul.mubr.bf16.gmra.mrb[28].mxu0 %v1114_v38  ;;  %1071 = vmatmul.mubr.bf16.gmra.mrb[28].mxu1 %v1130_v39 }
  0xf5   :  { %v1012_v41 = vpop.f32.mrb[0].mxu0  ;;  %v1283_v42 = vpop.f32.mrb[0].mxu1 }
  0xf6   :  { %626 = vst [vmem:[%s1683_s2 + $0x10] sm:$0xff] %v1012_v41  ;;  %v369_v43 = vpop.f32.mrb[1].mxu0  ;;  %658 = vst [vmem:[%s1683_s2 + $0x110] sm:$0xff] %v1283_v42  ;;  %v1292_v44 = vpop.f32.mrb[1].mxu1  ;;  %v769_v52 = vmul.f32 %v1012_v41, %v1012_v41 }
  0xf7   :  { %624 = vst [vmem:[%s1683_s2] sm:$0xff] %v369_v43  ;;  %v1013_v45 = vpop.f32.mrb[2].mxu0  ;;  %656 = vst [vmem:[%s1683_s2 + $0x100] sm:$0xff] %v1292_v44  ;;  %v1301_v46 = vpop.f32.mrb[2].mxu1  ;;  %v767_v49 = vmul.f32 %v369_v43, %v369_v43 }
  0xf8   :  { %627 = vst [vmem:[%s1683_s2 + $0x18] sm:$0xff] %v1013_v45  ;;  %v372_v47 = vpop.f32.mrb[3].mxu0  ;;  %659 = vst [vmem:[%s1683_s2 + $0x118] sm:$0xff] %v1301_v46  ;;  %v1310_v48 = vpop.f32.mrb[3].mxu1  ;;  %v770_v55 = vmul.f32 %v1013_v45, %v1013_v45 }
  0xf9   :  { %625 = vst [vmem:[%s1683_s2 + $0x8] sm:$0xff] %v372_v47  ;;  %v695_v50 = vadd.f32 %v372_v47, %v369_v43  ;;  %v768_v51 = vmul.f32 %v372_v47, %v372_v47  ;;  %657 = vst [vmem:[%s1683_s2 + $0x108] sm:$0xff] %v1310_v48 }
  0xfb   :  { %v696_v53 = vadd.f32 %v1012_v41, %v695_v50  ;;  %v831_v54 = vadd.f32 %v768_v51, %v767_v49 }
  0xfd   :  { %v832_v56 = vadd.f32 %v831_v54, %v769_v52  ;;  %v1016_v57 = vpop.f32.mrb[4].mxu0  ;;  %v697_v58 = vadd.f32 %v1013_v45, %v696_v53  ;;  %v1319_v59 = vpop.f32.mrb[4].mxu1 }
  0xfe   :  { %630 = vst [vmem:[%s1683_s2 + $0x30] sm:$0xff] %v1016_v57  ;;  %v385_v60 = vpop.f32.mrb[5].mxu0  ;;  %662 = vst [vmem:[%s1683_s2 + $0x130] sm:$0xff] %v1319_v59  ;;  %v1328_v61 = vpop.f32.mrb[5].mxu1  ;;  %v773_v8 = vmul.f32 %v1016_v57, %v1016_v57 }
  0xff   :  { %628 = vst [vmem:[%s1683_s2 + $0x20] sm:$0xff] %v385_v60  ;;  %v698_v62 = vadd.f32 %v697_v58, %v385_v60  ;;  %v771_v63 = vmul.f32 %v385_v60, %v385_v60  ;;  %v833_v0 = vadd.f32 %v832_v56, %v770_v55  ;;  %v1017_v1 = vpop.f32.mrb[6].mxu0  ;;  %660 = vst [vmem:[%s1683_s2 + $0x120] sm:$0xff] %v1328_v61  ;;  %v1337_v2 = vpop.f32.mrb[6].mxu1 }
 0x100   :  { %631 = vst [vmem:[%s1683_s2 + $0x38] sm:$0xff] %v1017_v1  ;;  %v388_v3 = vpop.f32.mrb[7].mxu0  ;;  %663 = vst [vmem:[%s1683_s2 + $0x138] sm:$0xff] %v1337_v2  ;;  %v1346_v4 = vpop.f32.mrb[7].mxu1  ;;  %v774_v11 = vmul.f32 %v1017_v1, %v1017_v1 }
 0x101   :  { %v834_v5 = vadd.f32 %v833_v0, %v771_v63  ;;  %629 = vst [vmem:[%s1683_s2 + $0x28] sm:$0xff] %v388_v3  ;;  %v699_v6 = vadd.f32 %v698_v62, %v388_v3  ;;  %v772_v7 = vmul.f32 %v388_v3, %v388_v3  ;;  %661 = vst [vmem:[%s1683_s2 + $0x128] sm:$0xff] %v1346_v4 }
 0x103   :  { %v700_v9 = vadd.f32 %v1016_v57, %v699_v6  ;;  %v835_v10 = vadd.f32 %v834_v5, %v772_v7 }
 0x105   :  { %v836_v12 = vadd.f32 %v835_v10, %v773_v8  ;;  %v1020_v13 = vpop.f32.mrb[8].mxu0  ;;  %v701_v14 = vadd.f32 %v1017_v1, %v700_v9  ;;  %v1355_v15 = vpop.f32.mrb[8].mxu1 }
 0x106   :  { %634 = vst [vmem:[%s1683_s2 + $0x50] sm:$0xff] %v1020_v13  ;;  %v401_v16 = vpop.f32.mrb[9].mxu0  ;;  %666 = vst [vmem:[%s1683_s2 + $0x150] sm:$0xff] %v1355_v15  ;;  %v1364_v17 = vpop.f32.mrb[9].mxu1  ;;  %v777_v28 = vmul.f32 %v1020_v13, %v1020_v13 }
 0x107   :  { %632 = vst [vmem:[%s1683_s2 + $0x40] sm:$0xff] %v401_v16  ;;  %v702_v18 = vadd.f32 %v701_v14, %v401_v16  ;;  %v775_v19 = vmul.f32 %v401_v16, %v401_v16  ;;  %v837_v20 = vadd.f32 %v836_v12, %v774_v11  ;;  %v1021_v21 = vpop.f32.mrb[10].mxu0  ;;  %664 = vst [vmem:[%s1683_s2 + $0x140] sm:$0xff] %v1364_v17  ;;  %v1373_v22 = vpop.f32.mrb[10].mxu1 }
 0x108   :  { %635 = vst [vmem:[%s1683_s2 + $0x58] sm:$0xff] %v1021_v21  ;;  %v404_v23 = vpop.f32.mrb[11].mxu0  ;;  %667 = vst [vmem:[%s1683_s2 + $0x158] sm:$0xff] %v1373_v22  ;;  %v1382_v24 = vpop.f32.mrb[11].mxu1  ;;  %v778_v31 = vmul.f32 %v1021_v21, %v1021_v21 }
 0x109   :  { %v838_v25 = vadd.f32 %v837_v20, %v775_v19  ;;  %633 = vst [vmem:[%s1683_s2 + $0x48] sm:$0xff] %v404_v23  ;;  %v703_v26 = vadd.f32 %v702_v18, %v404_v23  ;;  %v776_v27 = vmul.f32 %v404_v23, %v404_v23  ;;  %665 = vst [vmem:[%s1683_s2 + $0x148] sm:$0xff] %v1382_v24 }
 0x10b   :  { %v704_v29 = vadd.f32 %v1020_v13, %v703_v26  ;;  %v839_v30 = vadd.f32 %v838_v25, %v776_v27 }
 0x10d   :  { %v840_v32 = vadd.f32 %v839_v30, %v777_v28  ;;  %v1024_v33 = vpop.f32.mrb[12].mxu0  ;;  %v705_v34 = vadd.f32 %v1021_v21, %v704_v29  ;;  %v1391_v35 = vpop.f32.mrb[12].mxu1 }
 0x10e   :  { %638 = vst [vmem:[%s1683_s2 + $0x70] sm:$0xff] %v1024_v33  ;;  %v417_v36 = vpop.f32.mrb[13].mxu0  ;;  %670 = vst [vmem:[%s1683_s2 + $0x170] sm:$0xff] %v1391_v35  ;;  %v1400_v37 = vpop.f32.mrb[13].mxu1  ;;  %v781_v52 = vmul.f32 %v1024_v33, %v1024_v33 }
 0x10f   :  { %636 = vst [vmem:[%s1683_s2 + $0x60] sm:$0xff] %v417_v36  ;;  %v706_v38 = vadd.f32 %v705_v34, %v417_v36  ;;  %v779_v39 = vmul.f32 %v417_v36, %v417_v36  ;;  %v841_v40 = vadd.f32 %v840_v32, %v778_v31  ;;  %v1025_v41 = vpop.f32.mrb[14].mxu0  ;;  %668 = vst [vmem:[%s1683_s2 + $0x160] sm:$0xff] %v1400_v37  ;;  %v1409_v43 = vpop.f32.mrb[14].mxu1 }
 0x110   :  { %639 = vst [vmem:[%s1683_s2 + $0x78] sm:$0xff] %v1025_v41  ;;  %v420_v45 = vpop.f32.mrb[15].mxu0  ;;  %671 = vst [vmem:[%s1683_s2 + $0x178] sm:$0xff] %v1409_v43  ;;  %v1418_v47 = vpop.f32.mrb[15].mxu1  ;;  %v782_v55 = vmul.f32 %v1025_v41, %v1025_v41 }
 0x111   :  { %v842_v49 = vadd.f32 %v841_v40, %v779_v39  ;;  %637 = vst [vmem:[%s1683_s2 + $0x68] sm:$0xff] %v420_v45  ;;  %v707_v50 = vadd.f32 %v706_v38, %v420_v45  ;;  %v780_v51 = vmul.f32 %v420_v45, %v420_v45  ;;  %669 = vst [vmem:[%s1683_s2 + $0x168] sm:$0xff] %v1418_v47 }
 0x113   :  { %v708_v53 = vadd.f32 %v1024_v33, %v707_v50  ;;  %v843_v54 = vadd.f32 %v842_v49, %v780_v51 }
 0x115   :  { %v844_v56 = vadd.f32 %v843_v54, %v781_v52  ;;  %v1028_v57 = vpop.f32.mrb[16].mxu0  ;;  %v709_v58 = vadd.f32 %v1025_v41, %v708_v53  ;;  %v1427_v60 = vpop.f32.mrb[16].mxu1 }
 0x116   :  { %642 = vst [vmem:[%s1683_s2 + $0x90] sm:$0xff] %v1028_v57  ;;  %v433_v62 = vpop.f32.mrb[17].mxu0  ;;  %674 = vst [vmem:[%s1683_s2 + $0x190] sm:$0xff] %v1427_v60  ;;  %v1436_v63 = vpop.f32.mrb[17].mxu1  ;;  %v785_v12 = vmul.f32 %v1028_v57, %v1028_v57 }
 0x117   :  { %640 = vst [vmem:[%s1683_s2 + $0x80] sm:$0xff] %v433_v62  ;;  %v710_v0 = vadd.f32 %v709_v58, %v433_v62  ;;  %v783_v1 = vmul.f32 %v433_v62, %v433_v62  ;;  %v845_v3 = vadd.f32 %v844_v56, %v782_v55  ;;  %v1029_v5 = vpop.f32.mrb[18].mxu0  ;;  %672 = vst [vmem:[%s1683_s2 + $0x180] sm:$0xff] %v1436_v63  ;;  %v1445_v6 = vpop.f32.mrb[18].mxu1 }
 0x118   :  { %643 = vst [vmem:[%s1683_s2 + $0x98] sm:$0xff] %v1029_v5  ;;  %v436_v7 = vpop.f32.mrb[19].mxu0  ;;  %675 = vst [vmem:[%s1683_s2 + $0x198] sm:$0xff] %v1445_v6  ;;  %v1454_v8 = vpop.f32.mrb[19].mxu1  ;;  %v786_v16 = vmul.f32 %v1029_v5, %v1029_v5 }
 0x119   :  { %v846_v9 = vadd.f32 %v845_v3, %v783_v1  ;;  %641 = vst [vmem:[%s1683_s2 + $0x88] sm:$0xff] %v436_v7  ;;  %v711_v10 = vadd.f32 %v710_v0, %v436_v7  ;;  %v784_v11 = vmul.f32 %v436_v7, %v436_v7  ;;  %673 = vst [vmem:[%s1683_s2 + $0x188] sm:$0xff] %v1454_v8 }
 0x11b   :  { %v712_v13 = vadd.f32 %v1028_v57, %v711_v10  ;;  %v847_v14 = vadd.f32 %v846_v9, %v784_v11 }
 0x11d   :  { %v848_v18 = vadd.f32 %v847_v14, %v785_v12  ;;  %v1032_v19 = vpop.f32.mrb[20].mxu0  ;;  %v713_v20 = vadd.f32 %v1029_v5, %v712_v13  ;;  %v1463_v21 = vpop.f32.mrb[20].mxu1 }
 0x11e   :  { %646 = vst [vmem:[%s1683_s2 + $0xb0] sm:$0xff] %v1032_v19  ;;  %v449_v23 = vpop.f32.mrb[21].mxu0  ;;  %678 = vst [vmem:[%s1683_s2 + $0x1b0] sm:$0xff] %v1463_v21  ;;  %v1472_v25 = vpop.f32.mrb[21].mxu1  ;;  %v789_v38 = vmul.f32 %v1032_v19, %v1032_v19 }
 0x11f   :  { %644 = vst [vmem:[%s1683_s2 + $0xa0] sm:$0xff] %v449_v23  ;;  %v714_v26 = vadd.f32 %v713_v20, %v449_v23  ;;  %v787_v27 = vmul.f32 %v449_v23, %v449_v23  ;;  %v849_v28 = vadd.f32 %v848_v18, %v786_v16  ;;  %v1033_v29 = vpop.f32.mrb[22].mxu0  ;;  %676 = vst [vmem:[%s1683_s2 + $0x1a0] sm:$0xff] %v1472_v25  ;;  %v1481_v30 = vpop.f32.mrb[22].mxu1 }
 0x120   :  { %647 = vst [vmem:[%s1683_s2 + $0xb8] sm:$0xff] %v1033_v29  ;;  %v452_v31 = vpop.f32.mrb[23].mxu0  ;;  %679 = vst [vmem:[%s1683_s2 + $0x1b8] sm:$0xff] %v1481_v30  ;;  %v1490_v32 = vpop.f32.mrb[23].mxu1  ;;  %v790_v41 = vmul.f32 %v1033_v29, %v1033_v29 }
 0x121   :  { %v850_v33 = vadd.f32 %v849_v28, %v787_v27  ;;  %645 = vst [vmem:[%s1683_s2 + $0xa8] sm:$0xff] %v452_v31  ;;  %v715_v34 = vadd.f32 %v714_v26, %v452_v31  ;;  %v788_v36 = vmul.f32 %v452_v31, %v452_v31  ;;  %677 = vst [vmem:[%s1683_s2 + $0x1a8] sm:$0xff] %v1490_v32 }
 0x123   :  { %v716_v39 = vadd.f32 %v1032_v19, %v715_v34  ;;  %v851_v40 = vadd.f32 %v850_v33, %v788_v36 }
 0x125   :  { %v852_v45 = vadd.f32 %v851_v40, %v789_v38  ;;  %v1036_v49 = vpop.f32.mrb[24].mxu0  ;;  %v717_v50 = vadd.f32 %v1033_v29, %v716_v39  ;;  %v1499_v51 = vpop.f32.mrb[24].mxu1 }
 0x126   :  { %650 = vst [vmem:[%s1683_s2 + $0xd0] sm:$0xff] %v1036_v49  ;;  %v465_v52 = vpop.f32.mrb[25].mxu0  ;;  %682 = vst [vmem:[%s1683_s2 + $0x1d0] sm:$0xff] %v1499_v51  ;;  %v1508_v53 = vpop.f32.mrb[25].mxu1  ;;  %v793_v7 = vmul.f32 %v1036_v49, %v1036_v49 }
 0x127   :  { %648 = vst [vmem:[%s1683_s2 + $0xc0] sm:$0xff] %v465_v52  ;;  %v718_v54 = vadd.f32 %v717_v50, %v465_v52  ;;  %v791_v55 = vmul.f32 %v465_v52, %v465_v52  ;;  %v853_v56 = vadd.f32 %v852_v45, %v790_v41  ;;  %v1037_v57 = vpop.f32.mrb[26].mxu0  ;;  %680 = vst [vmem:[%s1683_s2 + $0x1c0] sm:$0xff] %v1508_v53  ;;  %v1517_v58 = vpop.f32.mrb[26].mxu1 }
 0x128   :  { %651 = vst [vmem:[%s1683_s2 + $0xd8] sm:$0xff] %v1037_v57  ;;  %v468_v62 = vpop.f32.mrb[27].mxu0  ;;  %683 = vst [vmem:[%s1683_s2 + $0x1d8] sm:$0xff] %v1517_v58  ;;  %v1526_v0 = vpop.f32.mrb[27].mxu1  ;;  %v794_v11 = vmul.f32 %v1037_v57, %v1037_v57  ;;  %v799_v50 = vmul.f32 %v1292_v44, %v1292_v44 }
 0x129   :  { %v854_v1 = vadd.f32 %v853_v56, %v791_v55  ;;  %649 = vst [vmem:[%s1683_s2 + $0xc8] sm:$0xff] %v468_v62  ;;  %v719_v3 = vadd.f32 %v718_v54, %v468_v62  ;;  %v792_v5 = vmul.f32 %v468_v62, %v468_v62  ;;  %681 = vst [vmem:[%s1683_s2 + $0x1c8] sm:$0xff] %v1526_v0 }
 0x12a   :  { %v801_v62 = vmul.f32 %v1283_v42, %v1283_v42 }
 0x12b   :  { %v720_v9 = vadd.f32 %v1036_v49, %v719_v3  ;;  %v855_v10 = vadd.f32 %v854_v1, %v792_v5  ;;  %v802_v5 = vmul.f32 %v1301_v46, %v1301_v46 }
 0x12d   :  { %v856_v12 = vadd.f32 %v855_v10, %v793_v7  ;;  %v1040_v13 = vpop.f32.mrb[28].mxu0  ;;  %v721_v14 = vadd.f32 %v1037_v57, %v720_v9  ;;  %v1535_v16 = vpop.f32.mrb[28].mxu1  ;;  %v800_v57 = vmul.f32 %v1310_v48, %v1310_v48 }
 0x12e   :  { %654 = vst [vmem:[%s1683_s2 + $0xf0] sm:$0xff] %v1040_v13  ;;  %v481_v18 = vpop.f32.mrb[29].mxu0  ;;  %686 = vst [vmem:[%s1683_s2 + $0x1f0] sm:$0xff] %v1535_v16  ;;  %v1544_v19 = vpop.f32.mrb[29].mxu1  ;;  %v797_v38 = vmul.f32 %v1040_v13, %v1040_v13 }
 0x12f   :  { %652 = vst [vmem:[%s1683_s2 + $0xe0] sm:$0xff] %v481_v18  ;;  %v722_v20 = vadd.f32 %v721_v14, %v481_v18  ;;  %v795_v23 = vmul.f32 %v481_v18, %v481_v18  ;;  %v857_v26 = vadd.f32 %v856_v12, %v794_v11  ;;  %v1041_v27 = vpop.f32.mrb[30].mxu0  ;;  %684 = vst [vmem:[%s1683_s2 + $0x1e0] sm:$0xff] %v1544_v19  ;;  %v1553_v28 = vpop.f32.mrb[30].mxu1 }
 0x130   :  { %655 = vst [vmem:[%s1683_s2 + $0xf8] sm:$0xff] %v1041_v27  ;;  %v484_v29 = vpop.f32.mrb[31].mxu0  ;;  %687 = vst [vmem:[%s1683_s2 + $0x1f8] sm:$0xff] %v1553_v28  ;;  %v1562_v31 = vpop.f32.mrb[31].mxu1  ;;  %v798_v41 = vmul.f32 %v1041_v27, %v1041_v27 }
 0x131   :  { %v858_v33 = vadd.f32 %v857_v26, %v795_v23  ;;  %653 = vst [vmem:[%s1683_s2 + $0xe8] sm:$0xff] %v484_v29  ;;  %v723_v34 = vadd.f32 %v722_v20, %v484_v29  ;;  %v796_v36 = vmul.f32 %v484_v29, %v484_v29  ;;  %685 = vst [vmem:[%s1683_s2 + $0x1e8] sm:$0xff] %v1562_v31 }
 0x133   :  { %v724_v39 = vadd.f32 %v1040_v13, %v723_v34  ;;  %v859_v40 = vadd.f32 %v858_v33, %v796_v36  ;;  %v804_v13 = vmul.f32 %v1346_v4, %v1346_v4  ;;  %v808_v33 = vmul.f32 %v1382_v24, %v1382_v24 }
 0x135   :  { %v860_v45 = vadd.f32 %v859_v40, %v797_v38  ;;  %v725_v49 = vadd.f32 %v1041_v27, %v724_v39 }
 0x137   :  { %v726_v52 = vadd.f32 %v725_v49, %v1292_v44  ;;  %v861_v54 = vadd.f32 %v860_v45, %v798_v41  ;;  %v803_v44 = vmul.f32 %v1328_v61, %v1328_v61  ;;  %v812_v49 = vmul.f32 %v1418_v47, %v1418_v47 }
 0x139   :  { %v862_v55 = vadd.f32 %v861_v54, %v799_v50  ;;  %v727_v56 = vadd.f32 %v726_v52, %v1310_v48 }
 0x13b   :  { %v728_v1 = vadd.f32 %v1283_v42, %v727_v56  ;;  %v863_v3 = vadd.f32 %v862_v55, %v800_v57  ;;  %v805_v42 = vmul.f32 %v1319_v59, %v1319_v59 }
 0x13d   :  { %v864_v7 = vadd.f32 %v863_v3, %v801_v62  ;;  %v729_v9 = vadd.f32 %v1301_v46, %v728_v1  ;;  %v806_v46 = vmul.f32 %v1337_v2, %v1337_v2  ;;  %v816_v1 = vmul.f32 %v1454_v8, %v1454_v8 }
 0x13f   :  { %v730_v10 = vadd.f32 %v729_v9, %v1328_v61  ;;  %v865_v11 = vadd.f32 %v864_v7, %v802_v5  ;;  %v807_v61 = vmul.f32 %v1364_v17, %v1364_v17 }
 0x141   :  { %v866_v12 = vadd.f32 %v865_v11, %v803_v44  ;;  %v731_v48 = vadd.f32 %v730_v10, %v1346_v4 }
 0x143   :  { %v732_v14 = vadd.f32 %v1319_v59, %v731_v48  ;;  %v867_v18 = vadd.f32 %v866_v12, %v804_v13  ;;  %v809_v59 = vmul.f32 %v1355_v15, %v1355_v15  ;;  %v820_v12 = vmul.f32 %v1490_v32, %v1490_v32 }
 0x145   :  { %v868_v20 = vadd.f32 %v867_v18, %v805_v42  ;;  %v733_v23 = vadd.f32 %v1337_v2, %v732_v14  ;;  %v810_v2 = vmul.f32 %v1373_v22, %v1373_v22 }
 0x147   :  { %v734_v26 = vadd.f32 %v733_v23, %v1364_v17  ;;  %v869_v27 = vadd.f32 %v868_v20, %v806_v46  ;;  %v811_v17 = vmul.f32 %v1400_v37, %v1400_v37  ;;  %v824_v23 = vmul.f32 %v1526_v0, %v1526_v0 }
 0x149   :  { %v870_v29 = vadd.f32 %v869_v27, %v807_v61  ;;  %v735_v4 = vadd.f32 %v734_v26, %v1382_v24 }
 0x14b   :  { %v736_v34 = vadd.f32 %v1355_v15, %v735_v4  ;;  %v871_v36 = vadd.f32 %v870_v29, %v808_v33  ;;  %v813_v15 = vmul.f32 %v1391_v35, %v1391_v35 }
 0x14d   :  { %v872_v38 = vadd.f32 %v871_v36, %v809_v59  ;;  %v737_v39 = vadd.f32 %v1373_v22, %v736_v34  ;;  %v814_v22 = vmul.f32 %v1409_v43, %v1409_v43  ;;  %v828_v34 = vmul.f32 %v1562_v31, %v1562_v31 }
 0x14f   :  { %v738_v40 = vadd.f32 %v737_v39, %v1400_v37  ;;  %v873_v41 = vadd.f32 %v872_v38, %v810_v2  ;;  %v815_v37 = vmul.f32 %v1436_v63, %v1436_v63 }
 0x151   :  { %v874_v45 = vadd.f32 %v873_v41, %v811_v17  ;;  %v739_v24 = vadd.f32 %v738_v40, %v1418_v47 }
 0x153   :  { %v740_v50 = vadd.f32 %v1391_v35, %v739_v24  ;;  %v875_v52 = vadd.f32 %v874_v45, %v812_v49  ;;  %v817_v35 = vmul.f32 %v1427_v60, %v1427_v60 }
 0x155   :  { %v876_v54 = vadd.f32 %v875_v52, %v813_v15  ;;  %v741_v55 = vadd.f32 %v1409_v43, %v740_v50  ;;  %v818_v43 = vmul.f32 %v1445_v6, %v1445_v6 }
 0x157   :  { %v742_v56 = vadd.f32 %v741_v55, %v1436_v63  ;;  %v877_v57 = vadd.f32 %v876_v54, %v814_v22  ;;  %v819_v63 = vmul.f32 %v1472_v25, %v1472_v25 }
 0x159   :  { %v878_v62 = vadd.f32 %v877_v57, %v815_v37  ;;  %v743_v47 = vadd.f32 %v742_v56, %v1454_v8 }
 0x15b   :  { %v744_v3 = vadd.f32 %v1427_v60, %v743_v47  ;;  %v879_v5 = vadd.f32 %v878_v62, %v816_v1  ;;  %v821_v60 = vmul.f32 %v1463_v21, %v1463_v21 }
 0x15d   :  { %v880_v7 = vadd.f32 %v879_v5, %v817_v35  ;;  %v745_v9 = vadd.f32 %v1445_v6, %v744_v3  ;;  %v822_v6 = vmul.f32 %v1481_v30, %v1481_v30 }
 0x15f   :  { %v746_v44 = vadd.f32 %v745_v9, %v1472_v25  ;;  %v881_v10 = vadd.f32 %v880_v7, %v818_v43  ;;  %v823_v25 = vmul.f32 %v1508_v53, %v1508_v53 }
 0x161   :  { %v882_v11 = vadd.f32 %v881_v10, %v819_v63  ;;  %v747_v8 = vadd.f32 %v746_v44, %v1490_v32 }
 0x163   :  { %v748_v48 = vadd.f32 %v1463_v21, %v747_v8  ;;  %v883_v13 = vadd.f32 %v882_v11, %v820_v12  ;;  %v825_v21 = vmul.f32 %v1499_v51, %v1499_v51 }
 0x165   :  { %v884_v42 = vadd.f32 %v883_v13, %v821_v60  ;;  %v749_v14 = vadd.f32 %v1481_v30, %v748_v48  ;;  %v826_v30 = vmul.f32 %v1517_v58, %v1517_v58 }
 0x167   :  { %v750_v18 = vadd.f32 %v749_v14, %v1508_v53  ;;  %v885_v46 = vadd.f32 %v884_v42, %v822_v6  ;;  %v827_v53 = vmul.f32 %v1544_v19, %v1544_v19 }
 0x169   :  { %v886_v20 = vadd.f32 %v885_v46, %v823_v25  ;;  %v751_v32 = vadd.f32 %v750_v18, %v1526_v0 }
 0x16b   :  { %v752_v61 = vadd.f32 %v1499_v51, %v751_v32  ;;  %v887_v26 = vadd.f32 %v886_v20, %v824_v23  ;;  %v829_v51 = vmul.f32 %v1535_v16, %v1535_v16 }
 0x16d   :  { %v888_v27 = vadd.f32 %v887_v26, %v825_v21  ;;  %v753_v29 = vadd.f32 %v1517_v58, %v752_v61  ;;  %v830_v58 = vmul.f32 %v1553_v28, %v1553_v28 }
 0x16f   :  { %v754_v4 = vadd.f32 %v753_v29, %v1544_v19  ;;  %v889_v33 = vadd.f32 %v888_v27, %v826_v30 }
 0x171   :  { %v890_v59 = vadd.f32 %v889_v33, %v827_v53  ;;  %v755_v0 = vadd.f32 %v754_v4, %v1562_v31 }
 0x173   :  { %v756_v36 = vadd.f32 %v1535_v16, %v755_v0  ;;  %v891_v2 = vadd.f32 %v890_v59, %v828_v34  ;;  %v694_v16 = vld [vmem:[%s1681_s3] sm:$0x1] }
 0x175   :  { %v757_v38 = vadd.f32 %v1553_v28, %v756_v36  ;;  %v892_v39 = vadd.f32 %v891_v2, %v829_v51  ;;  %v766_v28 = vld [vmem:[%s1682_s4] sm:$0x1] }
 0x177   :  { %v758_v19 = vrot.slane %v757_v38, 4  ;;  %v893_v17 = vadd.f32 %v892_v39, %v830_v58 }
 0x179   :  { %v759_v40 = vadd.f32 %v758_v19, %v757_v38  ;;  %v894_v41 = vrot.slane %v893_v17, 4 }
 0x17b   :  { %v760_v45 = vrot.slane %v759_v40, 2  ;;  %v895_v24 = vadd.f32 %v894_v41, %v893_v17 }
 0x17d   :  { %v761_v49 = vadd.f32 %v760_v45, %v759_v40  ;;  %v896_v31 = vrot.slane %v895_v24, 2 }
 0x17f   :  { %v762_v15 = vrot.slane %v761_v49, 1  ;;  %v897_v50 = vadd.f32 %v896_v31, %v895_v24 }
 0x181   :  { %v763_v52 = vadd.f32 %v762_v15, %v761_v49  ;;  %v898_v22 = vrot.slane %v897_v50, 1 }
 0x183   :  { %v764_v54 = vadd.f32 %v763_v52, %v694_v16  ;;  %v899_v55 = vadd.f32 %v898_v22, %v897_v50 }
 0x185   :  { %765 = vst [vmem:[%s1681_s3] sm:$0x1] %v764_v54  ;;  %v900_v37 = vadd.f32 %v899_v55, %v766_v28 }
 0x187   :  { %901 = vst [vmem:[%s1682_s4] sm:$0x1] %v900_v37 }

// kernel: discriminator_forward.10
= control target key start
LH: loop header
LB: loop body
LE: loop exit
PB: predicated region body
PF: predicated region fallthrough
CT: control target
= control target key end

     0   :  { %s1030_s0 = inlined_call_operand.vmem [shape: f32[512,128], index: 0, kind: input, shape index: {}]   ;;  %s1031_s1 = inlined_call_operand.vmem [shape: f32[1,128], index: 1, kind: input, shape index: {}]   ;;  %s1032_s2 = inlined_call_operand.vmem [shape: f32[1,128], index: 2, kind: input, shape index: {}]   ;;  %s1033_s3 = inlined_call_operand.vmem [shape: f32[512,128], index: 3, kind: output, shape index: {}]  }
   0x1   :  { %v14_v0 = vld [vmem:[%s1030_s0] sm:$0xff]  ;;  %v15_v4 = vld [vmem:[%s1030_s0 + $0x8] sm:$0xff]  ;;  %v16_v5 = vld [vmem:[%s1030_s0 + $0x10] sm:$0xff] }
   0x2   :  { %v508_v1 = vld [vmem:[%s1031_s1] ss:$0 sm:$0xff]  ;;  %v17_v6 = vld [vmem:[%s1030_s0 + $0x18] sm:$0xff]  ;;  %v19_v11 = vld [vmem:[%s1030_s0 + $0x28] sm:$0xff] }
   0x3   :  { %v513_v2 = vld [vmem:[%s1032_s2] ss:$0 sm:$0xff]  ;;  %v85_v3 = vmul.f32 %v508_v1, %v14_v0  ;;  %v86_v7 = vmul.f32 %v508_v1, %v15_v4  ;;  %v87_v8 = vmul.f32 %v508_v1, %v16_v5  ;;  %v88_v9 = vmul.f32 %v508_v1, %v17_v6  ;;  %v20_v12 = vld [vmem:[%s1030_s0 + $0x30] sm:$0xff]  ;;  %v21_v17 = vld [vmem:[%s1030_s0 + $0x38] sm:$0xff] }
   0x4   :  { %v18_v10 = vld [vmem:[%s1030_s0 + $0x20] sm:$0xff]  ;;  %v90_v15 = vmul.f32 %v508_v1, %v19_v11  ;;  %v91_v16 = vmul.f32 %v508_v1, %v20_v12  ;;  %v92_v21 = vmul.f32 %v508_v1, %v21_v17  ;;  %v23_v30 = vld [vmem:[%s1030_s0 + $0x48] sm:$0xff]  ;;  %v24_v31 = vld [vmem:[%s1030_s0 + $0x50] sm:$0xff] }
   0x5   :  { %v156_v13 = vadd.f32 %v513_v2, %v85_v3  ;;  %v89_v14 = vmul.f32 %v508_v1, %v18_v10  ;;  %v157_v18 = vadd.f32 %v513_v2, %v86_v7  ;;  %v158_v19 = vadd.f32 %v513_v2, %v87_v8  ;;  %v22_v25 = vld [vmem:[%s1030_s0 + $0x40] sm:$0xff]  ;;  %v25_v43 = vld [vmem:[%s1030_s0 + $0x58] sm:$0xff]  ;;  %v27_v45 = vld [vmem:[%s1030_s0 + $0x68] sm:$0xff] }
   0x6   :  { %v159_v20 = vadd.f32 %v513_v2, %v88_v9  ;;  %v161_v24 = vadd.f32 %v513_v2, %v90_v15  ;;  %v162_v37 = vadd.f32 %v513_v2, %v91_v16  ;;  %v163_v38 = vadd.f32 %v513_v2, %v92_v21  ;;  %v26_v44 = vld [vmem:[%s1030_s0 + $0x60] sm:$0xff]  ;;  %v28_v56 = vld [vmem:[%s1030_s0 + $0x70] sm:$0xff]  ;;  %v29_v4 = vld [vmem:[%s1030_s0 + $0x78] sm:$0xff] }
   0x7   :  { %vm220_vm0 = vcmp.gt.f32.partialorder %v156_v13, 0.0  ;;  %v284_v22 = vmul.f32 0.2, %v156_v13  ;;  %v160_v23 = vadd.f32 %v513_v2, %v89_v14  ;;  %vm221_vm1 = vcmp.gt.f32.partialorder %v157_v18, 0.0  ;;  %v30_v5 = vld [vmem:[%s1030_s0 + $0x80] sm:$0xff]  ;;  %v31_v9 = vld [vmem:[%s1030_s0 + $0x88] sm:$0xff] }
   0x8   :  { %v285_v26 = vmul.f32 0.2, %v157_v18  ;;  %vm222_vm2 = vcmp.gt.f32.partialorder %v158_v19, 0.0  ;;  %v286_v27 = vmul.f32 0.2, %v158_v19  ;;  %vm223_vm3 = vcmp.gt.f32.partialorder %v159_v20, 0.0 }
   0x9   :  { %v348_v28 = vsel %vm220_vm0, %v156_v13, %v284_v22  ;;  %v287_v29 = vmul.f32 0.2, %v159_v20  ;;  %vm224_vm4 = vcmp.gt.f32.partialorder %v160_v23, 0.0  ;;  %v288_v34 = vmul.f32 0.2, %v160_v23  ;;  %v32_v10 = vld [vmem:[%s1030_s0 + $0x90] sm:$0xff] }
   0xa   :  { %412 = vst [vmem:[%s1033_s3] sm:$0xff] %v348_v28  ;;  %v349_v32 = vsel %vm221_vm1, %v157_v18, %v285_v26  ;;  %v350_v33 = vsel %vm222_vm2, %v158_v19, %v286_v27  ;;  %vm225_vm5 = vcmp.gt.f32.partialorder %v161_v24, 0.0  ;;  %v289_v36 = vmul.f32 0.2, %v161_v24  ;;  %v33_v17 = vld [vmem:[%s1030_s0 + $0x98] sm:$0xff]  ;;  %v34_v18 = vld [vmem:[%s1030_s0 + $0xa0] sm:$0xff] }
   0xb   :  { %413 = vst [vmem:[%s1033_s3 + $0x8] sm:$0xff] %v349_v32  ;;  %414 = vst [vmem:[%s1033_s3 + $0x10] sm:$0xff] %v350_v33  ;;  %v351_v35 = vsel %vm223_vm3, %v159_v20, %v287_v29  ;;  %v352_v39 = vsel %vm224_vm4, %v160_v23, %v288_v34  ;;  %v93_v40 = vmul.f32 %v508_v1, %v22_v25  ;;  %vm226_vm6 = vcmp.gt.f32.partialorder %v162_v37, 0.0  ;;  %v35_v32 = vld [vmem:[%s1030_s0 + $0xa8] sm:$0xff]  ;;  %v36_v33 = vld [vmem:[%s1030_s0 + $0xb0] sm:$0xff] }
   0xc   :  { %415 = vst [vmem:[%s1033_s3 + $0x18] sm:$0xff] %v351_v35  ;;  %v94_v41 = vmul.f32 %v508_v1, %v23_v30  ;;  %v95_v42 = vmul.f32 %v508_v1, %v24_v31  ;;  %416 = vst [vmem:[%s1033_s3 + $0x20] sm:$0xff] %v352_v39  ;;  %v353_v46 = vsel %vm225_vm5, %v161_v24, %v289_v36  ;;  %v290_v47 = vmul.f32 0.2, %v162_v37 }
   0xd   :  { %vm227_vm7 = vcmp.gt.f32.partialorder %v163_v38, 0.0  ;;  %417 = vst [vmem:[%s1033_s3 + $0x28] sm:$0xff] %v353_v46  ;;  %v291_v48 = vmul.f32 0.2, %v163_v38  ;;  %v164_v49 = vadd.f32 %v513_v2, %v93_v40  ;;  %v96_v53 = vmul.f32 %v508_v1, %v25_v43  ;;  %v37_v40 = vld [vmem:[%s1030_s0 + $0xb8] sm:$0xff]  ;;  %v39_v46 = vld [vmem:[%s1030_s0 + $0xc8] sm:$0xff] }
   0xe   :  { %v165_v50 = vadd.f32 %v513_v2, %v94_v41  ;;  %v166_v51 = vadd.f32 %v513_v2, %v95_v42  ;;  %v354_v52 = vsel %vm226_vm6, %v162_v37, %v290_v47  ;;  %v97_v54 = vmul.f32 %v508_v1, %v26_v44  ;;  %v40_v47 = vld [vmem:[%s1030_s0 + $0xd0] sm:$0xff] }
   0xf   :  { %v98_v55 = vmul.f32 %v508_v1, %v27_v45  ;;  %418 = vst [vmem:[%s1033_s3 + $0x30] sm:$0xff] %v354_v52  ;;  %v355_v57 = vsel %vm227_vm7, %v163_v38, %v291_v48  ;;  %vm228_vm8 = vcmp.gt.f32.partialorder %v164_v49, 0.0  ;;  %v292_v58 = vmul.f32 0.2, %v164_v49  ;;  %v38_v45 = vld [vmem:[%s1030_s0 + $0xc0] sm:$0xff] }
  0x10   :  { %vm229_vm9 = vcmp.gt.f32.partialorder %v165_v50, 0.0  ;;  %419 = vst [vmem:[%s1033_s3 + $0x38] sm:$0xff] %v355_v57  ;;  %v293_v59 = vmul.f32 0.2, %v165_v50  ;;  %vm230_vm10 = vcmp.gt.f32.partialorder %v166_v51, 0.0  ;;  %v167_v61 = vadd.f32 %v513_v2, %v96_v53 }
  0x11   :  { %v294_v60 = vmul.f32 0.2, %v166_v51  ;;  %v356_v62 = vsel %vm228_vm8, %v164_v49, %v292_v58  ;;  %v168_v63 = vadd.f32 %v513_v2, %v97_v54  ;;  %v169_v0 = vadd.f32 %v513_v2, %v98_v55  ;;  %v41_v58 = vld [vmem:[%s1030_s0 + $0xd8] sm:$0xff] }
  0x12   :  { %v99_v3 = vmul.f32 %v508_v1, %v28_v56  ;;  %420 = vst [vmem:[%s1033_s3 + $0x40] sm:$0xff] %v356_v62  ;;  %v357_v6 = vsel %vm229_vm9, %v165_v50, %v293_v59  ;;  %vm231_vm11 = vcmp.gt.f32.partialorder %v167_v61, 0.0  ;;  %v295_v8 = vmul.f32 0.2, %v167_v61  ;;  %v42_v59 = vld [vmem:[%s1030_s0 + $0xe0] sm:$0xff] }
  0x13   :  { %v358_v7 = vsel %vm230_vm10, %v166_v51, %v294_v60  ;;  %421 = vst [vmem:[%s1033_s3 + $0x48] sm:$0xff] %v357_v6  ;;  %vm232_vm12 = vcmp.gt.f32.partialorder %v168_v63, 0.0  ;;  %v296_v11 = vmul.f32 0.2, %v168_v63  ;;  %vm233_vm13 = vcmp.gt.f32.partialorder %v169_v0, 0.0 }
  0x14   :  { %422 = vst [vmem:[%s1033_s3 + $0x50] sm:$0xff] %v358_v7  ;;  %v297_v12 = vmul.f32 0.2, %v169_v0  ;;  %v359_v13 = vsel %vm231_vm11, %v167_v61, %v295_v8  ;;  %v170_v14 = vadd.f32 %v513_v2, %v99_v3  ;;  %v100_v15 = vmul.f32 %v508_v1, %v29_v4 }
  0x15   :  { %v101_v16 = vmul.f32 %v508_v1, %v30_v5  ;;  %423 = vst [vmem:[%s1033_s3 + $0x58] sm:$0xff] %v359_v13  ;;  %v360_v19 = vsel %vm232_vm12, %v168_v63, %v296_v11  ;;  %v102_v21 = vmul.f32 %v508_v1, %v31_v9  ;;  %v103_v22 = vmul.f32 %v508_v1, %v32_v10  ;;  %v43_v10 = vld [vmem:[%s1030_s0 + $0xe8] sm:$0xff]  ;;  %v44_v11 = vld [vmem:[%s1030_s0 + $0xf0] sm:$0xff] }
  0x16   :  { %v361_v20 = vsel %vm233_vm13, %v169_v0, %v297_v12  ;;  %424 = vst [vmem:[%s1033_s3 + $0x60] sm:$0xff] %v360_v19  ;;  %vm234_vm14 = vcmp.gt.f32.partialorder %v170_v14, 0.0  ;;  %v298_v23 = vmul.f32 0.2, %v170_v14  ;;  %v171_v24 = vadd.f32 %v513_v2, %v100_v15 }
  0x17   :  { %425 = vst [vmem:[%s1033_s3 + $0x68] sm:$0xff] %v361_v20  ;;  %v172_v25 = vadd.f32 %v513_v2, %v101_v16  ;;  %v173_v26 = vadd.f32 %v513_v2, %v102_v21  ;;  %v174_v27 = vadd.f32 %v513_v2, %v103_v22  ;;  %v104_v28 = vmul.f32 %v508_v1, %v33_v17 }
  0x18   :  { %v105_v29 = vmul.f32 %v508_v1, %v34_v18  ;;  %v362_v30 = vsel %vm234_vm14, %v170_v14, %v298_v23  ;;  %vm235_vm15 = vcmp.gt.f32.partialorder %v171_v24, 0.0  ;;  %v299_v31 = vmul.f32 0.2, %v171_v24  ;;  %v45_v18 = vld [vmem:[%s1030_s0 + $0xf8] sm:$0xff]  ;;  %v46_v23 = vld [vmem:[%s1030_s0 + $0x100] sm:$0xff] }
  0x19   :  { %vm236_vm0 = vcmp.gt.f32.partialorder %v172_v25, 0.0  ;;  %426 = vst [vmem:[%s1033_s3 + $0x70] sm:$0xff] %v362_v30  ;;  %v300_v34 = vmul.f32 0.2, %v172_v25  ;;  %vm237_vm1 = vcmp.gt.f32.partialorder %v173_v26, 0.0  ;;  %vm238_vm2 = vcmp.gt.f32.partialorder %v174_v27, 0.0 }
  0x1a   :  { %v301_v35 = vmul.f32 0.2, %v173_v26  ;;  %v363_v36 = vsel %vm235_vm15, %v171_v24, %v299_v31  ;;  %v302_v37 = vmul.f32 0.2, %v174_v27  ;;  %v175_v38 = vadd.f32 %v513_v2, %v104_v28  ;;  %v47_v24 = vld [vmem:[%s1030_s0 + $0x108] sm:$0xff] }
  0x1b   :  { %v176_v39 = vadd.f32 %v513_v2, %v105_v29  ;;  %427 = vst [vmem:[%s1033_s3 + $0x78] sm:$0xff] %v363_v36  ;;  %v364_v41 = vsel %vm236_vm0, %v172_v25, %v300_v34  ;;  %v106_v43 = vmul.f32 %v508_v1, %v35_v32  ;;  %v107_v44 = vmul.f32 %v508_v1, %v36_v33  ;;  %v48_v25 = vld [vmem:[%s1030_s0 + $0x110] sm:$0xff]  ;;  %v49_v36 = vld [vmem:[%s1030_s0 + $0x118] sm:$0xff] }
  0x1c   :  { %v365_v42 = vsel %vm237_vm1, %v173_v26, %v301_v35  ;;  %428 = vst [vmem:[%s1033_s3 + $0x80] sm:$0xff] %v364_v41  ;;  %v366_v48 = vsel %vm238_vm2, %v174_v27, %v302_v37  ;;  %vm239_vm3 = vcmp.gt.f32.partialorder %v175_v38, 0.0  ;;  %v303_v49 = vmul.f32 0.2, %v175_v38  ;;  %v50_v37 = vld [vmem:[%s1030_s0 + $0x120] sm:$0xff] }
  0x1d   :  { %429 = vst [vmem:[%s1033_s3 + $0x88] sm:$0xff] %v365_v42  ;;  %vm240_vm4 = vcmp.gt.f32.partialorder %v176_v39, 0.0  ;;  %430 = vst [vmem:[%s1033_s3 + $0x90] sm:$0xff] %v366_v48  ;;  %v304_v50 = vmul.f32 0.2, %v176_v39  ;;  %v177_v51 = vadd.f32 %v513_v2, %v106_v43  ;;  %v178_v52 = vadd.f32 %v513_v2, %v107_v44 }
  0x1e   :  { %v108_v53 = vmul.f32 %v508_v1, %v37_v40  ;;  %v367_v54 = vsel %vm239_vm3, %v175_v38, %v303_v49  ;;  %v109_v55 = vmul.f32 %v508_v1, %v38_v45  ;;  %v110_v56 = vmul.f32 %v508_v1, %v39_v46 }
  0x1f   :  { %v111_v57 = vmul.f32 %v508_v1, %v40_v47  ;;  %431 = vst [vmem:[%s1033_s3 + $0x98] sm:$0xff] %v367_v54  ;;  %v368_v60 = vsel %vm240_vm4, %v176_v39, %v304_v50  ;;  %vm241_vm5 = vcmp.gt.f32.partialorder %v177_v51, 0.0  ;;  %v305_v61 = vmul.f32 0.2, %v177_v51  ;;  %v51_v50 = vld [vmem:[%s1030_s0 + $0x128] sm:$0xff] }
  0x20   :  { %vm242_vm6 = vcmp.gt.f32.partialorder %v178_v52, 0.0  ;;  %432 = vst [vmem:[%s1033_s3 + $0xa0] sm:$0xff] %v368_v60  ;;  %v306_v62 = vmul.f32 0.2, %v178_v52  ;;  %v179_v63 = vadd.f32 %v513_v2, %v108_v53  ;;  %v180_v0 = vadd.f32 %v513_v2, %v109_v55 }
  0x21   :  { %v181_v3 = vadd.f32 %v513_v2, %v110_v56  ;;  %v369_v4 = vsel %vm241_vm5, %v177_v51, %v305_v61  ;;  %v182_v5 = vadd.f32 %v513_v2, %v111_v57  ;;  %v112_v6 = vmul.f32 %v508_v1, %v41_v58  ;;  %v52_v51 = vld [vmem:[%s1030_s0 + $0x130] sm:$0xff]  ;;  %v53_v58 = vld [vmem:[%s1030_s0 + $0x138] sm:$0xff] }
  0x22   :  { %v113_v7 = vmul.f32 %v508_v1, %v42_v59  ;;  %433 = vst [vmem:[%s1033_s3 + $0xa8] sm:$0xff] %v369_v4  ;;  %v370_v8 = vsel %vm242_vm6, %v178_v52, %v306_v62  ;;  %vm243_vm7 = vcmp.gt.f32.partialorder %v179_v63, 0.0  ;;  %v307_v9 = vmul.f32 0.2, %v179_v63 }
  0x23   :  { %vm244_vm8 = vcmp.gt.f32.partialorder %v180_v0, 0.0  ;;  %434 = vst [vmem:[%s1033_s3 + $0xb0] sm:$0xff] %v370_v8  ;;  %v308_v12 = vmul.f32 0.2, %v180_v0  ;;  %vm245_vm9 = vcmp.gt.f32.partialorder %v181_v3, 0.0  ;;  %vm246_vm10 = vcmp.gt.f32.partialorder %v182_v5, 0.0 }
  0x24   :  { %v309_v13 = vmul.f32 0.2, %v181_v3  ;;  %v371_v14 = vsel %vm243_vm7, %v179_v63, %v307_v9  ;;  %v310_v15 = vmul.f32 0.2, %v182_v5  ;;  %v183_v16 = vadd.f32 %v513_v2, %v112_v6  ;;  %v54_v63 = vld [vmem:[%s1030_s0 + $0x140] sm:$0xff] }
  0x25   :  { %v184_v17 = vadd.f32 %v513_v2, %v113_v7  ;;  %435 = vst [vmem:[%s1033_s3 + $0xb8] sm:$0xff] %v371_v14  ;;  %v372_v19 = vsel %vm244_vm8, %v180_v0, %v308_v12  ;;  %v114_v21 = vmul.f32 %v508_v1, %v43_v10  ;;  %v115_v22 = vmul.f32 %v508_v1, %v44_v11  ;;  %v55_v0 = vld [vmem:[%s1030_s0 + $0x148] sm:$0xff]  ;;  %v57_v14 = vld [vmem:[%s1030_s0 + $0x158] sm:$0xff] }
  0x26   :  { %v373_v20 = vsel %vm245_vm9, %v181_v3, %v309_v13  ;;  %436 = vst [vmem:[%s1033_s3 + $0xc0] sm:$0xff] %v372_v19  ;;  %v374_v26 = vsel %vm246_vm10, %v182_v5, %v310_v15  ;;  %vm247_vm11 = vcmp.gt.f32.partialorder %v183_v16, 0.0  ;;  %v311_v27 = vmul.f32 0.2, %v183_v16  ;;  %v56_v3 = vld [vmem:[%s1030_s0 + $0x150] sm:$0xff]  ;;  %v58_v15 = vld [vmem:[%s1030_s0 + $0x160] sm:$0xff] }
  0x27   :  { %437 = vst [vmem:[%s1033_s3 + $0xc8] sm:$0xff] %v373_v20  ;;  %vm248_vm12 = vcmp.gt.f32.partialorder %v184_v17, 0.0  ;;  %438 = vst [vmem:[%s1033_s3 + $0xd0] sm:$0xff] %v374_v26  ;;  %v312_v28 = vmul.f32 0.2, %v184_v17  ;;  %v185_v29 = vadd.f32 %v513_v2, %v114_v21  ;;  %v186_v30 = vadd.f32 %v513_v2, %v115_v22 }
  0x28   :  { %v116_v31 = vmul.f32 %v508_v1, %v45_v18  ;;  %v375_v32 = vsel %vm247_vm11, %v183_v16, %v311_v27  ;;  %v117_v33 = vmul.f32 %v508_v1, %v46_v23  ;;  %v118_v34 = vmul.f32 %v508_v1, %v47_v24 }
  0x29   :  { %v119_v35 = vmul.f32 %v508_v1, %v48_v25  ;;  %439 = vst [vmem:[%s1033_s3 + $0xd8] sm:$0xff] %v375_v32  ;;  %v376_v38 = vsel %vm248_vm12, %v184_v17, %v312_v28  ;;  %vm249_vm13 = vcmp.gt.f32.partialorder %v185_v29, 0.0  ;;  %v313_v39 = vmul.f32 0.2, %v185_v29  ;;  %v59_v28 = vld [vmem:[%s1030_s0 + $0x168] sm:$0xff] }
  0x2a   :  { %vm250_vm14 = vcmp.gt.f32.partialorder %v186_v30, 0.0  ;;  %440 = vst [vmem:[%s1033_s3 + $0xe0] sm:$0xff] %v376_v38  ;;  %v314_v40 = vmul.f32 0.2, %v186_v30  ;;  %v187_v41 = vadd.f32 %v513_v2, %v116_v31  ;;  %v188_v42 = vadd.f32 %v513_v2, %v117_v33 }
  0x2b   :  { %v189_v43 = vadd.f32 %v513_v2, %v118_v34  ;;  %v377_v44 = vsel %vm249_vm13, %v185_v29, %v313_v39  ;;  %v190_v45 = vadd.f32 %v513_v2, %v119_v35  ;;  %v120_v46 = vmul.f32 %v508_v1, %v49_v36  ;;  %v60_v29 = vld [vmem:[%s1030_s0 + $0x170] sm:$0xff]  ;;  %v61_v36 = vld [vmem:[%s1030_s0 + $0x178] sm:$0xff] }
  0x2c   :  { %v121_v47 = vmul.f32 %v508_v1, %v50_v37  ;;  %441 = vst [vmem:[%s1033_s3 + $0xe8] sm:$0xff] %v377_v44  ;;  %v378_v48 = vsel %vm250_vm14, %v186_v30, %v314_v40  ;;  %vm251_vm15 = vcmp.gt.f32.partialorder %v187_v41, 0.0  ;;  %v315_v49 = vmul.f32 0.2, %v187_v41 }
  0x2d   :  { %vm252_vm0 = vcmp.gt.f32.partialorder %v188_v42, 0.0  ;;  %442 = vst [vmem:[%s1033_s3 + $0xf0] sm:$0xff] %v378_v48  ;;  %v316_v52 = vmul.f32 0.2, %v188_v42  ;;  %vm253_vm1 = vcmp.gt.f32.partialorder %v189_v43, 0.0  ;;  %vm254_vm2 = vcmp.gt.f32.partialorder %v190_v45, 0.0 }
  0x2e   :  { %v317_v53 = vmul.f32 0.2, %v189_v43  ;;  %v379_v54 = vsel %vm251_vm15, %v187_v41, %v315_v49  ;;  %v318_v55 = vmul.f32 0.2, %v190_v45  ;;  %v191_v56 = vadd.f32 %v513_v2, %v120_v46  ;;  %v62_v41 = vld [vmem:[%s1030_s0 + $0x180] sm:$0xff] }
  0x2f   :  { %v192_v57 = vadd.f32 %v513_v2, %v121_v47  ;;  %443 = vst [vmem:[%s1033_s3 + $0xf8] sm:$0xff] %v379_v54  ;;  %v380_v59 = vsel %vm252_vm0, %v188_v42, %v316_v52  ;;  %v122_v61 = vmul.f32 %v508_v1, %v51_v50  ;;  %v123_v62 = vmul.f32 %v508_v1, %v52_v51  ;;  %v63_v42 = vld [vmem:[%s1030_s0 + $0x188] sm:$0xff]  ;;  %v65_v54 = vld [vmem:[%s1030_s0 + $0x198] sm:$0xff] }
  0x30   :  { %v381_v60 = vsel %vm253_vm1, %v189_v43, %v317_v53  ;;  %444 = vst [vmem:[%s1033_s3 + $0x100] sm:$0xff] %v380_v59  ;;  %v382_v4 = vsel %vm254_vm2, %v190_v45, %v318_v55  ;;  %vm255_vm3 = vcmp.gt.f32.partialorder %v191_v56, 0.0  ;;  %v319_v5 = vmul.f32 0.2, %v191_v56  ;;  %v64_v43 = vld [vmem:[%s1030_s0 + $0x190] sm:$0xff]  ;;  %v66_v55 = vld [vmem:[%s1030_s0 + $0x1a0] sm:$0xff] }
  0x31   :  { %445 = vst [vmem:[%s1033_s3 + $0x108] sm:$0xff] %v381_v60  ;;  %vm256_vm4 = vcmp.gt.f32.partialorder %v192_v57, 0.0  ;;  %446 = vst [vmem:[%s1033_s3 + $0x110] sm:$0xff] %v382_v4  ;;  %v320_v6 = vmul.f32 0.2, %v192_v57  ;;  %v193_v7 = vadd.f32 %v513_v2, %v122_v61  ;;  %v194_v8 = vadd.f32 %v513_v2, %v123_v62 }
  0x32   :  { %v124_v9 = vmul.f32 %v508_v1, %v53_v58  ;;  %v383_v10 = vsel %vm255_vm3, %v191_v56, %v319_v5  ;;  %v125_v11 = vmul.f32 %v508_v1, %v54_v63  ;;  %v126_v12 = vmul.f32 %v508_v1, %v55_v0 }
  0x33   :  { %v127_v13 = vmul.f32 %v508_v1, %v56_v3  ;;  %447 = vst [vmem:[%s1033_s3 + $0x118] sm:$0xff] %v383_v10  ;;  %v384_v16 = vsel %vm256_vm4, %v192_v57, %v320_v6  ;;  %vm257_vm5 = vcmp.gt.f32.partialorder %v193_v7, 0.0  ;;  %v321_v17 = vmul.f32 0.2, %v193_v7  ;;  %v67_v6 = vld [vmem:[%s1030_s0 + $0x1a8] sm:$0xff] }
  0x34   :  { %vm258_vm6 = vcmp.gt.f32.partialorder %v194_v8, 0.0  ;;  %448 = vst [vmem:[%s1033_s3 + $0x120] sm:$0xff] %v384_v16  ;;  %v322_v18 = vmul.f32 0.2, %v194_v8  ;;  %v195_v19 = vadd.f32 %v513_v2, %v124_v9  ;;  %v196_v20 = vadd.f32 %v513_v2, %v125_v11 }
  0x35   :  { %v197_v21 = vadd.f32 %v513_v2, %v126_v12  ;;  %v385_v22 = vsel %vm257_vm5, %v193_v7, %v321_v17  ;;  %v198_v23 = vadd.f32 %v513_v2, %v127_v13  ;;  %v128_v24 = vmul.f32 %v508_v1, %v57_v14  ;;  %v68_v7 = vld [vmem:[%s1030_s0 + $0x1b0] sm:$0xff]  ;;  %v69_v14 = vld [vmem:[%s1030_s0 + $0x1b8] sm:$0xff] }
  0x36   :  { %v129_v25 = vmul.f32 %v508_v1, %v58_v15  ;;  %449 = vst [vmem:[%s1033_s3 + $0x128] sm:$0xff] %v385_v22  ;;  %v386_v26 = vsel %vm258_vm6, %v194_v8, %v322_v18  ;;  %vm259_vm7 = vcmp.gt.f32.partialorder %v195_v19, 0.0  ;;  %v323_v27 = vmul.f32 0.2, %v195_v19 }
  0x37   :  { %vm260_vm8 = vcmp.gt.f32.partialorder %v196_v20, 0.0  ;;  %450 = vst [vmem:[%s1033_s3 + $0x130] sm:$0xff] %v386_v26  ;;  %v324_v30 = vmul.f32 0.2, %v196_v20  ;;  %vm261_vm9 = vcmp.gt.f32.partialorder %v197_v21, 0.0  ;;  %vm262_vm10 = vcmp.gt.f32.partialorder %v198_v23, 0.0 }
  0x38   :  { %v325_v31 = vmul.f32 0.2, %v197_v21  ;;  %v387_v32 = vsel %vm259_vm7, %v195_v19, %v323_v27  ;;  %v326_v33 = vmul.f32 0.2, %v198_v23  ;;  %v199_v34 = vadd.f32 %v513_v2, %v128_v24  ;;  %v70_v19 = vld [vmem:[%s1030_s0 + $0x1c0] sm:$0xff] }
  0x39   :  { %v200_v35 = vadd.f32 %v513_v2, %v129_v25  ;;  %451 = vst [vmem:[%s1033_s3 + $0x138] sm:$0xff] %v387_v32  ;;  %v388_v37 = vsel %vm260_vm8, %v196_v20, %v324_v30  ;;  %v130_v39 = vmul.f32 %v508_v1, %v59_v28  ;;  %v131_v40 = vmul.f32 %v508_v1, %v60_v29  ;;  %v71_v20 = vld [vmem:[%s1030_s0 + $0x1c8] sm:$0xff]  ;;  %v73_v32 = vld [vmem:[%s1030_s0 + $0x1d8] sm:$0xff] }
  0x3a   :  { %v389_v38 = vsel %vm261_vm9, %v197_v21, %v325_v31  ;;  %452 = vst [vmem:[%s1033_s3 + $0x140] sm:$0xff] %v388_v37  ;;  %v390_v44 = vsel %vm262_vm10, %v198_v23, %v326_v33  ;;  %vm263_vm11 = vcmp.gt.f32.partialorder %v199_v34, 0.0  ;;  %v327_v45 = vmul.f32 0.2, %v199_v34  ;;  %v72_v21 = vld [vmem:[%s1030_s0 + $0x1d0] sm:$0xff]  ;;  %v74_v33 = vld [vmem:[%s1030_s0 + $0x1e0] sm:$0xff] }
  0x3b   :  { %453 = vst [vmem:[%s1033_s3 + $0x148] sm:$0xff] %v389_v38  ;;  %vm264_vm12 = vcmp.gt.f32.partialorder %v200_v35, 0.0  ;;  %454 = vst [vmem:[%s1033_s3 + $0x150] sm:$0xff] %v390_v44  ;;  %v328_v46 = vmul.f32 0.2, %v200_v35  ;;  %v201_v47 = vadd.f32 %v513_v2, %v130_v39  ;;  %v202_v48 = vadd.f32 %v513_v2, %v131_v40 }
  0x3c   :  { %v132_v49 = vmul.f32 %v508_v1, %v61_v36  ;;  %v391_v50 = vsel %vm263_vm11, %v199_v34, %v327_v45  ;;  %v133_v51 = vmul.f32 %v508_v1, %v62_v41  ;;  %v134_v52 = vmul.f32 %v508_v1, %v63_v42 }
  0x3d   :  { %v135_v53 = vmul.f32 %v508_v1, %v64_v43  ;;  %455 = vst [vmem:[%s1033_s3 + $0x158] sm:$0xff] %v391_v50  ;;  %v392_v56 = vsel %vm264_vm12, %v200_v35, %v328_v46  ;;  %vm265_vm13 = vcmp.gt.f32.partialorder %v201_v47, 0.0  ;;  %v329_v57 = vmul.f32 0.2, %v201_v47  ;;  %v75_v46 = vld [vmem:[%s1030_s0 + $0x1e8] sm:$0xff] }
  0x3e   :  { %vm266_vm14 = vcmp.gt.f32.partialorder %v202_v48, 0.0  ;;  %456 = vst [vmem:[%s1033_s3 + $0x160] sm:$0xff] %v392_v56  ;;  %v330_v58 = vmul.f32 0.2, %v202_v48  ;;  %v203_v59 = vadd.f32 %v513_v2, %v132_v49  ;;  %v204_v60 = vadd.f32 %v513_v2, %v133_v51 }
  0x3f   :  { %v205_v61 = vadd.f32 %v513_v2, %v134_v52  ;;  %v393_v62 = vsel %vm265_vm13, %v201_v47, %v329_v57  ;;  %v206_v63 = vadd.f32 %v513_v2, %v135_v53  ;;  %v136_v0 = vmul.f32 %v508_v1, %v65_v54  ;;  %v76_v47 = vld [vmem:[%s1030_s0 + $0x1f0] sm:$0xff]  ;;  %v77_v54 = vld [vmem:[%s1030_s0 + $0x1f8] sm:$0xff] }
  0x40   :  { %v137_v3 = vmul.f32 %v508_v1, %v66_v55  ;;  %457 = vst [vmem:[%s1033_s3 + $0x168] sm:$0xff] %v393_v62  ;;  %v394_v4 = vsel %vm266_vm14, %v202_v48, %v330_v58  ;;  %vm267_vm15 = vcmp.gt.f32.partialorder %v203_v59, 0.0  ;;  %v331_v5 = vmul.f32 0.2, %v203_v59 }
  0x41   :  { %vm268_vm0 = vcmp.gt.f32.partialorder %v204_v60, 0.0  ;;  %458 = vst [vmem:[%s1033_s3 + $0x170] sm:$0xff] %v394_v4  ;;  %v332_v8 = vmul.f32 0.2, %v204_v60  ;;  %vm269_vm1 = vcmp.gt.f32.partialorder %v205_v61, 0.0  ;;  %vm270_vm2 = vcmp.gt.f32.partialorder %v206_v63, 0.0 }
  0x42   :  { %v333_v9 = vmul.f32 0.2, %v205_v61  ;;  %v395_v10 = vsel %vm267_vm15, %v203_v59, %v331_v5  ;;  %v334_v11 = vmul.f32 0.2, %v206_v63  ;;  %v207_v12 = vadd.f32 %v513_v2, %v136_v0 }
  0x43   :  { %v208_v13 = vadd.f32 %v513_v2, %v137_v3  ;;  %459 = vst [vmem:[%s1033_s3 + $0x178] sm:$0xff] %v395_v10  ;;  %v396_v15 = vsel %vm268_vm0, %v204_v60, %v332_v8  ;;  %v138_v17 = vmul.f32 %v508_v1, %v67_v6  ;;  %v139_v18 = vmul.f32 %v508_v1, %v68_v7 }
  0x44   :  { %v397_v16 = vsel %vm269_vm1, %v205_v61, %v333_v9  ;;  %460 = vst [vmem:[%s1033_s3 + $0x180] sm:$0xff] %v396_v15  ;;  %v398_v22 = vsel %vm270_vm2, %v206_v63, %v334_v11  ;;  %vm271_vm3 = vcmp.gt.f32.partialorder %v207_v12, 0.0  ;;  %v335_v23 = vmul.f32 0.2, %v207_v12 }
  0x45   :  { %461 = vst [vmem:[%s1033_s3 + $0x188] sm:$0xff] %v397_v16  ;;  %vm272_vm4 = vcmp.gt.f32.partialorder %v208_v13, 0.0  ;;  %462 = vst [vmem:[%s1033_s3 + $0x190] sm:$0xff] %v398_v22  ;;  %v336_v24 = vmul.f32 0.2, %v208_v13  ;;  %v209_v25 = vadd.f32 %v513_v2, %v138_v17  ;;  %v210_v26 = vadd.f32 %v513_v2, %v139_v18 }
  0x46   :  { %v140_v27 = vmul.f32 %v508_v1, %v69_v14  ;;  %v399_v28 = vsel %vm271_vm3, %v207_v12, %v335_v23  ;;  %v141_v29 = vmul.f32 %v508_v1, %v70_v19  ;;  %v142_v30 = vmul.f32 %v508_v1, %v71_v20 }
  0x47   :  { %v143_v31 = vmul.f32 %v508_v1, %v72_v21  ;;  %463 = vst [vmem:[%s1033_s3 + $0x198] sm:$0xff] %v399_v28  ;;  %v400_v34 = vsel %vm272_vm4, %v208_v13, %v336_v24  ;;  %vm273_vm5 = vcmp.gt.f32.partialorder %v209_v25, 0.0  ;;  %v337_v35 = vmul.f32 0.2, %v209_v25 }
  0x48   :  { %vm274_vm6 = vcmp.gt.f32.partialorder %v210_v26, 0.0  ;;  %464 = vst [vmem:[%s1033_s3 + $0x1a0] sm:$0xff] %v400_v34  ;;  %v338_v36 = vmul.f32 0.2, %v210_v26  ;;  %v211_v37 = vadd.f32 %v513_v2, %v140_v27  ;;  %v212_v38 = vadd.f32 %v513_v2, %v141_v29 }
  0x49   :  { %v213_v39 = vadd.f32 %v513_v2, %v142_v30  ;;  %v401_v40 = vsel %vm273_vm5, %v209_v25, %v337_v35  ;;  %v214_v41 = vadd.f32 %v513_v2, %v143_v31  ;;  %v144_v42 = vmul.f32 %v508_v1, %v73_v32 }
  0x4a   :  { %v145_v43 = vmul.f32 %v508_v1, %v74_v33  ;;  %465 = vst [vmem:[%s1033_s3 + $0x1a8] sm:$0xff] %v401_v40  ;;  %v402_v44 = vsel %vm274_vm6, %v210_v26, %v338_v36  ;;  %vm275_vm7 = vcmp.gt.f32.partialorder %v211_v37, 0.0  ;;  %v339_v45 = vmul.f32 0.2, %v211_v37 }
  0x4b   :  { %vm276_vm8 = vcmp.gt.f32.partialorder %v212_v38, 0.0  ;;  %466 = vst [vmem:[%s1033_s3 + $0x1b0] sm:$0xff] %v402_v44  ;;  %v340_v48 = vmul.f32 0.2, %v212_v38  ;;  %vm277_vm9 = vcmp.gt.f32.partialorder %v213_v39, 0.0  ;;  %vm278_vm10 = vcmp.gt.f32.partialorder %v214_v41, 0.0 }
  0x4c   :  { %v341_v49 = vmul.f32 0.2, %v213_v39  ;;  %v403_v50 = vsel %vm275_vm7, %v211_v37, %v339_v45  ;;  %v342_v51 = vmul.f32 0.2, %v214_v41  ;;  %v215_v52 = vadd.f32 %v513_v2, %v144_v42 }
  0x4d   :  { %v216_v53 = vadd.f32 %v513_v2, %v145_v43  ;;  %467 = vst [vmem:[%s1033_s3 + $0x1b8] sm:$0xff] %v403_v50  ;;  %v404_v55 = vsel %vm276_vm8, %v212_v38, %v340_v48  ;;  %v146_v57 = vmul.f32 %v508_v1, %v75_v46  ;;  %v147_v58 = vmul.f32 %v508_v1, %v76_v47 }
  0x4e   :  { %v405_v56 = vsel %vm277_vm9, %v213_v39, %v341_v49  ;;  %468 = vst [vmem:[%s1033_s3 + $0x1c0] sm:$0xff] %v404_v55  ;;  %v406_v59 = vsel %vm278_vm10, %v214_v41, %v342_v51  ;;  %vm279_vm11 = vcmp.gt.f32.partialorder %v215_v52, 0.0  ;;  %v343_v60 = vmul.f32 0.2, %v215_v52 }
  0x4f   :  { %469 = vst [vmem:[%s1033_s3 + $0x1c8] sm:$0xff] %v405_v56  ;;  %vm280_vm12 = vcmp.gt.f32.partialorder %v216_v53, 0.0  ;;  %470 = vst [vmem:[%s1033_s3 + $0x1d0] sm:$0xff] %v406_v59  ;;  %v344_v61 = vmul.f32 0.2, %v216_v53  ;;  %v217_v62 = vadd.f32 %v513_v2, %v146_v57  ;;  %v218_v63 = vadd.f32 %v513_v2, %v147_v58 }
  0x50   :  { %v148_v0 = vmul.f32 %v508_v1, %v77_v54  ;;  %v407_v3 = vsel %vm279_vm11, %v215_v52, %v343_v60 }
  0x51   :  { %471 = vst [vmem:[%s1033_s3 + $0x1d8] sm:$0xff] %v407_v3  ;;  %v408_v4 = vsel %vm280_vm12, %v216_v53, %v344_v61  ;;  %vm281_vm13 = vcmp.gt.f32.partialorder %v217_v62, 0.0  ;;  %v345_v5 = vmul.f32 0.2, %v217_v62  ;;  %vm282_vm14 = vcmp.gt.f32.partialorder %v218_v63, 0.0 }
  0x52   :  { %472 = vst [vmem:[%s1033_s3 + $0x1e0] sm:$0xff] %v408_v4  ;;  %v346_v6 = vmul.f32 0.2, %v218_v63  ;;  %v219_v7 = vadd.f32 %v513_v2, %v148_v0 }
  0x53   :  { %v409_v8 = vsel %vm281_vm13, %v217_v62, %v345_v5 }
  0x54   :  { %473 = vst [vmem:[%s1033_s3 + $0x1e8] sm:$0xff] %v409_v8  ;;  %v410_v1 = vsel %vm282_vm14, %v218_v63, %v346_v6  ;;  %vm283_vm15 = vcmp.gt.f32.partialorder %v219_v7, 0.0  ;;  %v347_v9 = vmul.f32 0.2, %v219_v7 }
  0x55   :  { %474 = vst [vmem:[%s1033_s3 + $0x1f0] sm:$0xff] %v410_v1 }
  0x56   :  { %v411_v10 = vsel %vm283_vm15, %v219_v7, %v347_v9 }
  0x57   :  { %475 = vst [vmem:[%s1033_s3 + $0x1f8] sm:$0xff] %v411_v10 }

// kernel: discriminator_forward.11
= control target key start
LH: loop header
LB: loop body
LE: loop exit
PB: predicated region body
PF: predicated region fallthrough
CT: control target
= control target key end

     0   :  { %v587_v32 = vmov 0.0   ;;  %s793_s1 = inlined_call_operand.vmem [shape: bf16[256,128], index: 1, kind: input, shape index: {}]   ;;  %s794_s0 = inlined_call_operand.vmem [shape: bf16[128,256], index: 0, kind: input, shape index: {}]   ;;  %s795_s3 = inlined_call_operand.vmem [shape: f32[1,128], index: 3, kind: output, shape index: {1}]   ;;  %s796_s4 = inlined_call_operand.vmem [shape: f32[1,128], index: 4, kind: output, shape index: {2}]   ;;  %s797_s2 = inlined_call_operand.vmem [shape: f32[128,128], index: 2, kind: output, shape index: {0}]  }
   0x1   :  { %v547_v0 = vld [vmem:[%s793_s1 + $0x40] sm:$0xff]   ;;  %v549_v2 = vld [vmem:[%s793_s1 + $0x48] sm:$0xff]   ;;  %v551_v4 = vld [vmem:[%s793_s1 + $0x50] sm:$0xff]   ;;  %356 = vst [vmem:[%s795_s3] sm:$0x1] %v587_v32 }
   0x2   :  { %v548_v1 = vld [vmem:[%s793_s1] sm:$0xff]   ;;  %466 = vmatprep.subr.bf16.mxu0 %v547_v0  ;;  %530 = vmatprep.subr.bf16.mxu1 %v547_v0  ;;  %v550_v3 = vld [vmem:[%s793_s1 + $0x8] sm:$0xff]   ;;  %v552_v5 = vld [vmem:[%s793_s1 + $0x10] sm:$0xff]   ;;  %357 = vst [vmem:[%s796_s4] sm:$0x1] %v587_v32 }
   0x3   :  { %467 = vmatpush3.bf16.msra.mxu0 %v548_v1  ;;  %538 = vmatpush3.bf16.msra.mxu1 %v548_v1  ;;  %v553_v6 = vld [vmem:[%s793_s1 + $0x58] sm:$0xff]   ;;  %v555_v8 = vld [vmem:[%s793_s1 + $0x60] sm:$0xff]   ;;  %v557_v10 = vld [vmem:[%s793_s1 + $0x68] sm:$0xff]  }
   0x4   :  { %468 = vmatprep.subr.bf16.mxu0 %v549_v2  ;;  %531 = vmatprep.subr.bf16.mxu1 %v549_v2  ;;  %v554_v7 = vld [vmem:[%s793_s1 + $0x18] sm:$0xff]   ;;  %v556_v9 = vld [vmem:[%s793_s1 + $0x20] sm:$0xff]   ;;  %v558_v12 = vld [vmem:[%s793_s1 + $0x28] sm:$0xff]  }
   0x5   :  { %v565_v11 = vld [vmem:[%s794_s0 + $0x4] ss:$8 sps:$4 sm:$0xff]   ;;  %v559_v14 = vld [vmem:[%s793_s1 + $0x70] sm:$0xff]   ;;  %v561_v16 = vld [vmem:[%s793_s1 + $0x78] sm:$0xff]  }
   0x6   :  { %v571_v13 = vld [vmem:[%s794_s0 + $0x44] ss:$8 sps:$4 sm:$0xff]   ;;  %271 = vmatprep.mubr.bf16.mxu0 %v565_v11  ;;  %v560_v15 = vld [vmem:[%s793_s1 + $0x30] sm:$0xff]   ;;  %v562_v17 = vld [vmem:[%s793_s1 + $0x38] sm:$0xff]  }
   0x7   :  { %469 = vmatpush3.bf16.msra.mxu0 %v550_v3  ;;  %539 = vmatpush3.bf16.msra.mxu1 %v550_v3  ;;  %v563_v18 = vld [vmem:[%s794_s0] ss:$8 sps:$4 sm:$0xff]   ;;  %v566_v20 = vld [vmem:[%s794_s0 + $0x14] ss:$8 sps:$4 sm:$0xff]   ;;  %v568_v22 = vld [vmem:[%s794_s0 + $0x10] ss:$8 sps:$4 sm:$0xff]  }
   0x8   :  { %470 = vmatprep.subr.bf16.mxu0 %v551_v4  ;;  %532 = vmatprep.subr.bf16.mxu1 %v551_v4  ;;  %v569_v19 = vld [vmem:[%s794_s0 + $0x40] ss:$8 sps:$4 sm:$0xff]   ;;  %v575_v21 = vld [vmem:[%s794_s0 + $0x54] ss:$8 sps:$4 sm:$0xff]   ;;  %v577_v23 = vld [vmem:[%s794_s0 + $0x50] ss:$8 sps:$4 sm:$0xff]  }
   0x9   :  { %303 = vmatprep.mubr.bf16.mxu1 %v571_v13  ;;  %v572_v24 = vld [vmem:[%s794_s0 + $0x24] ss:$8 sps:$4 sm:$0xff]   ;;  %v574_v26 = vld [vmem:[%s794_s0 + $0x20] ss:$8 sps:$4 sm:$0xff]   ;;  %v578_v28 = vld [vmem:[%s794_s0 + $0x34] ss:$8 sps:$4 sm:$0xff]  }
   0xa   :  { %v581_v25 = vld [vmem:[%s794_s0 + $0x64] ss:$8 sps:$4 sm:$0xff]   ;;  %v583_v27 = vld [vmem:[%s794_s0 + $0x60] ss:$8 sps:$4 sm:$0xff]   ;;  %v584_v29 = vld [vmem:[%s794_s0 + $0x74] ss:$8 sps:$4 sm:$0xff]  }
   0xb   :  { %471 = vmatpush3.bf16.msra.mxu0 %v552_v5  ;;  %540 = vmatpush3.bf16.msra.mxu1 %v552_v5  ;;  %v580_v30 = vld [vmem:[%s794_s0 + $0x30] ss:$8 sps:$4 sm:$0xff]  }
   0xc   :  { %472 = vmatprep.subr.bf16.mxu0 %v553_v6  ;;  %533 = vmatprep.subr.bf16.mxu1 %v553_v6  ;;  %v586_v31 = vld [vmem:[%s794_s0 + $0x70] ss:$8 sps:$4 sm:$0xff]  }
   0xf   :  { %473 = vmatpush3.bf16.msra.mxu0 %v554_v7  ;;  %541 = vmatpush3.bf16.msra.mxu1 %v554_v7 }
  0x10   :  { %474 = vmatprep.subr.bf16.mxu0 %v555_v8  ;;  %534 = vmatprep.subr.bf16.mxu1 %v555_v8 }
  0x13   :  { %475 = vmatpush3.bf16.msra.mxu0 %v556_v9  ;;  %542 = vmatpush3.bf16.msra.mxu1 %v556_v9 }
  0x14   :  { %476 = vmatprep.subr.bf16.mxu0 %v557_v10  ;;  %535 = vmatprep.subr.bf16.mxu1 %v557_v10 }
  0x17   :  { %477 = vmatpush3.bf16.msra.mxu0 %v558_v12  ;;  %543 = vmatpush3.bf16.msra.mxu1 %v558_v12 }
  0x18   :  { %478 = vmatprep.subr.bf16.mxu0 %v559_v14  ;;  %536 = vmatprep.subr.bf16.mxu1 %v559_v14 }
  0x1b   :  { %479 = vmatpush3.bf16.msra.mxu0 %v560_v15  ;;  %544 = vmatpush3.bf16.msra.mxu1 %v560_v15 }
  0x1c   :  { %480 = vmatprep.subr.bf16.mxu0 %v561_v16  ;;  %537 = vmatprep.subr.bf16.mxu1 %v561_v16 }
  0x1f   :  { %481 = vmatpush3.bf16.msra.mxu0 %v562_v17  ;;  %545 = vmatpush3.bf16.msra.mxu1 %v562_v17 }
  0x22   :  { %272 = vmatmul.mubr.bf16.vlgmr.msra.gmra.mrb[0].mxu0 %v563_v18  ;;  %304 = vmatmul.mubr.bf16.vlgmr.msra.gmra.mrb[0].mxu1 %v569_v19 }
  0x23   :  { %279 = vmatprep.mubr.bf16.mxu0 %v566_v20  ;;  %311 = vmatprep.mubr.bf16.mxu1 %v575_v21 }
  0x2a   :  { %280 = vmatmul.mubr.bf16.gmra.mrb[4].mxu0 %v568_v22  ;;  %312 = vmatmul.mubr.bf16.gmra.mrb[4].mxu1 %v577_v23 }
  0x2b   :  { %287 = vmatprep.mubr.bf16.mxu0 %v572_v24  ;;  %319 = vmatprep.mubr.bf16.mxu1 %v581_v25 }
  0x32   :  { %288 = vmatmul.mubr.bf16.gmra.mrb[8].mxu0 %v574_v26  ;;  %320 = vmatmul.mubr.bf16.gmra.mrb[8].mxu1 %v583_v27 }
  0x33   :  { %295 = vmatprep.mubr.bf16.mxu0 %v578_v28  ;;  %327 = vmatprep.mubr.bf16.mxu1 %v584_v29 }
  0x3a   :  { %296 = vmatmul.mubr.bf16.gmra.mrb[12].mxu0 %v580_v30  ;;  %328 = vmatmul.mubr.bf16.gmra.mrb[12].mxu1 %v586_v31 }
  0xf5   :  { %v482_v33 = vpop.f32.mrb[0].mxu0  ;;  %v506_v34 = vpop.f32.mrb[0].mxu1 }
  0xf6   :  { %v483_v35 = vpop.f32.mrb[1].mxu0  ;;  %v507_v36 = vpop.f32.mrb[1].mxu1 }
  0xf7   :  { %v484_v37 = vadd.f32 %v483_v35, %v482_v33  ;;  %v485_v38 = vpop.f32.mrb[2].mxu0  ;;  %v715_v39 = vadd.f32 %v507_v36, %v506_v34  ;;  %v509_v40 = vpop.f32.mrb[2].mxu1 }
  0xf8   :  { %v486_v41 = vpop.f32.mrb[3].mxu0  ;;  %v510_v42 = vpop.f32.mrb[3].mxu1 }
  0xf9   :  { %336 = vst [vmem:[%s797_s2] sm:$0xff] %v484_v37  ;;  %v487_v43 = vadd.f32 %v486_v41, %v485_v38  ;;  %344 = vst [vmem:[%s797_s2 + $0x40] sm:$0xff] %v715_v39  ;;  %v724_v44 = vadd.f32 %v510_v42, %v509_v40  ;;  %v383_v45 = vmul.f32 %v484_v37, %v484_v37 }
  0xfa   :  { %v391_v38 = vmul.f32 %v715_v39, %v715_v39 }
  0xfb   :  { %337 = vst [vmem:[%s797_s2 + $0x8] sm:$0xff] %v487_v43  ;;  %v359_v46 = vadd.f32 %v487_v43, %v484_v37  ;;  %v384_v47 = vmul.f32 %v487_v43, %v487_v43  ;;  %345 = vst [vmem:[%s797_s2 + $0x48] sm:$0xff] %v724_v44  ;;  %v392_v42 = vmul.f32 %v724_v44, %v724_v44 }
  0xfd   :  { %v399_v48 = vadd.f32 %v384_v47, %v383_v45  ;;  %v488_v49 = vpop.f32.mrb[4].mxu0  ;;  %v512_v50 = vpop.f32.mrb[4].mxu1 }
  0xfe   :  { %v489_v51 = vpop.f32.mrb[5].mxu0  ;;  %v513_v52 = vpop.f32.mrb[5].mxu1 }
  0xff   :  { %v490_v53 = vadd.f32 %v489_v51, %v488_v49  ;;  %v491_v54 = vpop.f32.mrb[6].mxu0  ;;  %v733_v55 = vadd.f32 %v513_v52, %v512_v50  ;;  %v515_v56 = vpop.f32.mrb[6].mxu1 }
 0x100   :  { %v492_v57 = vpop.f32.mrb[7].mxu0  ;;  %v516_v58 = vpop.f32.mrb[7].mxu1 }
 0x101   :  { %338 = vst [vmem:[%s797_s2 + $0x10] sm:$0xff] %v490_v53  ;;  %v360_v59 = vadd.f32 %v490_v53, %v359_v46  ;;  %v385_v60 = vmul.f32 %v490_v53, %v490_v53  ;;  %v493_v61 = vadd.f32 %v492_v57, %v491_v54  ;;  %346 = vst [vmem:[%s797_s2 + $0x50] sm:$0xff] %v733_v55 }
 0x102   :  { %v517_v62 = vadd.f32 %v516_v58, %v515_v56  ;;  %v393_v46 = vmul.f32 %v733_v55, %v733_v55 }
 0x103   :  { %v400_v63 = vadd.f32 %v399_v48, %v385_v60  ;;  %339 = vst [vmem:[%s797_s2 + $0x18] sm:$0xff] %v493_v61  ;;  %v361_v0 = vadd.f32 %v493_v61, %v360_v59  ;;  %v386_v1 = vmul.f32 %v493_v61, %v493_v61 }
 0x104   :  { %347 = vst [vmem:[%s797_s2 + $0x58] sm:$0xff] %v517_v62  ;;  %v394_v49 = vmul.f32 %v517_v62, %v517_v62 }
 0x105   :  { %v401_v2 = vadd.f32 %v400_v63, %v386_v1  ;;  %v494_v3 = vpop.f32.mrb[8].mxu0  ;;  %v518_v4 = vpop.f32.mrb[8].mxu1 }
 0x106   :  { %v495_v5 = vpop.f32.mrb[9].mxu0  ;;  %v519_v6 = vpop.f32.mrb[9].mxu1 }
 0x107   :  { %v496_v7 = vadd.f32 %v495_v5, %v494_v3  ;;  %v497_v8 = vpop.f32.mrb[10].mxu0  ;;  %v520_v9 = vadd.f32 %v519_v6, %v518_v4  ;;  %v521_v10 = vpop.f32.mrb[10].mxu1 }
 0x108   :  { %v498_v11 = vpop.f32.mrb[11].mxu0  ;;  %v522_v12 = vpop.f32.mrb[11].mxu1 }
 0x109   :  { %340 = vst [vmem:[%s797_s2 + $0x20] sm:$0xff] %v496_v7  ;;  %v362_v13 = vadd.f32 %v496_v7, %v361_v0  ;;  %v387_v14 = vmul.f32 %v496_v7, %v496_v7  ;;  %v499_v15 = vadd.f32 %v498_v11, %v497_v8  ;;  %348 = vst [vmem:[%s797_s2 + $0x60] sm:$0xff] %v520_v9  ;;  %v358_v8 = vld [vmem:[%s795_s3] sm:$0x1] }
 0x10a   :  { %v523_v16 = vadd.f32 %v522_v12, %v521_v10  ;;  %v395_v53 = vmul.f32 %v520_v9, %v520_v9  ;;  %v382_v11 = vld [vmem:[%s796_s4] sm:$0x1] }
 0x10b   :  { %v402_v17 = vadd.f32 %v401_v2, %v387_v14  ;;  %341 = vst [vmem:[%s797_s2 + $0x28] sm:$0xff] %v499_v15  ;;  %v363_v18 = vadd.f32 %v499_v15, %v362_v13  ;;  %v388_v19 = vmul.f32 %v499_v15, %v499_v15 }
 0x10c   :  { %349 = vst [vmem:[%s797_s2 + $0x68] sm:$0xff] %v523_v16  ;;  %v396_v57 = vmul.f32 %v523_v16, %v523_v16 }
 0x10d   :  { %v403_v20 = vadd.f32 %v402_v17, %v388_v19  ;;  %v500_v21 = vpop.f32.mrb[12].mxu0  ;;  %v524_v22 = vpop.f32.mrb[12].mxu1 }
 0x10e   :  { %v501_v23 = vpop.f32.mrb[13].mxu0  ;;  %v525_v24 = vpop.f32.mrb[13].mxu1 }
 0x10f   :  { %v502_v25 = vadd.f32 %v501_v23, %v500_v21  ;;  %v503_v26 = vpop.f32.mrb[14].mxu0  ;;  %v526_v27 = vadd.f32 %v525_v24, %v524_v22  ;;  %v527_v28 = vpop.f32.mrb[14].mxu1 }
 0x110   :  { %v504_v29 = vpop.f32.mrb[15].mxu0  ;;  %v528_v30 = vpop.f32.mrb[15].mxu1 }
 0x111   :  { %342 = vst [vmem:[%s797_s2 + $0x30] sm:$0xff] %v502_v25  ;;  %v364_v31 = vadd.f32 %v502_v25, %v363_v18  ;;  %v389_v32 = vmul.f32 %v502_v25, %v502_v25  ;;  %v505_v33 = vadd.f32 %v504_v29, %v503_v26  ;;  %350 = vst [vmem:[%s797_s2 + $0x70] sm:$0xff] %v526_v27 }
 0x112   :  { %v529_v34 = vadd.f32 %v528_v30, %v527_v28  ;;  %v397_v58 = vmul.f32 %v526_v27, %v526_v27 }
 0x113   :  { %v404_v35 = vadd.f32 %v403_v20, %v389_v32  ;;  %343 = vst [vmem:[%s797_s2 + $0x38] sm:$0xff] %v505_v33  ;;  %v365_v36 = vadd.f32 %v505_v33, %v364_v31  ;;  %v390_v37 = vmul.f32 %v505_v33, %v505_v33 }
 0x114   :  { %351 = vst [vmem:[%s797_s2 + $0x78] sm:$0xff] %v529_v34  ;;  %v398_v63 = vmul.f32 %v529_v34, %v529_v34 }
 0x115   :  { %v366_v40 = vadd.f32 %v715_v39, %v365_v36  ;;  %v405_v41 = vadd.f32 %v404_v35, %v390_v37 }
 0x117   :  { %v367_v43 = vadd.f32 %v724_v44, %v366_v40  ;;  %v406_v45 = vadd.f32 %v405_v41, %v391_v38 }
 0x119   :  { %v407_v47 = vadd.f32 %v406_v45, %v392_v42  ;;  %v368_v48 = vadd.f32 %v733_v55, %v367_v43 }
 0x11b   :  { %v369_v50 = vadd.f32 %v517_v62, %v368_v48  ;;  %v408_v51 = vadd.f32 %v407_v47, %v393_v46 }
 0x11d   :  { %v370_v52 = vadd.f32 %v520_v9, %v369_v50  ;;  %v409_v54 = vadd.f32 %v408_v51, %v394_v49 }
 0x11f   :  { %v410_v39 = vadd.f32 %v409_v54, %v395_v53  ;;  %v371_v56 = vadd.f32 %v523_v16, %v370_v52 }
 0x121   :  { %v411_v59 = vadd.f32 %v410_v39, %v396_v57  ;;  %v372_v60 = vadd.f32 %v526_v27, %v371_v56 }
 0x123   :  { %v412_v44 = vadd.f32 %v411_v59, %v397_v58  ;;  %v373_v61 = vadd.f32 %v529_v34, %v372_v60 }
 0x125   :  { %v374_v0 = vrot.slane %v373_v61, 4  ;;  %v413_v1 = vadd.f32 %v412_v44, %v398_v63 }
 0x127   :  { %v375_v2 = vadd.f32 %v374_v0, %v373_v61  ;;  %v414_v3 = vrot.slane %v413_v1, 4 }
 0x129   :  { %v376_v55 = vrot.slane %v375_v2, 2  ;;  %v415_v4 = vadd.f32 %v414_v3, %v413_v1 }
 0x12b   :  { %v377_v62 = vadd.f32 %v376_v55, %v375_v2  ;;  %v416_v5 = vrot.slane %v415_v4, 2 }
 0x12d   :  { %v378_v6 = vrot.slane %v377_v62, 1  ;;  %v417_v7 = vadd.f32 %v416_v5, %v415_v4 }
 0x12f   :  { %v379_v9 = vadd.f32 %v378_v6, %v377_v62  ;;  %v418_v10 = vrot.slane %v417_v7, 1 }
 0x131   :  { %v380_v12 = vadd.f32 %v379_v9, %v358_v8  ;;  %v419_v13 = vadd.f32 %v418_v10, %v417_v7 }
 0x133   :  { %381 = vst [vmem:[%s795_s3] sm:$0x1] %v380_v12  ;;  %v420_v14 = vadd.f32 %v419_v13, %v382_v11 }
 0x135   :  { %421 = vst [vmem:[%s796_s4] sm:$0x1] %v420_v14 }

// kernel: discriminator_forward.12
= control target key start
LH: loop header
LB: loop body
LE: loop exit
PB: predicated region body
PF: predicated region fallthrough
CT: control target
= control target key end

     0   :  { %s305_s0 = inlined_call_operand.vmem [shape: f32[128,128], index: 0, kind: input, shape index: {}]   ;;  %s306_s1 = inlined_call_operand.vmem [shape: f32[1,128], index: 1, kind: input, shape index: {}]   ;;  %s307_s2 = inlined_call_operand.vmem [shape: f32[1,128], index: 2, kind: input, shape index: {}]   ;;  %s308_s3 = inlined_call_operand.vmem [shape: f32[128,128], index: 3, kind: output, shape index: {}]  }
   0x1   :  { %v14_v0 = vld [vmem:[%s305_s0] sm:$0xff]  ;;  %v15_v4 = vld [vmem:[%s305_s0 + $0x8] sm:$0xff]  ;;  %v16_v5 = vld [vmem:[%s305_s0 + $0x10] sm:$0xff] }
   0x2   :  { %v172_v1 = vld [vmem:[%s306_s1] ss:$0 sm:$0xff]  ;;  %v17_v6 = vld [vmem:[%s305_s0 + $0x18] sm:$0xff]  ;;  %v19_v11 = vld [vmem:[%s305_s0 + $0x28] sm:$0xff] }
   0x3   :  { %v177_v2 = vld [vmem:[%s307_s2] ss:$0 sm:$0xff]  ;;  %v37_v3 = vmul.f32 %v172_v1, %v14_v0  ;;  %v38_v7 = vmul.f32 %v172_v1, %v15_v4  ;;  %v39_v8 = vmul.f32 %v172_v1, %v16_v5  ;;  %v40_v9 = vmul.f32 %v172_v1, %v17_v6  ;;  %v20_v12 = vld [vmem:[%s305_s0 + $0x30] sm:$0xff]  ;;  %v21_v17 = vld [vmem:[%s305_s0 + $0x38] sm:$0xff] }
   0x4   :  { %v18_v10 = vld [vmem:[%s305_s0 + $0x20] sm:$0xff]  ;;  %v42_v15 = vmul.f32 %v172_v1, %v19_v11  ;;  %v43_v16 = vmul.f32 %v172_v1, %v20_v12  ;;  %v44_v21 = vmul.f32 %v172_v1, %v21_v17  ;;  %v23_v30 = vld [vmem:[%s305_s0 + $0x48] sm:$0xff]  ;;  %v24_v31 = vld [vmem:[%s305_s0 + $0x50] sm:$0xff] }
   0x5   :  { %v60_v13 = vadd.f32 %v177_v2, %v37_v3  ;;  %v41_v14 = vmul.f32 %v172_v1, %v18_v10  ;;  %v61_v18 = vadd.f32 %v177_v2, %v38_v7  ;;  %v62_v19 = vadd.f32 %v177_v2, %v39_v8  ;;  %v22_v25 = vld [vmem:[%s305_s0 + $0x40] sm:$0xff]  ;;  %v25_v43 = vld [vmem:[%s305_s0 + $0x58] sm:$0xff]  ;;  %v27_v45 = vld [vmem:[%s305_s0 + $0x68] sm:$0xff] }
   0x6   :  { %v63_v20 = vadd.f32 %v177_v2, %v40_v9  ;;  %v65_v24 = vadd.f32 %v177_v2, %v42_v15  ;;  %v66_v37 = vadd.f32 %v177_v2, %v43_v16  ;;  %v67_v38 = vadd.f32 %v177_v2, %v44_v21  ;;  %v26_v44 = vld [vmem:[%s305_s0 + $0x60] sm:$0xff]  ;;  %v28_v56 = vld [vmem:[%s305_s0 + $0x70] sm:$0xff]  ;;  %v29_v4 = vld [vmem:[%s305_s0 + $0x78] sm:$0xff] }
   0x7   :  { %vm76_vm0 = vcmp.gt.f32.partialorder %v60_v13, 0.0  ;;  %v92_v22 = vmul.f32 0.2, %v60_v13  ;;  %v64_v23 = vadd.f32 %v177_v2, %v41_v14  ;;  %vm77_vm1 = vcmp.gt.f32.partialorder %v61_v18, 0.0 }
   0x8   :  { %v93_v26 = vmul.f32 0.2, %v61_v18  ;;  %vm78_vm2 = vcmp.gt.f32.partialorder %v62_v19, 0.0  ;;  %v94_v27 = vmul.f32 0.2, %v62_v19  ;;  %vm79_vm3 = vcmp.gt.f32.partialorder %v63_v20, 0.0 }
   0x9   :  { %v108_v28 = vsel %vm76_vm0, %v60_v13, %v92_v22  ;;  %v95_v29 = vmul.f32 0.2, %v63_v20  ;;  %vm80_vm4 = vcmp.gt.f32.partialorder %v64_v23, 0.0  ;;  %v96_v34 = vmul.f32 0.2, %v64_v23 }
   0xa   :  { %124 = vst [vmem:[%s308_s3] sm:$0xff] %v108_v28  ;;  %v109_v32 = vsel %vm77_vm1, %v61_v18, %v93_v26  ;;  %v110_v33 = vsel %vm78_vm2, %v62_v19, %v94_v27  ;;  %vm81_vm5 = vcmp.gt.f32.partialorder %v65_v24, 0.0  ;;  %v97_v36 = vmul.f32 0.2, %v65_v24 }
   0xb   :  { %125 = vst [vmem:[%s308_s3 + $0x8] sm:$0xff] %v109_v32  ;;  %126 = vst [vmem:[%s308_s3 + $0x10] sm:$0xff] %v110_v33  ;;  %v111_v35 = vsel %vm79_vm3, %v63_v20, %v95_v29  ;;  %v112_v39 = vsel %vm80_vm4, %v64_v23, %v96_v34  ;;  %v45_v40 = vmul.f32 %v172_v1, %v22_v25  ;;  %vm82_vm6 = vcmp.gt.f32.partialorder %v66_v37, 0.0 }
   0xc   :  { %127 = vst [vmem:[%s308_s3 + $0x18] sm:$0xff] %v111_v35  ;;  %v46_v41 = vmul.f32 %v172_v1, %v23_v30  ;;  %v47_v42 = vmul.f32 %v172_v1, %v24_v31  ;;  %128 = vst [vmem:[%s308_s3 + $0x20] sm:$0xff] %v112_v39  ;;  %v113_v46 = vsel %vm81_vm5, %v65_v24, %v97_v36  ;;  %v98_v47 = vmul.f32 0.2, %v66_v37 }
   0xd   :  { %vm83_vm7 = vcmp.gt.f32.partialorder %v67_v38, 0.0  ;;  %129 = vst [vmem:[%s308_s3 + $0x28] sm:$0xff] %v113_v46  ;;  %v99_v48 = vmul.f32 0.2, %v67_v38  ;;  %v68_v49 = vadd.f32 %v177_v2, %v45_v40  ;;  %v48_v53 = vmul.f32 %v172_v1, %v25_v43 }
   0xe   :  { %v69_v50 = vadd.f32 %v177_v2, %v46_v41  ;;  %v70_v51 = vadd.f32 %v177_v2, %v47_v42  ;;  %v114_v52 = vsel %vm82_vm6, %v66_v37, %v98_v47  ;;  %v49_v54 = vmul.f32 %v172_v1, %v26_v44 }
   0xf   :  { %v50_v55 = vmul.f32 %v172_v1, %v27_v45  ;;  %130 = vst [vmem:[%s308_s3 + $0x30] sm:$0xff] %v114_v52  ;;  %v115_v57 = vsel %vm83_vm7, %v67_v38, %v99_v48  ;;  %vm84_vm8 = vcmp.gt.f32.partialorder %v68_v49, 0.0  ;;  %v100_v58 = vmul.f32 0.2, %v68_v49 }
  0x10   :  { %vm85_vm9 = vcmp.gt.f32.partialorder %v69_v50, 0.0  ;;  %131 = vst [vmem:[%s308_s3 + $0x38] sm:$0xff] %v115_v57  ;;  %v101_v59 = vmul.f32 0.2, %v69_v50  ;;  %vm86_vm10 = vcmp.gt.f32.partialorder %v70_v51, 0.0  ;;  %v71_v61 = vadd.f32 %v177_v2, %v48_v53 }
  0x11   :  { %v102_v60 = vmul.f32 0.2, %v70_v51  ;;  %v116_v62 = vsel %vm84_vm8, %v68_v49, %v100_v58  ;;  %v72_v63 = vadd.f32 %v177_v2, %v49_v54  ;;  %v73_v0 = vadd.f32 %v177_v2, %v50_v55 }
  0x12   :  { %v51_v3 = vmul.f32 %v172_v1, %v28_v56  ;;  %132 = vst [vmem:[%s308_s3 + $0x40] sm:$0xff] %v116_v62  ;;  %v117_v5 = vsel %vm85_vm9, %v69_v50, %v101_v59  ;;  %vm87_vm11 = vcmp.gt.f32.partialorder %v71_v61, 0.0  ;;  %v103_v7 = vmul.f32 0.2, %v71_v61 }
  0x13   :  { %v118_v6 = vsel %vm86_vm10, %v70_v51, %v102_v60  ;;  %133 = vst [vmem:[%s308_s3 + $0x48] sm:$0xff] %v117_v5  ;;  %vm88_vm12 = vcmp.gt.f32.partialorder %v72_v63, 0.0  ;;  %v104_v8 = vmul.f32 0.2, %v72_v63  ;;  %vm89_vm13 = vcmp.gt.f32.partialorder %v73_v0, 0.0 }
  0x14   :  { %134 = vst [vmem:[%s308_s3 + $0x50] sm:$0xff] %v118_v6  ;;  %v105_v9 = vmul.f32 0.2, %v73_v0  ;;  %v119_v10 = vsel %vm87_vm11, %v71_v61, %v103_v7  ;;  %v74_v11 = vadd.f32 %v177_v2, %v51_v3  ;;  %v52_v12 = vmul.f32 %v172_v1, %v29_v4 }
  0x15   :  { %135 = vst [vmem:[%s308_s3 + $0x58] sm:$0xff] %v119_v10  ;;  %v120_v13 = vsel %vm88_vm12, %v72_v63, %v104_v8 }
  0x16   :  { %v121_v14 = vsel %vm89_vm13, %v73_v0, %v105_v9  ;;  %136 = vst [vmem:[%s308_s3 + $0x60] sm:$0xff] %v120_v13  ;;  %vm90_vm14 = vcmp.gt.f32.partialorder %v74_v11, 0.0  ;;  %v106_v15 = vmul.f32 0.2, %v74_v11  ;;  %v75_v16 = vadd.f32 %v177_v2, %v52_v12 }
  0x17   :  { %137 = vst [vmem:[%s308_s3 + $0x68] sm:$0xff] %v121_v14 }
  0x18   :  { %v122_v17 = vsel %vm90_vm14, %v74_v11, %v106_v15  ;;  %vm91_vm15 = vcmp.gt.f32.partialorder %v75_v16, 0.0  ;;  %v107_v1 = vmul.f32 0.2, %v75_v16 }
  0x19   :  { %138 = vst [vmem:[%s308_s3 + $0x70] sm:$0xff] %v122_v17 }
  0x1a   :  { %v123_v18 = vsel %vm91_vm15, %v75_v16, %v107_v1 }
  0x1b   :  { %139 = vst [vmem:[%s308_s3 + $0x78] sm:$0xff] %v123_v18 }

// kernel: discriminator_forward.13
= control target key start
LH: loop header
LB: loop body
LE: loop exit
PB: predicated region body
PF: predicated region fallthrough
CT: control target
= control target key end

     0   :  { %v608_v40 = vmov 0.0   ;;  %s784_s1 = inlined_call_operand.vmem [shape: bf16[512,128], index: 1, kind: input, shape index: {}]   ;;  %s785_s0 = inlined_call_operand.vmem [shape: bf16[32,512], index: 0, kind: input, shape index: {}]   ;;  %s786_s3 = inlined_call_operand.vmem [shape: f32[1,128], index: 3, kind: output, shape index: {1}]   ;;  %s787_s4 = inlined_call_operand.vmem [shape: f32[1,128], index: 4, kind: output, shape index: {2}]   ;;  %s788_s2 = inlined_call_operand.vmem [shape: f32[32,128], index: 2, kind: output, shape index: {0}]  }
   0x1   :  { %v564_v0 = vld [vmem:[%s784_s1 + $0x40] sm:$0xff]   ;;  %v568_v4 = vld [vmem:[%s784_s1 + $0x48] sm:$0xff]   ;;  %v572_v8 = vld [vmem:[%s784_s1 + $0x50] sm:$0xff]   ;;  %425 = vst [vmem:[%s786_s3] sm:$0x1] %v608_v40 }
   0x2   :  { %v565_v1 = vld [vmem:[%s784_s1 + $0xc0] sm:$0xff]   ;;  %507 = vmatprep.subr.bf16.mxu0 %v564_v0  ;;  %v569_v5 = vld [vmem:[%s784_s1 + $0xc8] sm:$0xff]   ;;  %v573_v9 = vld [vmem:[%s784_s1 + $0xd0] sm:$0xff]   ;;  %426 = vst [vmem:[%s787_s4] sm:$0x1] %v608_v40 }
   0x3   :  { %v566_v2 = vld [vmem:[%s784_s1] sm:$0xff]   ;;  %535 = vmatprep.subr.bf16.mxu1 %v565_v1  ;;  %v570_v6 = vld [vmem:[%s784_s1 + $0x8] sm:$0xff]   ;;  %v574_v10 = vld [vmem:[%s784_s1 + $0x10] sm:$0xff]  }
   0x4   :  { %v567_v3 = vld [vmem:[%s784_s1 + $0x80] sm:$0xff]   ;;  %508 = vmatpush3.bf16.msra.mxu0 %v566_v2  ;;  %v571_v7 = vld [vmem:[%s784_s1 + $0x88] sm:$0xff]   ;;  %v575_v11 = vld [vmem:[%s784_s1 + $0x90] sm:$0xff]  }
   0x5   :  { %536 = vmatpush3.bf16.msra.mxu1 %v567_v3  ;;  %509 = vmatprep.subr.bf16.mxu0 %v568_v4  ;;  %v576_v12 = vld [vmem:[%s784_s1 + $0x58] sm:$0xff]   ;;  %v580_v16 = vld [vmem:[%s784_s1 + $0x60] sm:$0xff]   ;;  %v584_v20 = vld [vmem:[%s784_s1 + $0x68] sm:$0xff]  }
   0x6   :  { %537 = vmatprep.subr.bf16.mxu1 %v569_v5  ;;  %v577_v13 = vld [vmem:[%s784_s1 + $0xd8] sm:$0xff]   ;;  %v581_v17 = vld [vmem:[%s784_s1 + $0xe0] sm:$0xff]   ;;  %v585_v21 = vld [vmem:[%s784_s1 + $0xe8] sm:$0xff]  }
   0x7   :  { %v578_v14 = vld [vmem:[%s784_s1 + $0x18] sm:$0xff]   ;;  %v582_v18 = vld [vmem:[%s784_s1 + $0x20] sm:$0xff]   ;;  %v586_v22 = vld [vmem:[%s784_s1 + $0x28] sm:$0xff]  }
   0x8   :  { %510 = vmatpush3.bf16.msra.mxu0 %v570_v6  ;;  %v579_v15 = vld [vmem:[%s784_s1 + $0x98] sm:$0xff]   ;;  %v583_v19 = vld [vmem:[%s784_s1 + $0xa0] sm:$0xff]   ;;  %v587_v23 = vld [vmem:[%s784_s1 + $0xa8] sm:$0xff]  }
   0x9   :  { %538 = vmatpush3.bf16.msra.mxu1 %v571_v7  ;;  %511 = vmatprep.subr.bf16.mxu0 %v572_v8  ;;  %v588_v24 = vld [vmem:[%s784_s1 + $0x70] sm:$0xff]   ;;  %v592_v28 = vld [vmem:[%s784_s1 + $0x78] sm:$0xff]  }
   0xa   :  { %539 = vmatprep.subr.bf16.mxu1 %v573_v9  ;;  %v589_v25 = vld [vmem:[%s784_s1 + $0xf0] sm:$0xff]   ;;  %v593_v29 = vld [vmem:[%s784_s1 + $0xf8] sm:$0xff]  }
   0xb   :  { %v590_v26 = vld [vmem:[%s784_s1 + $0x30] sm:$0xff]   ;;  %v594_v30 = vld [vmem:[%s784_s1 + $0x38] sm:$0xff]  }
   0xc   :  { %512 = vmatpush3.bf16.msra.mxu0 %v574_v10  ;;  %v591_v27 = vld [vmem:[%s784_s1 + $0xb0] sm:$0xff]   ;;  %v595_v31 = vld [vmem:[%s784_s1 + $0xb8] sm:$0xff]  }
   0xd   :  { %540 = vmatpush3.bf16.msra.mxu1 %v575_v11  ;;  %513 = vmatprep.subr.bf16.mxu0 %v576_v12  ;;  %v596_v32 = vld [vmem:[%s785_s0] ss:$16 sps:$4 sm:$0xff]   ;;  %v598_v33 = vld [vmem:[%s785_s0 + $0x4] ss:$16 sps:$4 sm:$0xff]   ;;  %v599_v34 = vld [vmem:[%s785_s0 + $0x8] ss:$16 sps:$4 sm:$0xff]  }
   0xe   :  { %541 = vmatprep.subr.bf16.mxu1 %v577_v13  ;;  %v601_v35 = vld [vmem:[%s785_s0 + $0xc] ss:$16 sps:$4 sm:$0xff]   ;;  %351 = vmatprep.mubr.bf16.mxu0 %v598_v33  ;;  %v602_v36 = vld [vmem:[%s785_s0 + $0x24] ss:$16 sps:$4 sm:$0xff]   ;;  %v606_v38 = vld [vmem:[%s785_s0 + $0x20] ss:$16 sps:$4 sm:$0xff]  }
   0xf   :  { %400 = vmatprep.mubr.bf16.mxu1 %v601_v35  ;;  %v604_v37 = vld [vmem:[%s785_s0 + $0x2c] ss:$16 sps:$4 sm:$0xff]   ;;  %v607_v39 = vld [vmem:[%s785_s0 + $0x28] ss:$16 sps:$4 sm:$0xff]  }
  0x10   :  { %514 = vmatpush3.bf16.msra.mxu0 %v578_v14 }
  0x11   :  { %542 = vmatpush3.bf16.msra.mxu1 %v579_v15  ;;  %515 = vmatprep.subr.bf16.mxu0 %v580_v16 }
  0x12   :  { %543 = vmatprep.subr.bf16.mxu1 %v581_v17 }
  0x14   :  { %516 = vmatpush3.bf16.msra.mxu0 %v582_v18 }
  0x15   :  { %544 = vmatpush3.bf16.msra.mxu1 %v583_v19  ;;  %517 = vmatprep.subr.bf16.mxu0 %v584_v20 }
  0x16   :  { %545 = vmatprep.subr.bf16.mxu1 %v585_v21 }
  0x18   :  { %518 = vmatpush3.bf16.msra.mxu0 %v586_v22 }
  0x19   :  { %546 = vmatpush3.bf16.msra.mxu1 %v587_v23  ;;  %519 = vmatprep.subr.bf16.mxu0 %v588_v24  ;;  %v427_v24 = vld [vmem:[%s786_s3] sm:$0x1] }
  0x1a   :  { %547 = vmatprep.subr.bf16.mxu1 %v589_v25 }
  0x1c   :  { %520 = vmatpush3.bf16.msra.mxu0 %v590_v26 }
  0x1d   :  { %548 = vmatpush3.bf16.msra.mxu1 %v591_v27  ;;  %521 = vmatprep.subr.bf16.mxu0 %v592_v28  ;;  %v439_v27 = vld [vmem:[%s787_s4] sm:$0x1] }
  0x1e   :  { %549 = vmatprep.subr.bf16.mxu1 %v593_v29 }
  0x20   :  { %522 = vmatpush3.bf16.msra.mxu0 %v594_v30 }
  0x21   :  { %550 = vmatpush3.bf16.msra.mxu1 %v595_v31 }
  0x23   :  { %352 = vmatmul.mubr.bf16.vlgmr.msra.gmra.mrb[0].mxu0 %v596_v32 }
  0x24   :  { %401 = vmatmul.mubr.bf16.vlgmr.msra.gmra.mrb[0].mxu1 %v599_v34  ;;  %359 = vmatprep.mubr.bf16.mxu0 %v602_v36 }
  0x25   :  { %408 = vmatprep.mubr.bf16.mxu1 %v604_v37 }
  0x2b   :  { %360 = vmatmul.mubr.bf16.gmra.mrb[4].mxu0 %v606_v38 }
  0x2c   :  { %409 = vmatmul.mubr.bf16.gmra.mrb[4].mxu1 %v607_v39 }
  0xf6   :  { %v523_v41 = vpop.f32.mrb[0].mxu0 }
  0xf7   :  { %v551_v42 = vpop.f32.mrb[0].mxu1  ;;  %v524_v43 = vpop.f32.mrb[1].mxu0 }
  0xf8   :  { %v525_v44 = vadd.f32 %v524_v43, %v523_v41  ;;  %v552_v45 = vpop.f32.mrb[1].mxu1  ;;  %v526_v46 = vpop.f32.mrb[2].mxu0 }
  0xf9   :  { %v553_v47 = vadd.f32 %v552_v45, %v551_v42  ;;  %v554_v48 = vpop.f32.mrb[2].mxu1  ;;  %v527_v49 = vpop.f32.mrb[3].mxu0 }
  0xfa   :  { %v528_v50 = vadd.f32 %v527_v49, %v526_v46  ;;  %v555_v51 = vpop.f32.mrb[3].mxu1 }
  0xfb   :  { %v403_v52 = vadd.f32 %v553_v47, %v525_v44  ;;  %v556_v53 = vadd.f32 %v555_v51, %v554_v48 }
  0xfd   :  { %417 = vst [vmem:[%s788_s2] sm:$0xff] %v403_v52  ;;  %v406_v54 = vadd.f32 %v556_v53, %v528_v50  ;;  %v440_v56 = vmul.f32 %v403_v52, %v403_v52 }
  0xfe   :  { %v529_v55 = vpop.f32.mrb[4].mxu0 }
  0xff   :  { %418 = vst [vmem:[%s788_s2 + $0x8] sm:$0xff] %v406_v54  ;;  %v428_v57 = vadd.f32 %v406_v54, %v403_v52  ;;  %v441_v58 = vmul.f32 %v406_v54, %v406_v54  ;;  %v557_v59 = vpop.f32.mrb[4].mxu1  ;;  %v530_v60 = vpop.f32.mrb[5].mxu0 }
 0x100   :  { %v531_v61 = vadd.f32 %v530_v60, %v529_v55  ;;  %v558_v62 = vpop.f32.mrb[5].mxu1  ;;  %v532_v63 = vpop.f32.mrb[6].mxu0 }
 0x101   :  { %v444_v0 = vadd.f32 %v441_v58, %v440_v56  ;;  %v559_v1 = vadd.f32 %v558_v62, %v557_v59  ;;  %v560_v2 = vpop.f32.mrb[6].mxu1  ;;  %v533_v3 = vpop.f32.mrb[7].mxu0 }
 0x102   :  { %v534_v4 = vadd.f32 %v533_v3, %v532_v63  ;;  %v561_v5 = vpop.f32.mrb[7].mxu1 }
 0x103   :  { %v411_v6 = vadd.f32 %v559_v1, %v531_v61  ;;  %v562_v7 = vadd.f32 %v561_v5, %v560_v2 }
 0x105   :  { %419 = vst [vmem:[%s788_s2 + $0x10] sm:$0xff] %v411_v6  ;;  %v429_v8 = vadd.f32 %v428_v57, %v411_v6  ;;  %v442_v9 = vmul.f32 %v411_v6, %v411_v6  ;;  %v414_v10 = vadd.f32 %v562_v7, %v534_v4 }
 0x107   :  { %v445_v11 = vadd.f32 %v444_v0, %v442_v9  ;;  %420 = vst [vmem:[%s788_s2 + $0x18] sm:$0xff] %v414_v10  ;;  %v430_v12 = vadd.f32 %v429_v8, %v414_v10  ;;  %v443_v13 = vmul.f32 %v414_v10, %v414_v10 }
 0x109   :  { %v431_v14 = vrot.slane %v430_v12, 4  ;;  %v446_v15 = vadd.f32 %v445_v11, %v443_v13 }
 0x10b   :  { %v432_v16 = vadd.f32 %v431_v14, %v430_v12  ;;  %v447_v17 = vrot.slane %v446_v15, 4 }
 0x10d   :  { %v433_v18 = vrot.slane %v432_v16, 2  ;;  %v448_v19 = vadd.f32 %v447_v17, %v446_v15 }
 0x10f   :  { %v434_v20 = vadd.f32 %v433_v18, %v432_v16  ;;  %v449_v21 = vrot.slane %v448_v19, 2 }
 0x111   :  { %v435_v22 = vrot.slane %v434_v20, 1  ;;  %v450_v23 = vadd.f32 %v449_v21, %v448_v19 }
 0x113   :  { %v436_v25 = vadd.f32 %v435_v22, %v434_v20  ;;  %v451_v26 = vrot.slane %v450_v23, 1 }
 0x115   :  { %v437_v28 = vadd.f32 %v436_v25, %v427_v24  ;;  %v452_v29 = vadd.f32 %v451_v26, %v450_v23 }
 0x117   :  { %438 = vst [vmem:[%s786_s3] sm:$0x1] %v437_v28  ;;  %v453_v30 = vadd.f32 %v452_v29, %v439_v27 }
 0x119   :  { %454 = vst [vmem:[%s787_s4] sm:$0x1] %v453_v30 }

// kernel: discriminator_forward.14
= control target key start
LH: loop header
LB: loop body
LE: loop exit
PB: predicated region body
PF: predicated region fallthrough
CT: control target
= control target key end

     0   :  { %s112_s0 = inlined_call_operand.vmem [shape: f32[32,128], index: 0, kind: input, shape index: {}]   ;;  %s113_s1 = inlined_call_operand.vmem [shape: f32[1,128], index: 1, kind: input, shape index: {}]   ;;  %s114_s2 = inlined_call_operand.vmem [shape: f32[1,128], index: 2, kind: input, shape index: {}]   ;;  %s115_s3 = inlined_call_operand.vmem [shape: f32[32,128], index: 3, kind: output, shape index: {}]  }
   0x1   :  { %v14_v0 = vld [vmem:[%s112_s0] sm:$0xff]  ;;  %v15_v4 = vld [vmem:[%s112_s0 + $0x8] sm:$0xff]  ;;  %v16_v5 = vld [vmem:[%s112_s0 + $0x10] sm:$0xff] }
   0x2   :  { %v60_v1 = vld [vmem:[%s113_s1] ss:$0 sm:$0xff]  ;;  %v17_v6 = vld [vmem:[%s112_s0 + $0x18] sm:$0xff] }
   0x3   :  { %v61_v2 = vld [vmem:[%s114_s2] ss:$0 sm:$0xff]  ;;  %v25_v3 = vmul.f32 %v60_v1, %v14_v0  ;;  %v26_v7 = vmul.f32 %v60_v1, %v15_v4  ;;  %v27_v8 = vmul.f32 %v60_v1, %v16_v5  ;;  %v28_v9 = vmul.f32 %v60_v1, %v17_v6 }
   0x5   :  { %v36_v10 = vadd.f32 %v61_v2, %v25_v3  ;;  %v37_v11 = vadd.f32 %v61_v2, %v26_v7  ;;  %v38_v12 = vadd.f32 %v61_v2, %v27_v8  ;;  %v39_v13 = vadd.f32 %v61_v2, %v28_v9 }
   0x7   :  { %vm40_vm0 = vcmp.gt.f32.partialorder %v36_v10, 0.0  ;;  %v44_v14 = vmul.f32 0.2, %v36_v10  ;;  %vm41_vm1 = vcmp.gt.f32.partialorder %v37_v11, 0.0  ;;  %v45_v15 = vmul.f32 0.2, %v37_v11 }
   0x8   :  { %vm42_vm2 = vcmp.gt.f32.partialorder %v38_v12, 0.0  ;;  %v46_v16 = vmul.f32 0.2, %v38_v12  ;;  %vm43_vm3 = vcmp.gt.f32.partialorder %v39_v13, 0.0  ;;  %v47_v18 = vmul.f32 0.2, %v39_v13 }
   0x9   :  { %v48_v17 = vsel %vm40_vm0, %v36_v10, %v44_v14  ;;  %v49_v19 = vsel %vm41_vm1, %v37_v11, %v45_v15 }
   0xa   :  { %52 = vst [vmem:[%s115_s3] sm:$0xff] %v48_v17  ;;  %v50_v20 = vsel %vm42_vm2, %v38_v12, %v46_v16  ;;  %53 = vst [vmem:[%s115_s3 + $0x8] sm:$0xff] %v49_v19  ;;  %v51_v21 = vsel %vm43_vm3, %v39_v13, %v47_v18 }
   0xb   :  { %54 = vst [vmem:[%s115_s3 + $0x10] sm:$0xff] %v50_v20  ;;  %55 = vst [vmem:[%s115_s3 + $0x18] sm:$0xff] %v51_v21 }

// kernel: discriminator_forward.15
= control target key start
LH: loop header
LB: loop body
LE: loop exit
PB: predicated region body
PF: predicated region fallthrough
CT: control target
= control target key end

     0   :  { %s1175_s1 = inlined_call_operand.vmem [shape: bf16[1024,128], index: 1, kind: input, shape index: {}]   ;;  %s1176_s0 = inlined_call_operand.vmem [shape: bf16[8,1024], index: 0, kind: input, shape index: {}]   ;;  %s1177_s2 = inlined_call_operand.vmem [shape: f32[8,128], index: 2, kind: output, shape index: {}]  }
   0x1   :  { %v881_v0 = vld [vmem:[%s1175_s1 + $0x40] sm:$0xff]   ;;  %v885_v4 = vld [vmem:[%s1175_s1 + $0x48] sm:$0xff]   ;;  %v889_v8 = vld [vmem:[%s1175_s1 + $0x50] sm:$0xff]  }
   0x2   :  { %v882_v1 = vld [vmem:[%s1175_s1 + $0xc0] sm:$0xff]   ;;  %793 = vmatprep.subr.bf16.mxu0 %v881_v0  ;;  %v886_v5 = vld [vmem:[%s1175_s1 + $0xc8] sm:$0xff]   ;;  %v890_v9 = vld [vmem:[%s1175_s1 + $0xd0] sm:$0xff]  }
   0x3   :  { %v883_v2 = vld [vmem:[%s1175_s1] sm:$0xff]   ;;  %815 = vmatprep.subr.bf16.mxu1 %v882_v1  ;;  %v887_v6 = vld [vmem:[%s1175_s1 + $0x8] sm:$0xff]   ;;  %v891_v10 = vld [vmem:[%s1175_s1 + $0x10] sm:$0xff]  }
   0x4   :  { %v884_v3 = vld [vmem:[%s1175_s1 + $0x80] sm:$0xff]   ;;  %794 = vmatpush3.bf16.msra.mxu0 %v883_v2  ;;  %v888_v7 = vld [vmem:[%s1175_s1 + $0x88] sm:$0xff]   ;;  %v892_v11 = vld [vmem:[%s1175_s1 + $0x90] sm:$0xff]  }
   0x5   :  { %816 = vmatpush3.bf16.msra.mxu1 %v884_v3  ;;  %795 = vmatprep.subr.bf16.mxu0 %v885_v4  ;;  %v893_v12 = vld [vmem:[%s1175_s1 + $0x58] sm:$0xff]   ;;  %v897_v16 = vld [vmem:[%s1175_s1 + $0x60] sm:$0xff]   ;;  %v901_v20 = vld [vmem:[%s1175_s1 + $0x68] sm:$0xff]  }
   0x6   :  { %817 = vmatprep.subr.bf16.mxu1 %v886_v5  ;;  %v894_v13 = vld [vmem:[%s1175_s1 + $0xd8] sm:$0xff]   ;;  %v898_v17 = vld [vmem:[%s1175_s1 + $0xe0] sm:$0xff]   ;;  %v902_v21 = vld [vmem:[%s1175_s1 + $0xe8] sm:$0xff]  }
   0x7   :  { %v895_v14 = vld [vmem:[%s1175_s1 + $0x18] sm:$0xff]   ;;  %v899_v18 = vld [vmem:[%s1175_s1 + $0x20] sm:$0xff]   ;;  %v903_v22 = vld [vmem:[%s1175_s1 + $0x28] sm:$0xff]  }
   0x8   :  { %796 = vmatpush3.bf16.msra.mxu0 %v887_v6  ;;  %v896_v15 = vld [vmem:[%s1175_s1 + $0x98] sm:$0xff]   ;;  %v900_v19 = vld [vmem:[%s1175_s1 + $0xa0] sm:$0xff]   ;;  %v904_v23 = vld [vmem:[%s1175_s1 + $0xa8] sm:$0xff]  }
   0x9   :  { %818 = vmatpush3.bf16.msra.mxu1 %v888_v7  ;;  %797 = vmatprep.subr.bf16.mxu0 %v889_v8  ;;  %v905_v24 = vld [vmem:[%s1175_s1 + $0x70] sm:$0xff]   ;;  %v909_v28 = vld [vmem:[%s1175_s1 + $0x78] sm:$0xff]   ;;  %v12_v32 = vld [vmem:[%s1176_s0] sm:$0xff] }
   0xa   :  { %819 = vmatprep.subr.bf16.mxu1 %v890_v9  ;;  %v906_v25 = vld [vmem:[%s1175_s1 + $0xf0] sm:$0xff]   ;;  %v910_v29 = vld [vmem:[%s1175_s1 + $0xf8] sm:$0xff]   ;;  %v13_v33 = vld [vmem:[%s1176_s0 + $0x8] sm:$0xff]  ;;  %v721_v34 = vcombine.low %v12_v32, %v12_v32  ;;  %v722_v35 = vcombine.high %v12_v32, %v12_v32 }
   0xb   :  { %v907_v26 = vld [vmem:[%s1175_s1 + $0x30] sm:$0xff]   ;;  %v911_v30 = vld [vmem:[%s1175_s1 + $0x38] sm:$0xff]   ;;  %v723_v36 = vcombine.low %v13_v33, %v13_v33  ;;  %v724_v37 = vcombine.high %v13_v33, %v13_v33  ;;  %v917_v38 = vld [vmem:[%s1175_s1 + $0x140] sm:$0xff]  }
   0xc   :  { %798 = vmatpush3.bf16.msra.mxu0 %v891_v10  ;;  %v908_v27 = vld [vmem:[%s1175_s1 + $0xb0] sm:$0xff]   ;;  %v912_v31 = vld [vmem:[%s1175_s1 + $0xb8] sm:$0xff]   ;;  %v918_v39 = vld [vmem:[%s1175_s1 + $0x1c0] sm:$0xff]   ;;  %588 = vmatprep.mubr.bf16.mxu0 %v722_v35 }
   0xd   :  { %820 = vmatpush3.bf16.msra.mxu1 %v892_v11  ;;  %799 = vmatprep.subr.bf16.mxu0 %v893_v12  ;;  %v919_v40 = vld [vmem:[%s1175_s1 + $0x100] sm:$0xff]   ;;  %v921_v42 = vld [vmem:[%s1175_s1 + $0x148] sm:$0xff]   ;;  %v925_v46 = vld [vmem:[%s1175_s1 + $0x150] sm:$0xff]  }
   0xe   :  { %821 = vmatprep.subr.bf16.mxu1 %v894_v13  ;;  %628 = vmatprep.mubr.bf16.mxu1 %v724_v37  ;;  %v920_v41 = vld [vmem:[%s1175_s1 + $0x180] sm:$0xff]   ;;  %v922_v43 = vld [vmem:[%s1175_s1 + $0x1c8] sm:$0xff]   ;;  %v926_v47 = vld [vmem:[%s1175_s1 + $0x1d0] sm:$0xff]  }
   0xf   :  { %v923_v44 = vld [vmem:[%s1175_s1 + $0x108] sm:$0xff]   ;;  %v927_v48 = vld [vmem:[%s1175_s1 + $0x110] sm:$0xff]   ;;  %v929_v50 = vld [vmem:[%s1175_s1 + $0x158] sm:$0xff]  }
  0x10   :  { %800 = vmatpush3.bf16.msra.mxu0 %v895_v14  ;;  %v924_v45 = vld [vmem:[%s1175_s1 + $0x188] sm:$0xff]   ;;  %v928_v49 = vld [vmem:[%s1175_s1 + $0x190] sm:$0xff]   ;;  %v930_v51 = vld [vmem:[%s1175_s1 + $0x1d8] sm:$0xff]  }
  0x11   :  { %822 = vmatpush3.bf16.msra.mxu1 %v896_v15  ;;  %801 = vmatprep.subr.bf16.mxu0 %v897_v16  ;;  %v931_v52 = vld [vmem:[%s1175_s1 + $0x118] sm:$0xff]   ;;  %v933_v54 = vld [vmem:[%s1175_s1 + $0x160] sm:$0xff]   ;;  %v937_v58 = vld [vmem:[%s1175_s1 + $0x168] sm:$0xff]  }
  0x12   :  { %823 = vmatprep.subr.bf16.mxu1 %v898_v17  ;;  %v932_v53 = vld [vmem:[%s1175_s1 + $0x198] sm:$0xff]   ;;  %v934_v55 = vld [vmem:[%s1175_s1 + $0x1e0] sm:$0xff]   ;;  %v938_v59 = vld [vmem:[%s1175_s1 + $0x1e8] sm:$0xff]  }
  0x13   :  { %v935_v56 = vld [vmem:[%s1175_s1 + $0x120] sm:$0xff]   ;;  %v939_v60 = vld [vmem:[%s1175_s1 + $0x128] sm:$0xff]   ;;  %v941_v62 = vld [vmem:[%s1175_s1 + $0x170] sm:$0xff]  }
  0x14   :  { %802 = vmatpush3.bf16.msra.mxu0 %v899_v18  ;;  %v936_v57 = vld [vmem:[%s1175_s1 + $0x1a0] sm:$0xff]   ;;  %v940_v61 = vld [vmem:[%s1175_s1 + $0x1a8] sm:$0xff]   ;;  %v942_v63 = vld [vmem:[%s1175_s1 + $0x1f0] sm:$0xff]  }
  0x15   :  { %824 = vmatpush3.bf16.msra.mxu1 %v900_v19  ;;  %803 = vmatprep.subr.bf16.mxu0 %v901_v20  ;;  %v943_v0 = vld [vmem:[%s1175_s1 + $0x130] sm:$0xff]   ;;  %v945_v2 = vld [vmem:[%s1175_s1 + $0x178] sm:$0xff]  }
  0x16   :  { %825 = vmatprep.subr.bf16.mxu1 %v902_v21  ;;  %v944_v1 = vld [vmem:[%s1175_s1 + $0x1b0] sm:$0xff]   ;;  %v946_v3 = vld [vmem:[%s1175_s1 + $0x1f8] sm:$0xff]  }
  0x17   :  { %v947_v4 = vld [vmem:[%s1175_s1 + $0x138] sm:$0xff]   ;;  %v14_v6 = vld [vmem:[%s1176_s0 + $0x10] sm:$0xff] }
  0x18   :  { %804 = vmatpush3.bf16.msra.mxu0 %v903_v22  ;;  %v948_v5 = vld [vmem:[%s1175_s1 + $0x1b8] sm:$0xff]   ;;  %v725_v7 = vcombine.low %v14_v6, %v14_v6  ;;  %v726_v8 = vcombine.high %v14_v6, %v14_v6 }
  0x19   :  { %826 = vmatpush3.bf16.msra.mxu1 %v904_v23  ;;  %805 = vmatprep.subr.bf16.mxu0 %v905_v24  ;;  %v15_v9 = vld [vmem:[%s1176_s0 + $0x18] sm:$0xff] }
  0x1a   :  { %827 = vmatprep.subr.bf16.mxu1 %v906_v25  ;;  %v727_v10 = vcombine.low %v15_v9, %v15_v9  ;;  %v728_v11 = vcombine.high %v15_v9, %v15_v9 }
  0x1c   :  { %806 = vmatpush3.bf16.msra.mxu0 %v907_v26 }
  0x1d   :  { %828 = vmatpush3.bf16.msra.mxu1 %v908_v27  ;;  %807 = vmatprep.subr.bf16.mxu0 %v909_v28 }
  0x1e   :  { %829 = vmatprep.subr.bf16.mxu1 %v910_v29 }
  0x20   :  { %808 = vmatpush3.bf16.msra.mxu0 %v911_v30 }
  0x21   :  { %830 = vmatpush3.bf16.msra.mxu1 %v912_v31  ;;  %837 = vmatprep.subr.bf16.mxu0 %v917_v38 }
  0x22   :  { %859 = vmatprep.subr.bf16.mxu1 %v918_v39 }
  0x23   :  { %589 = vmatmul.mubr.bf16.vlgmr.msra.gmra.mrb[0].mxu0 %v721_v34 }
  0x24   :  { %629 = vmatmul.mubr.bf16.vlgmr.msra.gmra.mrb[0].mxu1 %v723_v36  ;;  %838 = vmatpush3.bf16.msra.mxu0 %v919_v40 }
  0x25   :  { %860 = vmatpush3.bf16.msra.mxu1 %v920_v41  ;;  %839 = vmatprep.subr.bf16.mxu0 %v921_v42 }
  0x26   :  { %861 = vmatprep.subr.bf16.mxu1 %v922_v43  ;;  %668 = vmatprep.mubr.bf16.mxu0 %v726_v8 }
  0x27   :  { %708 = vmatprep.mubr.bf16.mxu1 %v728_v11 }
  0x28   :  { %840 = vmatpush3.bf16.msra.mxu0 %v923_v44 }
  0x29   :  { %862 = vmatpush3.bf16.msra.mxu1 %v924_v45  ;;  %841 = vmatprep.subr.bf16.mxu0 %v925_v46 }
  0x2a   :  { %863 = vmatprep.subr.bf16.mxu1 %v926_v47 }
  0x2c   :  { %842 = vmatpush3.bf16.msra.mxu0 %v927_v48 }
  0x2d   :  { %864 = vmatpush3.bf16.msra.mxu1 %v928_v49  ;;  %843 = vmatprep.subr.bf16.mxu0 %v929_v50 }
  0x2e   :  { %865 = vmatprep.subr.bf16.mxu1 %v930_v51 }
  0x30   :  { %844 = vmatpush3.bf16.msra.mxu0 %v931_v52 }
  0x31   :  { %866 = vmatpush3.bf16.msra.mxu1 %v932_v53  ;;  %845 = vmatprep.subr.bf16.mxu0 %v933_v54 }
  0x32   :  { %867 = vmatprep.subr.bf16.mxu1 %v934_v55 }
  0x34   :  { %846 = vmatpush3.bf16.msra.mxu0 %v935_v56 }
  0x35   :  { %868 = vmatpush3.bf16.msra.mxu1 %v936_v57  ;;  %847 = vmatprep.subr.bf16.mxu0 %v937_v58 }
  0x36   :  { %869 = vmatprep.subr.bf16.mxu1 %v938_v59 }
  0x38   :  { %848 = vmatpush3.bf16.msra.mxu0 %v939_v60 }
  0x39   :  { %870 = vmatpush3.bf16.msra.mxu1 %v940_v61  ;;  %849 = vmatprep.subr.bf16.mxu0 %v941_v62 }
  0x3a   :  { %871 = vmatprep.subr.bf16.mxu1 %v942_v63 }
  0x3c   :  { %850 = vmatpush3.bf16.msra.mxu0 %v943_v0 }
  0x3d   :  { %872 = vmatpush3.bf16.msra.mxu1 %v944_v1  ;;  %851 = vmatprep.subr.bf16.mxu0 %v945_v2 }
  0x3e   :  { %873 = vmatprep.subr.bf16.mxu1 %v946_v3 }
  0x40   :  { %852 = vmatpush3.bf16.msra.mxu0 %v947_v4 }
  0x41   :  { %874 = vmatpush3.bf16.msra.mxu1 %v948_v5 }
  0x43   :  { %669 = vmatmul.mubr.bf16.vlgmr.msra.gmra.mrb[4].mxu0 %v725_v7 }
  0x44   :  { %709 = vmatmul.mubr.bf16.vlgmr.msra.gmra.mrb[4].mxu1 %v727_v10 }
  0xf6   :  { %v809_v12 = vpop.f32.mrb[0].mxu0 }
  0xf7   :  { %v831_v13 = vpop.f32.mrb[0].mxu1  ;;  %v810_v14 = vpop.f32.mrb[1].mxu0 }
  0xf8   :  { %v832_v15 = vpop.f32.mrb[1].mxu1  ;;  %v811_v16 = vadd.f32 %v810_v14, %v809_v12  ;;  %v812_v18 = vpop.f32.mrb[2].mxu0 }
  0xf9   :  { %v833_v17 = vadd.f32 %v832_v15, %v831_v13  ;;  %v834_v19 = vpop.f32.mrb[2].mxu1  ;;  %v813_v20 = vpop.f32.mrb[3].mxu0 }
  0xfa   :  { %v835_v21 = vpop.f32.mrb[3].mxu1 }
  0xfb   :  { %v631_v22 = vadd.f32 %v833_v17, %v811_v16 }
 0x116   :  { %v853_v23 = vpop.f32.mrb[4].mxu0 }
 0x117   :  { %v875_v24 = vpop.f32.mrb[4].mxu1  ;;  %v854_v25 = vpop.f32.mrb[5].mxu0 }
 0x118   :  { %v876_v26 = vpop.f32.mrb[5].mxu1  ;;  %v855_v27 = vadd.f32 %v854_v25, %v853_v23  ;;  %v856_v29 = vpop.f32.mrb[6].mxu0 }
 0x119   :  { %v877_v28 = vadd.f32 %v876_v26, %v875_v24  ;;  %v878_v30 = vpop.f32.mrb[6].mxu1  ;;  %v857_v31 = vpop.f32.mrb[7].mxu0 }
 0x11a   :  { %v879_v32 = vpop.f32.mrb[7].mxu1  ;;  %v671_v33 = vadd.f32 %v855_v27, %v631_v22 }
 0x11c   :  { %v711_v34 = vadd.f32 %v877_v28, %v671_v33 }
 0x11e   :  { %716 = vst [vmem:[%s1177_s2] sm:$0xff] %v711_v34 }

</bundles_post_ra>
